<compile_context>
chip_gen: v6e
topology: v6e:2x2x1
jax: 0.10.0
libtpu: 0.0.40
codegen_flags: <defaults>
</compile_context>

<pallas_src>
from functools import partial

import numpy as np
import jax
import jax.numpy as jnp
from jax import lax
from jax.experimental import pallas as pl
from jax.experimental.pallas import tpu as pltpu

EPS = 1e-5  # nn.BatchNorm2d default eps


# ------------------------------------------------------------------ fused generator kernel
def _generator_kernel(z_ref,
                      m1, s1, r1, c1, g1, b1,
                      m2, s2, r2, c2, g2, b2,
                      m3, s3, r3, c3, g3, b3,
                      m4, s4,
                      out_ref):
    """Entire generator forward pass. Activations are 2-D (n*h, w*c) values in VMEM/vregs."""

    def deconv(act_f32, m_ref, s_ref):
        # ConvTranspose2d(k=4) as: sum_kh S[kh] @ (act @ M[kh]).  bf16 MXU operands for the
        # wide (K = w_in*ic) matmul, f32 accumulation; the 0/1 row-placement matmul stays f32.
        a16 = act_f32.astype(jnp.bfloat16)
        acc = None
        for kh in range(m_ref.shape[0]):
            u = jnp.dot(a16, m_ref[kh], preferred_element_type=jnp.float32)
            t = jnp.dot(s_ref[kh], u, preferred_element_type=jnp.float32)
            acc = t if acc is None else acc + t
        return acc

    def bn_relu(x, red_ref, bc_ref, gamma_ref, beta_ref):
        # Training-mode BatchNorm2d (biased batch stats over N,H,W), single pass:
        #   red_ref  (w*c, c): sums over the w-groups and divides by N*H*W  -> per-channel stat
        #   bc_ref   (c, w*c): broadcasts the per-channel stat back over w
        s = jnp.sum(x, axis=0, keepdims=True)
        sq = jnp.sum(x * x, axis=0, keepdims=True)
        mean_c = jnp.dot(s, red_ref[...], preferred_element_type=jnp.float32)
        ex2_c = jnp.dot(sq, red_ref[...], preferred_element_type=jnp.float32)
        mean = jnp.dot(mean_c, bc_ref[...], preferred_element_type=jnp.float32)
        ex2 = jnp.dot(ex2_c, bc_ref[...], preferred_element_type=jnp.float32)
        var = ex2 - mean * mean
        y = (x - mean) * lax.rsqrt(var + EPS) * gamma_ref[...] + beta_ref[...]
        return jnp.maximum(y, 0.0)

    a = bn_relu(deconv(z_ref[...], m1, s1), r1, c1, g1, b1)   # (N*4,  4*2*ngf*4) fused branches
    a = bn_relu(deconv(a, m2, s2), r2, c2, g2, b2)            # (N*8,  8*ngf*4)
    a = bn_relu(deconv(a, m3, s3), r3, c3, g3, b3)            # (N*16, 16*ngf*2)
    out_ref[...] = jnp.tanh(deconv(a, m4, s4))                # (N*32, pad128(32*nc))


def _run_generator_kernel(z, p):
    ops = [z,
           p["m1"], p["s1"], p["r1"], p["c1"], p["g1"], p["b1"],
           p["m2"], p["s2"], p["r2"], p["c2"], p["g2"], p["b2"],
           p["m3"], p["s3"], p["r3"], p["c3"], p["g3"], p["b3"],
           p["m4"], p["s4"]]
    out_rows = p["s4"].shape[1]
    out_cols = p["m4"].shape[2]        # already padded to a multiple of 128

    def full_spec(a):
        nd = a.ndim
        return pl.BlockSpec(a.shape, lambda i, _nd=nd: (0,) * _nd)

    return pl.pallas_call(
        _generator_kernel,
        out_shape=jax.ShapeDtypeStruct((out_rows, out_cols), jnp.float32),
        grid=(1,),
        in_specs=[full_spec(a) for a in ops],
        out_specs=pl.BlockSpec((out_rows, out_cols), lambda i: (0, 0)),
        compiler_params=pltpu.CompilerParams(dimension_semantics=("arbitrary",)),
    )(*ops)


# ------------------------------------------------------------------ one-time host-side prep
def _deconv_mats(w_np, H, W, stride, pad, batch):
    """Lower PyTorch ConvTranspose2d weight (IC, OC, KH, KW) to the (M[kh], S[kh]) pair
    acting on 2-D activations A[(n*H+ih), (iw*IC+ic)]:
        out[(n*OH+oh), (ow*OC+oc)] = sum_kh S[kh] @ (A @ M[kh]).
    """
    IC, OC, KH, KW = w_np.shape
    OH = (H - 1) * stride - 2 * pad + KH
    OW = (W - 1) * stride - 2 * pad + KW
    M = np.zeros((KH, W * IC, OW * OC), np.float32)
    for kh in range(KH):
        for iw in range(W):
            for kw in range(KW):
                ow = iw * stride + kw - pad
                if 0 <= ow < OW:
                    M[kh, iw * IC:(iw + 1) * IC, ow * OC:(ow + 1) * OC] += w_np[:, :, kh, kw]
    S = np.zeros((KH, batch * OH, batch * H), np.float32)
    for kh in range(KH):
        for ih in range(H):
            oh = ih * stride + kh - pad
            if 0 <= oh < OH:
                for n in range(batch):
                    S[kh, n * OH + oh, n * H + ih] = 1.0
    return M, S, OH, OW


def prepare_params(params, batch):
    """One-time weight preprocessing (hoisted out of the forward pass)."""
    f32 = np.float32
    w11 = np.asarray(params["w1_1"], f32)          # (nz, ngf*4, 4, 4)
    w12 = np.asarray(params["w1_2"], f32)          # (num_classes, ngf*4, 4, 4)
    nz, c1 = w11.shape[0], w11.shape[1]
    ncls = w12.shape[0]

    # fused block-diagonal first layer: channels = [branch1 | branch2]
    wf = np.zeros((nz + ncls, 2 * c1, 4, 4), f32)
    wf[:nz, :c1] = w11
    wf[nz:, c1:] = w12
    gf = np.concatenate([np.asarray(params["g1_1"], f32), np.asarray(params["g1_2"], f32)])
    bf = np.concatenate([np.asarray(params["b1_1"], f32), np.asarray(params["b1_2"], f32)])

    layers = [
        ("1", wf, gf, bf, 1, 1, 0),
        ("2", np.asarray(params["wm1"], f32), np.asarray(params["gm1"], f32),
         np.asarray(params["bm1"], f32), 4, 2, 1),
        ("3", np.asarray(params["wm2"], f32), np.asarray(params["gm2"], f32),
         np.asarray(params["bm2"], f32), 8, 2, 1),
        ("4", np.asarray(params["wm3"], f32), None, None, 16, 2, 1),
    ]
    prepared = {}
    for name, w, g, b, hin, stride, pad in layers:
        M, S, OH, OW = _deconv_mats(w, hin, hin, stride, pad, batch)
        if g is None:
            # Final layer: zero-pad output columns to a multiple of 128 so the kernel's only
            # output store is lane-dense (unmasked vst); pad is sliced off in the wrapper.
            pad_cols = (-M.shape[2]) % 128
            if pad_cols:
                M = np.pad(M, ((0, 0), (0, 0), (0, pad_cols)))
        prepared["m" + name] = jnp.asarray(M, jnp.bfloat16)      # bf16 MXU operands
        prepared["s" + name] = jnp.asarray(S, jnp.float32)       # 0/1 placement, f32
        if g is not None:
            OC = w.shape[1]
            count = float(batch * OH * OW)
            red = np.tile(np.eye(OC, dtype=f32), (OW, 1)) / count   # (OW*OC, OC): sum + avg
            bc = np.tile(np.eye(OC, dtype=f32), (1, OW))            # (OC, OW*OC): broadcast
            prepared["r" + name] = jnp.asarray(red)
            prepared["c" + name] = jnp.asarray(bc)
            prepared["g" + name] = jnp.asarray(np.tile(g, OW)[None, :])
            prepared["b" + name] = jnp.asarray(np.tile(b, OW)[None, :])
    return prepared


# ------------------------------------------------------------------ params & forward
def init_params(key, nc=3, nz=16, ngf=8, num_classes=10):
    ks = jax.random.split(key, 9)

    def w(k, ic, oc):
        return 0.02 * jax.random.normal(k, (ic, oc, 4, 4), jnp.float32)

    def gb(k, c):
        kg, kb = jax.random.split(k)
        return (1.0 + 0.02 * jax.random.normal(kg, (c,), jnp.float32),
                0.02 * jax.random.normal(kb, (c,), jnp.float32))

    p = {}
    p["w1_1"] = w(ks[0], nz, ngf * 4)
    p["g1_1"], p["b1_1"] = gb(ks[1], ngf * 4)
    p["w1_2"] = w(ks[2], num_classes, ngf * 4)
    p["g1_2"], p["b1_2"] = gb(ks[3], ngf * 4)
    p["wm1"] = w(ks[4], ngf * 8, ngf * 4)
    p["gm1"], p["bm1"] = gb(ks[5], ngf * 4)
    p["wm2"] = w(ks[6], ngf * 4, ngf * 2)
    p["gm2"], p["bm2"] = gb(ks[7], ngf * 2)
    p["wm3"] = w(ks[8], ngf * 2, nc)
    return p


@partial(jax.jit, static_argnames=("num_classes", "nc"))
def generator_forward(prepared, x_nchw, y, num_classes=10, nc=3):
    """x: (N, nz, 1, 1), y: (N,) int labels -> (N, nc, 32, 32)."""
    N, nz = x_nchw.shape[0], x_nchw.shape[1]
    z = jnp.concatenate(
        [x_nchw.reshape(N, nz).astype(jnp.float32),
         jax.nn.one_hot(y.astype(jnp.int32), num_classes, dtype=jnp.float32)],
        axis=1)                                             # (N, nz + num_classes)
    out2d = _run_generator_kernel(z, prepared)              # (N*32, pad128(32*nc))
    img = out2d.shape[0] // N
    out2d = out2d[:, : img * nc]                            # drop lane padding
    return out2d.reshape(N, img, img, nc).transpose(0, 3, 1, 2)


# ------------------------------------------------------------------ pure-JAX reference
def _conv_transpose_ref(x_nchw, w, stride, pad):
    k = w.shape[2]
    rhs = jnp.flip(w, (2, 3)).transpose(1, 0, 2, 3)         # (OC, IC, kh, kw)
    return lax.conv_general_dilated(
        x_nchw, rhs, window_strides=(1, 1),
        padding=[(k - 1 - pad, k - 1 - pad)] * 2,
        lhs_dilation=(stride, stride),
        dimension_numbers=("NCHW", "OIHW", "NCHW"),
        precision=lax.Precision.HIGHEST)


def _bn_relu_ref(x, g, b):
    mean = x.mean(axis=(0, 2, 3), keepdims=True)
    var = ((x - mean) ** 2).mean(axis=(0, 2, 3), keepdims=True)
    y = (x - mean) * lax.rsqrt(var + EPS) * g[None, :, None, None] + b[None, :, None, None]
    return jnp.maximum(y, 0.0)


@partial(jax.jit, static_argnames=("num_classes",))
def generator_reference(params, x, y, num_classes=10):
    yoh = jax.nn.one_hot(y.astype(jnp.int32), num_classes, dtype=jnp.float32)
    yimg = yoh[:, :, None, None]
    h1 = _bn_relu_ref(_conv_transpose_ref(x, params["w1_1"], 1, 0),
                      params["g1_1"], params["b1_1"])
    h2 = _bn_relu_ref(_conv_transpose_ref(yimg, params["w1_2"], 1, 0),
                      params["g1_2"], params["b1_2"])
    h = jnp.concatenate([h1, h2], axis=1)
    h = _bn_relu_ref(_conv_transpose_ref(h, params["wm1"], 2, 1), params["gm1"], params["bm1"])
    h = _bn_relu_ref(_conv_transpose_ref(h, params["wm2"], 2, 1), params["gm2"], params["bm2"])
    return jnp.tanh(_conv_transpose_ref(h, params["wm3"], 2, 1))


# ------------------------------------------------------------------ main
if __name__ == "__main__":
    nc, nz, ngf, num_classes = 3, 16, 8, 10
    N = 2
    key = jax.random.PRNGKey(0)
    kp, kx, ky = jax.random.split(key, 3)

    params = init_params(kp, nc=nc, nz=nz, ngf=ngf, num_classes=num_classes)
    prepared = prepare_params(params, batch=N)                # one-time weight prep
    x = jax.random.normal(kx, (N, nz, 1, 1), jnp.float32)     # latent, NCHW like PyTorch
    y = jax.random.randint(ky, (N,), 0, num_classes)          # class labels

    out = generator_forward(prepared, x, y, num_classes=num_classes, nc=nc)
    out = jax.block_until_ready(out)

    assert out.shape == (N, nc, 32, 32), out.shape
    assert bool(jnp.all(jnp.isfinite(out)))
    assert bool(jnp.all(jnp.abs(out) <= 1.0 + 1e-6))          # tanh output range

    # correctness vs. a pure-JAX/XLA reference (f32); kernel uses bf16 MXU operands,
    # so allow a generous elementwise tolerance.
    ref = jax.block_until_ready(generator_reference(params, x, y, num_classes=num_classes))
    max_err = float(jnp.max(jnp.abs(out - ref)))
    assert max_err < 0.1, f"max |kernel - reference| = {max_err}"

    print("KERNEL_OK")
</pallas_src>

<mosaic_0001>
module attributes {stable_mosaic.version = 11 : i64} {
  func.func @_generator_kernel(%arg0: i32, %arg1: memref<2x26xf32, #tpu.memory_space<vmem>>, %arg2: memref<4x26x256xbf16, #tpu.memory_space<vmem>>, %arg3: memref<4x8x2xf32, #tpu.memory_space<vmem>>, %arg4: memref<256x64xf32, #tpu.memory_space<vmem>>, %arg5: memref<64x256xf32, #tpu.memory_space<vmem>>, %arg6: memref<1x256xf32, #tpu.memory_space<vmem>>, %arg7: memref<1x256xf32, #tpu.memory_space<vmem>>, %arg8: memref<4x256x256xbf16, #tpu.memory_space<vmem>>, %arg9: memref<4x16x8xf32, #tpu.memory_space<vmem>>, %arg10: memref<256x32xf32, #tpu.memory_space<vmem>>, %arg11: memref<32x256xf32, #tpu.memory_space<vmem>>, %arg12: memref<1x256xf32, #tpu.memory_space<vmem>>, %arg13: memref<1x256xf32, #tpu.memory_space<vmem>>, %arg14: memref<4x256x256xbf16, #tpu.memory_space<vmem>>, %arg15: memref<4x32x16xf32, #tpu.memory_space<vmem>>, %arg16: memref<256x16xf32, #tpu.memory_space<vmem>>, %arg17: memref<16x256xf32, #tpu.memory_space<vmem>>, %arg18: memref<1x256xf32, #tpu.memory_space<vmem>>, %arg19: memref<1x256xf32, #tpu.memory_space<vmem>>, %arg20: memref<4x256x128xbf16, #tpu.memory_space<vmem>>, %arg21: memref<4x64x32xf32, #tpu.memory_space<vmem>>, %arg22: memref<64x128xf32, #tpu.memory_space<vmem>>) attributes {dimension_semantics = [#tpu.dimension_semantics<arbitrary>], iteration_bounds = array<i64: 1>, scalar_prefetch = 0 : i64, scratch_operands = 0 : i64, tpu.core_type = #tpu.core_type<tc>, window_params = [{pipeline_mode = #tpu.pipeline_mode<synchronous>, transform_indices = @transform_0, window_bounds = array<i64: 2, 26>}, {pipeline_mode = #tpu.pipeline_mode<synchronous>, transform_indices = @transform_1, window_bounds = array<i64: 4, 26, 256>}, {pipeline_mode = #tpu.pipeline_mode<synchronous>, transform_indices = @transform_2, window_bounds = array<i64: 4, 8, 2>}, {pipeline_mode = #tpu.pipeline_mode<synchronous>, transform_indices = @transform_3, window_bounds = array<i64: 256, 64>}, {pipeline_mode = #tpu.pipeline_mode<synchronous>, transform_indices = @transform_4, window_bounds = array<i64: 64, 256>}, {pipeline_mode = #tpu.pipeline_mode<synchronous>, transform_indices = @transform_5, window_bounds = array<i64: 1, 256>}, {pipeline_mode = #tpu.pipeline_mode<synchronous>, transform_indices = @transform_6, window_bounds = array<i64: 1, 256>}, {pipeline_mode = #tpu.pipeline_mode<synchronous>, transform_indices = @transform_7, window_bounds = array<i64: 4, 256, 256>}, {pipeline_mode = #tpu.pipeline_mode<synchronous>, transform_indices = @transform_8, window_bounds = array<i64: 4, 16, 8>}, {pipeline_mode = #tpu.pipeline_mode<synchronous>, transform_indices = @transform_9, window_bounds = array<i64: 256, 32>}, {pipeline_mode = #tpu.pipeline_mode<synchronous>, transform_indices = @transform_10, window_bounds = array<i64: 32, 256>}, {pipeline_mode = #tpu.pipeline_mode<synchronous>, transform_indices = @transform_11, window_bounds = array<i64: 1, 256>}, {pipeline_mode = #tpu.pipeline_mode<synchronous>, transform_indices = @transform_12, window_bounds = array<i64: 1, 256>}, {pipeline_mode = #tpu.pipeline_mode<synchronous>, transform_indices = @transform_13, window_bounds = array<i64: 4, 256, 256>}, {pipeline_mode = #tpu.pipeline_mode<synchronous>, transform_indices = @transform_14, window_bounds = array<i64: 4, 32, 16>}, {pipeline_mode = #tpu.pipeline_mode<synchronous>, transform_indices = @transform_15, window_bounds = array<i64: 256, 16>}, {pipeline_mode = #tpu.pipeline_mode<synchronous>, transform_indices = @transform_16, window_bounds = array<i64: 16, 256>}, {pipeline_mode = #tpu.pipeline_mode<synchronous>, transform_indices = @transform_17, window_bounds = array<i64: 1, 256>}, {pipeline_mode = #tpu.pipeline_mode<synchronous>, transform_indices = @transform_18, window_bounds = array<i64: 1, 256>}, {pipeline_mode = #tpu.pipeline_mode<synchronous>, transform_indices = @transform_19, window_bounds = array<i64: 4, 256, 128>}, {pipeline_mode = #tpu.pipeline_mode<synchronous>, transform_indices = @transform_20, window_bounds = array<i64: 4, 64, 32>}, {pipeline_mode = #tpu.pipeline_mode<synchronous>, transform_indices = @transform_21, window_bounds = array<i64: 64, 128>}]} {
    %c0 = arith.constant 0 : index
    %c0_0 = arith.constant 0 : index
    %0 = vector.load %arg1[%c0, %c0_0] : memref<2x26xf32, #tpu.memory_space<vmem>>, vector<2x26xf32>
    %1 = arith.truncf %0 : vector<2x26xf32> to vector<2x26xbf16>
    %c0_1 = arith.constant 0 : index
    %c0_2 = arith.constant 0 : index
    %c0_3 = arith.constant 0 : index
    %2 = vector.load %arg2[%c0_1, %c0_2, %c0_3] : memref<4x26x256xbf16, #tpu.memory_space<vmem>>, vector<1x26x256xbf16>
    %3 = vector.shape_cast %2 : vector<1x26x256xbf16> to vector<26x256xbf16>
    %cst = arith.constant dense<0.000000e+00> : vector<2x256xf32>
    %4 = tpu.matmul %1, %3, %cst {dimension_numbers = #tpu.dot_dimension_numbers<[1], [0], [0], [1], [0, 0, 1, 1], [], []>} : vector<2x26xbf16>, vector<26x256xbf16>, vector<2x256xf32> -> vector<2x256xf32>
    %c0_4 = arith.constant 0 : index
    %c0_5 = arith.constant 0 : index
    %c0_6 = arith.constant 0 : index
    %5 = vector.load %arg3[%c0_4, %c0_5, %c0_6] : memref<4x8x2xf32, #tpu.memory_space<vmem>>, vector<1x8x2xf32>
    %6 = vector.shape_cast %5 : vector<1x8x2xf32> to vector<8x2xf32>
    %cst_7 = arith.constant dense<0.000000e+00> : vector<8x256xf32>
    %7 = tpu.matmul %6, %4, %cst_7 {dimension_numbers = #tpu.dot_dimension_numbers<[1], [0], [0], [1], [0, 0, 1, 1], [], []>} : vector<8x2xf32>, vector<2x256xf32>, vector<8x256xf32> -> vector<8x256xf32>
    %c1 = arith.constant 1 : index
    %c0_8 = arith.constant 0 : index
    %c0_9 = arith.constant 0 : index
    %8 = vector.load %arg2[%c1, %c0_8, %c0_9] : memref<4x26x256xbf16, #tpu.memory_space<vmem>>, vector<1x26x256xbf16>
    %9 = vector.shape_cast %8 : vector<1x26x256xbf16> to vector<26x256xbf16>
    %cst_10 = arith.constant dense<0.000000e+00> : vector<2x256xf32>
    %10 = tpu.matmul %1, %9, %cst_10 {dimension_numbers = #tpu.dot_dimension_numbers<[1], [0], [0], [1], [0, 0, 1, 1], [], []>} : vector<2x26xbf16>, vector<26x256xbf16>, vector<2x256xf32> -> vector<2x256xf32>
    %c1_11 = arith.constant 1 : index
    %c0_12 = arith.constant 0 : index
    %c0_13 = arith.constant 0 : index
    %11 = vector.load %arg3[%c1_11, %c0_12, %c0_13] : memref<4x8x2xf32, #tpu.memory_space<vmem>>, vector<1x8x2xf32>
    %12 = vector.shape_cast %11 : vector<1x8x2xf32> to vector<8x2xf32>
    %cst_14 = arith.constant dense<0.000000e+00> : vector<8x256xf32>
    %13 = tpu.matmul %12, %10, %cst_14 {dimension_numbers = #tpu.dot_dimension_numbers<[1], [0], [0], [1], [0, 0, 1, 1], [], []>} : vector<8x2xf32>, vector<2x256xf32>, vector<8x256xf32> -> vector<8x256xf32>
    %14 = arith.addf %7, %13 : vector<8x256xf32>
    %c2 = arith.constant 2 : index
    %c0_15 = arith.constant 0 : index
    %c0_16 = arith.constant 0 : index
    %15 = vector.load %arg2[%c2, %c0_15, %c0_16] : memref<4x26x256xbf16, #tpu.memory_space<vmem>>, vector<1x26x256xbf16>
    %16 = vector.shape_cast %15 : vector<1x26x256xbf16> to vector<26x256xbf16>
    %cst_17 = arith.constant dense<0.000000e+00> : vector<2x256xf32>
    %17 = tpu.matmul %1, %16, %cst_17 {dimension_numbers = #tpu.dot_dimension_numbers<[1], [0], [0], [1], [0, 0, 1, 1], [], []>} : vector<2x26xbf16>, vector<26x256xbf16>, vector<2x256xf32> -> vector<2x256xf32>
    %c2_18 = arith.constant 2 : index
    %c0_19 = arith.constant 0 : index
    %c0_20 = arith.constant 0 : index
    %18 = vector.load %arg3[%c2_18, %c0_19, %c0_20] : memref<4x8x2xf32, #tpu.memory_space<vmem>>, vector<1x8x2xf32>
    %19 = vector.shape_cast %18 : vector<1x8x2xf32> to vector<8x2xf32>
    %cst_21 = arith.constant dense<0.000000e+00> : vector<8x256xf32>
    %20 = tpu.matmul %19, %17, %cst_21 {dimension_numbers = #tpu.dot_dimension_numbers<[1], [0], [0], [1], [0, 0, 1, 1], [], []>} : vector<8x2xf32>, vector<2x256xf32>, vector<8x256xf32> -> vector<8x256xf32>
    %21 = arith.addf %14, %20 : vector<8x256xf32>
    %c3 = arith.constant 3 : index
    %c0_22 = arith.constant 0 : index
    %c0_23 = arith.constant 0 : index
    %22 = vector.load %arg2[%c3, %c0_22, %c0_23] : memref<4x26x256xbf16, #tpu.memory_space<vmem>>, vector<1x26x256xbf16>
    %23 = vector.shape_cast %22 : vector<1x26x256xbf16> to vector<26x256xbf16>
    %cst_24 = arith.constant dense<0.000000e+00> : vector<2x256xf32>
    %24 = tpu.matmul %1, %23, %cst_24 {dimension_numbers = #tpu.dot_dimension_numbers<[1], [0], [0], [1], [0, 0, 1, 1], [], []>} : vector<2x26xbf16>, vector<26x256xbf16>, vector<2x256xf32> -> vector<2x256xf32>
    %c3_25 = arith.constant 3 : index
    %c0_26 = arith.constant 0 : index
    %c0_27 = arith.constant 0 : index
    %25 = vector.load %arg3[%c3_25, %c0_26, %c0_27] : memref<4x8x2xf32, #tpu.memory_space<vmem>>, vector<1x8x2xf32>
    %26 = vector.shape_cast %25 : vector<1x8x2xf32> to vector<8x2xf32>
    %cst_28 = arith.constant dense<0.000000e+00> : vector<8x256xf32>
    %27 = tpu.matmul %26, %24, %cst_28 {dimension_numbers = #tpu.dot_dimension_numbers<[1], [0], [0], [1], [0, 0, 1, 1], [], []>} : vector<8x2xf32>, vector<2x256xf32>, vector<8x256xf32> -> vector<8x256xf32>
    %28 = arith.addf %21, %27 : vector<8x256xf32>
    %cst_29 = arith.constant dense<0.000000e+00> : vector<256xf32>
    %29 = vector.multi_reduction <add>, %28, %cst_29 [0] : vector<8x256xf32> to vector<256xf32>
    %30 = vector.shape_cast %29 : vector<256xf32> to vector<1x256xf32>
    %31 = arith.mulf %28, %28 : vector<8x256xf32>
    %cst_30 = arith.constant dense<0.000000e+00> : vector<256xf32>
    %32 = vector.multi_reduction <add>, %31, %cst_30 [0] : vector<8x256xf32> to vector<256xf32>
    %33 = vector.shape_cast %32 : vector<256xf32> to vector<1x256xf32>
    %c0_31 = arith.constant 0 : index
    %c0_32 = arith.constant 0 : index
    %34 = vector.load %arg4[%c0_31, %c0_32] : memref<256x64xf32, #tpu.memory_space<vmem>>, vector<256x64xf32>
    %cst_33 = arith.constant dense<0.000000e+00> : vector<1x64xf32>
    %35 = tpu.matmul %30, %34, %cst_33 {dimension_numbers = #tpu.dot_dimension_numbers<[1], [0], [0], [1], [0, 0, 1, 1], [], []>} : vector<1x256xf32>, vector<256x64xf32>, vector<1x64xf32> -> vector<1x64xf32>
    %c0_34 = arith.constant 0 : index
    %c0_35 = arith.constant 0 : index
    %36 = vector.load %arg4[%c0_34, %c0_35] : memref<256x64xf32, #tpu.memory_space<vmem>>, vector<256x64xf32>
    %cst_36 = arith.constant dense<0.000000e+00> : vector<1x64xf32>
    %37 = tpu.matmul %33, %36, %cst_36 {dimension_numbers = #tpu.dot_dimension_numbers<[1], [0], [0], [1], [0, 0, 1, 1], [], []>} : vector<1x256xf32>, vector<256x64xf32>, vector<1x64xf32> -> vector<1x64xf32>
    %c0_37 = arith.constant 0 : index
    %c0_38 = arith.constant 0 : index
    %38 = vector.load %arg5[%c0_37, %c0_38] : memref<64x256xf32, #tpu.memory_space<vmem>>, vector<64x256xf32>
    %cst_39 = arith.constant dense<0.000000e+00> : vector<1x256xf32>
    %39 = tpu.matmul %35, %38, %cst_39 {dimension_numbers = #tpu.dot_dimension_numbers<[1], [0], [0], [1], [0, 0, 1, 1], [], []>} : vector<1x64xf32>, vector<64x256xf32>, vector<1x256xf32> -> vector<1x256xf32>
    %c0_40 = arith.constant 0 : index
    %c0_41 = arith.constant 0 : index
    %40 = vector.load %arg5[%c0_40, %c0_41] : memref<64x256xf32, #tpu.memory_space<vmem>>, vector<64x256xf32>
    %cst_42 = arith.constant dense<0.000000e+00> : vector<1x256xf32>
    %41 = tpu.matmul %37, %40, %cst_42 {dimension_numbers = #tpu.dot_dimension_numbers<[1], [0], [0], [1], [0, 0, 1, 1], [], []>} : vector<1x64xf32>, vector<64x256xf32>, vector<1x256xf32> -> vector<1x256xf32>
    %42 = arith.mulf %39, %39 : vector<1x256xf32>
    %43 = arith.subf %41, %42 : vector<1x256xf32>
    %44 = vector.broadcast %39 : vector<1x256xf32> to vector<8x256xf32>
    %45 = arith.subf %28, %44 : vector<8x256xf32>
    %cst_43 = arith.constant 9.99999974E-6 : f32
    %46 = vector.broadcast %cst_43 : f32 to vector<1x256xf32>
    %47 = arith.addf %43, %46 : vector<1x256xf32>
    %48 = math.rsqrt %47 : vector<1x256xf32>
    %49 = vector.broadcast %48 : vector<1x256xf32> to vector<8x256xf32>
    %50 = arith.mulf %45, %49 : vector<8x256xf32>
    %c0_44 = arith.constant 0 : index
    %c0_45 = arith.constant 0 : index
    %51 = vector.load %arg6[%c0_44, %c0_45] : memref<1x256xf32, #tpu.memory_space<vmem>>, vector<1x256xf32>
    %52 = vector.broadcast %51 : vector<1x256xf32> to vector<8x256xf32>
    %53 = arith.mulf %50, %52 : vector<8x256xf32>
    %c0_46 = arith.constant 0 : index
    %c0_47 = arith.constant 0 : index
    %54 = vector.load %arg7[%c0_46, %c0_47] : memref<1x256xf32, #tpu.memory_space<vmem>>, vector<1x256xf32>
    %55 = vector.broadcast %54 : vector<1x256xf32> to vector<8x256xf32>
    %56 = arith.addf %53, %55 : vector<8x256xf32>
    %cst_48 = arith.constant 0.000000e+00 : f32
    %57 = vector.broadcast %cst_48 : f32 to vector<8x256xf32>
    %58 = arith.maximumf %56, %57 : vector<8x256xf32>
    %59 = arith.truncf %58 : vector<8x256xf32> to vector<8x256xbf16>
    %c0_49 = arith.constant 0 : index
    %c0_50 = arith.constant 0 : index
    %c0_51 = arith.constant 0 : index
    %60 = vector.load %arg8[%c0_49, %c0_50, %c0_51] : memref<4x256x256xbf16, #tpu.memory_space<vmem>>, vector<1x256x256xbf16>
    %61 = vector.shape_cast %60 : vector<1x256x256xbf16> to vector<256x256xbf16>
    %cst_52 = arith.constant dense<0.000000e+00> : vector<8x256xf32>
    %62 = tpu.matmul %59, %61, %cst_52 {dimension_numbers = #tpu.dot_dimension_numbers<[1], [0], [0], [1], [0, 0, 1, 1], [], []>} : vector<8x256xbf16>, vector<256x256xbf16>, vector<8x256xf32> -> vector<8x256xf32>
    %c0_53 = arith.constant 0 : index
    %c0_54 = arith.constant 0 : index
    %c0_55 = arith.constant 0 : index
    %63 = vector.load %arg9[%c0_53, %c0_54, %c0_55] : memref<4x16x8xf32, #tpu.memory_space<vmem>>, vector<1x16x8xf32>
    %64 = vector.shape_cast %63 : vector<1x16x8xf32> to vector<16x8xf32>
    %cst_56 = arith.constant dense<0.000000e+00> : vector<16x256xf32>
    %65 = tpu.matmul %64, %62, %cst_56 {dimension_numbers = #tpu.dot_dimension_numbers<[1], [0], [0], [1], [0, 0, 1, 1], [], []>} : vector<16x8xf32>, vector<8x256xf32>, vector<16x256xf32> -> vector<16x256xf32>
    %c1_57 = arith.constant 1 : index
    %c0_58 = arith.constant 0 : index
    %c0_59 = arith.constant 0 : index
    %66 = vector.load %arg8[%c1_57, %c0_58, %c0_59] : memref<4x256x256xbf16, #tpu.memory_space<vmem>>, vector<1x256x256xbf16>
    %67 = vector.shape_cast %66 : vector<1x256x256xbf16> to vector<256x256xbf16>
    %cst_60 = arith.constant dense<0.000000e+00> : vector<8x256xf32>
    %68 = tpu.matmul %59, %67, %cst_60 {dimension_numbers = #tpu.dot_dimension_numbers<[1], [0], [0], [1], [0, 0, 1, 1], [], []>} : vector<8x256xbf16>, vector<256x256xbf16>, vector<8x256xf32> -> vector<8x256xf32>
    %c1_61 = arith.constant 1 : index
    %c0_62 = arith.constant 0 : index
    %c0_63 = arith.constant 0 : index
    %69 = vector.load %arg9[%c1_61, %c0_62, %c0_63] : memref<4x16x8xf32, #tpu.memory_space<vmem>>, vector<1x16x8xf32>
    %70 = vector.shape_cast %69 : vector<1x16x8xf32> to vector<16x8xf32>
    %cst_64 = arith.constant dense<0.000000e+00> : vector<16x256xf32>
    %71 = tpu.matmul %70, %68, %cst_64 {dimension_numbers = #tpu.dot_dimension_numbers<[1], [0], [0], [1], [0, 0, 1, 1], [], []>} : vector<16x8xf32>, vector<8x256xf32>, vector<16x256xf32> -> vector<16x256xf32>
    %72 = arith.addf %65, %71 : vector<16x256xf32>
    %c2_65 = arith.constant 2 : index
    %c0_66 = arith.constant 0 : index
    %c0_67 = arith.constant 0 : index
    %73 = vector.load %arg8[%c2_65, %c0_66, %c0_67] : memref<4x256x256xbf16, #tpu.memory_space<vmem>>, vector<1x256x256xbf16>
    %74 = vector.shape_cast %73 : vector<1x256x256xbf16> to vector<256x256xbf16>
    %cst_68 = arith.constant dense<0.000000e+00> : vector<8x256xf32>
    %75 = tpu.matmul %59, %74, %cst_68 {dimension_numbers = #tpu.dot_dimension_numbers<[1], [0], [0], [1], [0, 0, 1, 1], [], []>} : vector<8x256xbf16>, vector<256x256xbf16>, vector<8x256xf32> -> vector<8x256xf32>
    %c2_69 = arith.constant 2 : index
    %c0_70 = arith.constant 0 : index
    %c0_71 = arith.constant 0 : index
    %76 = vector.load %arg9[%c2_69, %c0_70, %c0_71] : memref<4x16x8xf32, #tpu.memory_space<vmem>>, vector<1x16x8xf32>
    %77 = vector.shape_cast %76 : vector<1x16x8xf32> to vector<16x8xf32>
    %cst_72 = arith.constant dense<0.000000e+00> : vector<16x256xf32>
    %78 = tpu.matmul %77, %75, %cst_72 {dimension_numbers = #tpu.dot_dimension_numbers<[1], [0], [0], [1], [0, 0, 1, 1], [], []>} : vector<16x8xf32>, vector<8x256xf32>, vector<16x256xf32> -> vector<16x256xf32>
    %79 = arith.addf %72, %78 : vector<16x256xf32>
    %c3_73 = arith.constant 3 : index
    %c0_74 = arith.constant 0 : index
    %c0_75 = arith.constant 0 : index
    %80 = vector.load %arg8[%c3_73, %c0_74, %c0_75] : memref<4x256x256xbf16, #tpu.memory_space<vmem>>, vector<1x256x256xbf16>
    %81 = vector.shape_cast %80 : vector<1x256x256xbf16> to vector<256x256xbf16>
    %cst_76 = arith.constant dense<0.000000e+00> : vector<8x256xf32>
    %82 = tpu.matmul %59, %81, %cst_76 {dimension_numbers = #tpu.dot_dimension_numbers<[1], [0], [0], [1], [0, 0, 1, 1], [], []>} : vector<8x256xbf16>, vector<256x256xbf16>, vector<8x256xf32> -> vector<8x256xf32>
    %c3_77 = arith.constant 3 : index
    %c0_78 = arith.constant 0 : index
    %c0_79 = arith.constant 0 : index
    %83 = vector.load %arg9[%c3_77, %c0_78, %c0_79] : memref<4x16x8xf32, #tpu.memory_space<vmem>>, vector<1x16x8xf32>
    %84 = vector.shape_cast %83 : vector<1x16x8xf32> to vector<16x8xf32>
    %cst_80 = arith.constant dense<0.000000e+00> : vector<16x256xf32>
    %85 = tpu.matmul %84, %82, %cst_80 {dimension_numbers = #tpu.dot_dimension_numbers<[1], [0], [0], [1], [0, 0, 1, 1], [], []>} : vector<16x8xf32>, vector<8x256xf32>, vector<16x256xf32> -> vector<16x256xf32>
    %86 = arith.addf %79, %85 : vector<16x256xf32>
    %cst_81 = arith.constant dense<0.000000e+00> : vector<256xf32>
    %87 = vector.multi_reduction <add>, %86, %cst_81 [0] : vector<16x256xf32> to vector<256xf32>
    %88 = vector.shape_cast %87 : vector<256xf32> to vector<1x256xf32>
    %89 = arith.mulf %86, %86 : vector<16x256xf32>
    %cst_82 = arith.constant dense<0.000000e+00> : vector<256xf32>
    %90 = vector.multi_reduction <add>, %89, %cst_82 [0] : vector<16x256xf32> to vector<256xf32>
    %91 = vector.shape_cast %90 : vector<256xf32> to vector<1x256xf32>
    %c0_83 = arith.constant 0 : index
    %c0_84 = arith.constant 0 : index
    %92 = vector.load %arg10[%c0_83, %c0_84] : memref<256x32xf32, #tpu.memory_space<vmem>>, vector<256x32xf32>
    %cst_85 = arith.constant dense<0.000000e+00> : vector<1x32xf32>
    %93 = tpu.matmul %88, %92, %cst_85 {dimension_numbers = #tpu.dot_dimension_numbers<[1], [0], [0], [1], [0, 0, 1, 1], [], []>} : vector<1x256xf32>, vector<256x32xf32>, vector<1x32xf32> -> vector<1x32xf32>
    %c0_86 = arith.constant 0 : index
    %c0_87 = arith.constant 0 : index
    %94 = vector.load %arg10[%c0_86, %c0_87] : memref<256x32xf32, #tpu.memory_space<vmem>>, vector<256x32xf32>
    %cst_88 = arith.constant dense<0.000000e+00> : vector<1x32xf32>
    %95 = tpu.matmul %91, %94, %cst_88 {dimension_numbers = #tpu.dot_dimension_numbers<[1], [0], [0], [1], [0, 0, 1, 1], [], []>} : vector<1x256xf32>, vector<256x32xf32>, vector<1x32xf32> -> vector<1x32xf32>
    %c0_89 = arith.constant 0 : index
    %c0_90 = arith.constant 0 : index
    %96 = vector.load %arg11[%c0_89, %c0_90] : memref<32x256xf32, #tpu.memory_space<vmem>>, vector<32x256xf32>
    %cst_91 = arith.constant dense<0.000000e+00> : vector<1x256xf32>
    %97 = tpu.matmul %93, %96, %cst_91 {dimension_numbers = #tpu.dot_dimension_numbers<[1], [0], [0], [1], [0, 0, 1, 1], [], []>} : vector<1x32xf32>, vector<32x256xf32>, vector<1x256xf32> -> vector<1x256xf32>
    %c0_92 = arith.constant 0 : index
    %c0_93 = arith.constant 0 : index
    %98 = vector.load %arg11[%c0_92, %c0_93] : memref<32x256xf32, #tpu.memory_space<vmem>>, vector<32x256xf32>
    %cst_94 = arith.constant dense<0.000000e+00> : vector<1x256xf32>
    %99 = tpu.matmul %95, %98, %cst_94 {dimension_numbers = #tpu.dot_dimension_numbers<[1], [0], [0], [1], [0, 0, 1, 1], [], []>} : vector<1x32xf32>, vector<32x256xf32>, vector<1x256xf32> -> vector<1x256xf32>
    %100 = arith.mulf %97, %97 : vector<1x256xf32>
    %101 = arith.subf %99, %100 : vector<1x256xf32>
    %102 = vector.broadcast %97 : vector<1x256xf32> to vector<16x256xf32>
    %103 = arith.subf %86, %102 : vector<16x256xf32>
    %cst_95 = arith.constant 9.99999974E-6 : f32
    %104 = vector.broadcast %cst_95 : f32 to vector<1x256xf32>
    %105 = arith.addf %101, %104 : vector<1x256xf32>
    %106 = math.rsqrt %105 : vector<1x256xf32>
    %107 = vector.broadcast %106 : vector<1x256xf32> to vector<16x256xf32>
    %108 = arith.mulf %103, %107 : vector<16x256xf32>
    %c0_96 = arith.constant 0 : index
    %c0_97 = arith.constant 0 : index
    %109 = vector.load %arg12[%c0_96, %c0_97] : memref<1x256xf32, #tpu.memory_space<vmem>>, vector<1x256xf32>
    %110 = vector.broadcast %109 : vector<1x256xf32> to vector<16x256xf32>
    %111 = arith.mulf %108, %110 : vector<16x256xf32>
    %c0_98 = arith.constant 0 : index
    %c0_99 = arith.constant 0 : index
    %112 = vector.load %arg13[%c0_98, %c0_99] : memref<1x256xf32, #tpu.memory_space<vmem>>, vector<1x256xf32>
    %113 = vector.broadcast %112 : vector<1x256xf32> to vector<16x256xf32>
    %114 = arith.addf %111, %113 : vector<16x256xf32>
    %cst_100 = arith.constant 0.000000e+00 : f32
    %115 = vector.broadcast %cst_100 : f32 to vector<16x256xf32>
    %116 = arith.maximumf %114, %115 : vector<16x256xf32>
    %117 = arith.truncf %116 : vector<16x256xf32> to vector<16x256xbf16>
    %c0_101 = arith.constant 0 : index
    %c0_102 = arith.constant 0 : index
    %c0_103 = arith.constant 0 : index
    %118 = vector.load %arg14[%c0_101, %c0_102, %c0_103] : memref<4x256x256xbf16, #tpu.memory_space<vmem>>, vector<1x256x256xbf16>
    %119 = vector.shape_cast %118 : vector<1x256x256xbf16> to vector<256x256xbf16>
    %cst_104 = arith.constant dense<0.000000e+00> : vector<16x256xf32>
    %120 = tpu.matmul %117, %119, %cst_104 {dimension_numbers = #tpu.dot_dimension_numbers<[1], [0], [0], [1], [0, 0, 1, 1], [], []>} : vector<16x256xbf16>, vector<256x256xbf16>, vector<16x256xf32> -> vector<16x256xf32>
    %c0_105 = arith.constant 0 : index
    %c0_106 = arith.constant 0 : index
    %c0_107 = arith.constant 0 : index
    %121 = vector.load %arg15[%c0_105, %c0_106, %c0_107] : memref<4x32x16xf32, #tpu.memory_space<vmem>>, vector<1x32x16xf32>
    %122 = vector.shape_cast %121 : vector<1x32x16xf32> to vector<32x16xf32>
    %cst_108 = arith.constant dense<0.000000e+00> : vector<32x256xf32>
    %123 = tpu.matmul %122, %120, %cst_108 {dimension_numbers = #tpu.dot_dimension_numbers<[1], [0], [0], [1], [0, 0, 1, 1], [], []>} : vector<32x16xf32>, vector<16x256xf32>, vector<32x256xf32> -> vector<32x256xf32>
    %c1_109 = arith.constant 1 : index
    %c0_110 = arith.constant 0 : index
    %c0_111 = arith.constant 0 : index
    %124 = vector.load %arg14[%c1_109, %c0_110, %c0_111] : memref<4x256x256xbf16, #tpu.memory_space<vmem>>, vector<1x256x256xbf16>
    %125 = vector.shape_cast %124 : vector<1x256x256xbf16> to vector<256x256xbf16>
    %cst_112 = arith.constant dense<0.000000e+00> : vector<16x256xf32>
    %126 = tpu.matmul %117, %125, %cst_112 {dimension_numbers = #tpu.dot_dimension_numbers<[1], [0], [0], [1], [0, 0, 1, 1], [], []>} : vector<16x256xbf16>, vector<256x256xbf16>, vector<16x256xf32> -> vector<16x256xf32>
    %c1_113 = arith.constant 1 : index
    %c0_114 = arith.constant 0 : index
    %c0_115 = arith.constant 0 : index
    %127 = vector.load %arg15[%c1_113, %c0_114, %c0_115] : memref<4x32x16xf32, #tpu.memory_space<vmem>>, vector<1x32x16xf32>
    %128 = vector.shape_cast %127 : vector<1x32x16xf32> to vector<32x16xf32>
    %cst_116 = arith.constant dense<0.000000e+00> : vector<32x256xf32>
    %129 = tpu.matmul %128, %126, %cst_116 {dimension_numbers = #tpu.dot_dimension_numbers<[1], [0], [0], [1], [0, 0, 1, 1], [], []>} : vector<32x16xf32>, vector<16x256xf32>, vector<32x256xf32> -> vector<32x256xf32>
    %130 = arith.addf %123, %129 : vector<32x256xf32>
    %c2_117 = arith.constant 2 : index
    %c0_118 = arith.constant 0 : index
    %c0_119 = arith.constant 0 : index
    %131 = vector.load %arg14[%c2_117, %c0_118, %c0_119] : memref<4x256x256xbf16, #tpu.memory_space<vmem>>, vector<1x256x256xbf16>
    %132 = vector.shape_cast %131 : vector<1x256x256xbf16> to vector<256x256xbf16>
    %cst_120 = arith.constant dense<0.000000e+00> : vector<16x256xf32>
    %133 = tpu.matmul %117, %132, %cst_120 {dimension_numbers = #tpu.dot_dimension_numbers<[1], [0], [0], [1], [0, 0, 1, 1], [], []>} : vector<16x256xbf16>, vector<256x256xbf16>, vector<16x256xf32> -> vector<16x256xf32>
    %c2_121 = arith.constant 2 : index
    %c0_122 = arith.constant 0 : index
    %c0_123 = arith.constant 0 : index
    %134 = vector.load %arg15[%c2_121, %c0_122, %c0_123] : memref<4x32x16xf32, #tpu.memory_space<vmem>>, vector<1x32x16xf32>
    %135 = vector.shape_cast %134 : vector<1x32x16xf32> to vector<32x16xf32>
    %cst_124 = arith.constant dense<0.000000e+00> : vector<32x256xf32>
    %136 = tpu.matmul %135, %133, %cst_124 {dimension_numbers = #tpu.dot_dimension_numbers<[1], [0], [0], [1], [0, 0, 1, 1], [], []>} : vector<32x16xf32>, vector<16x256xf32>, vector<32x256xf32> -> vector<32x256xf32>
    %137 = arith.addf %130, %136 : vector<32x256xf32>
    %c3_125 = arith.constant 3 : index
    %c0_126 = arith.constant 0 : index
    %c0_127 = arith.constant 0 : index
    %138 = vector.load %arg14[%c3_125, %c0_126, %c0_127] : memref<4x256x256xbf16, #tpu.memory_space<vmem>>, vector<1x256x256xbf16>
    %139 = vector.shape_cast %138 : vector<1x256x256xbf16> to vector<256x256xbf16>
    %cst_128 = arith.constant dense<0.000000e+00> : vector<16x256xf32>
    %140 = tpu.matmul %117, %139, %cst_128 {dimension_numbers = #tpu.dot_dimension_numbers<[1], [0], [0], [1], [0, 0, 1, 1], [], []>} : vector<16x256xbf16>, vector<256x256xbf16>, vector<16x256xf32> -> vector<16x256xf32>
    %c3_129 = arith.constant 3 : index
    %c0_130 = arith.constant 0 : index
    %c0_131 = arith.constant 0 : index
    %141 = vector.load %arg15[%c3_129, %c0_130, %c0_131] : memref<4x32x16xf32, #tpu.memory_space<vmem>>, vector<1x32x16xf32>
    %142 = vector.shape_cast %141 : vector<1x32x16xf32> to vector<32x16xf32>
    %cst_132 = arith.constant dense<0.000000e+00> : vector<32x256xf32>
    %143 = tpu.matmul %142, %140, %cst_132 {dimension_numbers = #tpu.dot_dimension_numbers<[1], [0], [0], [1], [0, 0, 1, 1], [], []>} : vector<32x16xf32>, vector<16x256xf32>, vector<32x256xf32> -> vector<32x256xf32>
    %144 = arith.addf %137, %143 : vector<32x256xf32>
    %cst_133 = arith.constant dense<0.000000e+00> : vector<256xf32>
    %145 = vector.multi_reduction <add>, %144, %cst_133 [0] : vector<32x256xf32> to vector<256xf32>
    %146 = vector.shape_cast %145 : vector<256xf32> to vector<1x256xf32>
    %147 = arith.mulf %144, %144 : vector<32x256xf32>
    %cst_134 = arith.constant dense<0.000000e+00> : vector<256xf32>
    %148 = vector.multi_reduction <add>, %147, %cst_134 [0] : vector<32x256xf32> to vector<256xf32>
    %149 = vector.shape_cast %148 : vector<256xf32> to vector<1x256xf32>
    %c0_135 = arith.constant 0 : index
    %c0_136 = arith.constant 0 : index
    %150 = vector.load %arg16[%c0_135, %c0_136] : memref<256x16xf32, #tpu.memory_space<vmem>>, vector<256x16xf32>
    %cst_137 = arith.constant dense<0.000000e+00> : vector<1x16xf32>
    %151 = tpu.matmul %146, %150, %cst_137 {dimension_numbers = #tpu.dot_dimension_numbers<[1], [0], [0], [1], [0, 0, 1, 1], [], []>} : vector<1x256xf32>, vector<256x16xf32>, vector<1x16xf32> -> vector<1x16xf32>
    %c0_138 = arith.constant 0 : index
    %c0_139 = arith.constant 0 : index
    %152 = vector.load %arg16[%c0_138, %c0_139] : memref<256x16xf32, #tpu.memory_space<vmem>>, vector<256x16xf32>
    %cst_140 = arith.constant dense<0.000000e+00> : vector<1x16xf32>
    %153 = tpu.matmul %149, %152, %cst_140 {dimension_numbers = #tpu.dot_dimension_numbers<[1], [0], [0], [1], [0, 0, 1, 1], [], []>} : vector<1x256xf32>, vector<256x16xf32>, vector<1x16xf32> -> vector<1x16xf32>
    %c0_141 = arith.constant 0 : index
    %c0_142 = arith.constant 0 : index
    %154 = vector.load %arg17[%c0_141, %c0_142] : memref<16x256xf32, #tpu.memory_space<vmem>>, vector<16x256xf32>
    %cst_143 = arith.constant dense<0.000000e+00> : vector<1x256xf32>
    %155 = tpu.matmul %151, %154, %cst_143 {dimension_numbers = #tpu.dot_dimension_numbers<[1], [0], [0], [1], [0, 0, 1, 1], [], []>} : vector<1x16xf32>, vector<16x256xf32>, vector<1x256xf32> -> vector<1x256xf32>
    %c0_144 = arith.constant 0 : index
    %c0_145 = arith.constant 0 : index
    %156 = vector.load %arg17[%c0_144, %c0_145] : memref<16x256xf32, #tpu.memory_space<vmem>>, vector<16x256xf32>
    %cst_146 = arith.constant dense<0.000000e+00> : vector<1x256xf32>
    %157 = tpu.matmul %153, %156, %cst_146 {dimension_numbers = #tpu.dot_dimension_numbers<[1], [0], [0], [1], [0, 0, 1, 1], [], []>} : vector<1x16xf32>, vector<16x256xf32>, vector<1x256xf32> -> vector<1x256xf32>
    %158 = arith.mulf %155, %155 : vector<1x256xf32>
    %159 = arith.subf %157, %158 : vector<1x256xf32>
    %160 = vector.broadcast %155 : vector<1x256xf32> to vector<32x256xf32>
    %161 = arith.subf %144, %160 : vector<32x256xf32>
    %cst_147 = arith.constant 9.99999974E-6 : f32
    %162 = vector.broadcast %cst_147 : f32 to vector<1x256xf32>
    %163 = arith.addf %159, %162 : vector<1x256xf32>
    %164 = math.rsqrt %163 : vector<1x256xf32>
    %165 = vector.broadcast %164 : vector<1x256xf32> to vector<32x256xf32>
    %166 = arith.mulf %161, %165 : vector<32x256xf32>
    %c0_148 = arith.constant 0 : index
    %c0_149 = arith.constant 0 : index
    %167 = vector.load %arg18[%c0_148, %c0_149] : memref<1x256xf32, #tpu.memory_space<vmem>>, vector<1x256xf32>
    %168 = vector.broadcast %167 : vector<1x256xf32> to vector<32x256xf32>
    %169 = arith.mulf %166, %168 : vector<32x256xf32>
    %c0_150 = arith.constant 0 : index
    %c0_151 = arith.constant 0 : index
    %170 = vector.load %arg19[%c0_150, %c0_151] : memref<1x256xf32, #tpu.memory_space<vmem>>, vector<1x256xf32>
    %171 = vector.broadcast %170 : vector<1x256xf32> to vector<32x256xf32>
    %172 = arith.addf %169, %171 : vector<32x256xf32>
    %cst_152 = arith.constant 0.000000e+00 : f32
    %173 = vector.broadcast %cst_152 : f32 to vector<32x256xf32>
    %174 = arith.maximumf %172, %173 : vector<32x256xf32>
    %175 = arith.truncf %174 : vector<32x256xf32> to vector<32x256xbf16>
    %c0_153 = arith.constant 0 : index
    %c0_154 = arith.constant 0 : index
    %c0_155 = arith.constant 0 : index
    %176 = vector.load %arg20[%c0_153, %c0_154, %c0_155] : memref<4x256x128xbf16, #tpu.memory_space<vmem>>, vector<1x256x128xbf16>
    %177 = vector.shape_cast %176 : vector<1x256x128xbf16> to vector<256x128xbf16>
    %cst_156 = arith.constant dense<0.000000e+00> : vector<32x128xf32>
    %178 = tpu.matmul %175, %177, %cst_156 {dimension_numbers = #tpu.dot_dimension_numbers<[1], [0], [0], [1], [0, 0, 1, 1], [], []>} : vector<32x256xbf16>, vector<256x128xbf16>, vector<32x128xf32> -> vector<32x128xf32>
    %c0_157 = arith.constant 0 : index
    %c0_158 = arith.constant 0 : index
    %c0_159 = arith.constant 0 : index
    %179 = vector.load %arg21[%c0_157, %c0_158, %c0_159] : memref<4x64x32xf32, #tpu.memory_space<vmem>>, vector<1x64x32xf32>
    %180 = vector.shape_cast %179 : vector<1x64x32xf32> to vector<64x32xf32>
    %cst_160 = arith.constant dense<0.000000e+00> : vector<64x128xf32>
    %181 = tpu.matmul %180, %178, %cst_160 {dimension_numbers = #tpu.dot_dimension_numbers<[1], [0], [0], [1], [0, 0, 1, 1], [], []>} : vector<64x32xf32>, vector<32x128xf32>, vector<64x128xf32> -> vector<64x128xf32>
    %c1_161 = arith.constant 1 : index
    %c0_162 = arith.constant 0 : index
    %c0_163 = arith.constant 0 : index
    %182 = vector.load %arg20[%c1_161, %c0_162, %c0_163] : memref<4x256x128xbf16, #tpu.memory_space<vmem>>, vector<1x256x128xbf16>
    %183 = vector.shape_cast %182 : vector<1x256x128xbf16> to vector<256x128xbf16>
    %cst_164 = arith.constant dense<0.000000e+00> : vector<32x128xf32>
    %184 = tpu.matmul %175, %183, %cst_164 {dimension_numbers = #tpu.dot_dimension_numbers<[1], [0], [0], [1], [0, 0, 1, 1], [], []>} : vector<32x256xbf16>, vector<256x128xbf16>, vector<32x128xf32> -> vector<32x128xf32>
    %c1_165 = arith.constant 1 : index
    %c0_166 = arith.constant 0 : index
    %c0_167 = arith.constant 0 : index
    %185 = vector.load %arg21[%c1_165, %c0_166, %c0_167] : memref<4x64x32xf32, #tpu.memory_space<vmem>>, vector<1x64x32xf32>
    %186 = vector.shape_cast %185 : vector<1x64x32xf32> to vector<64x32xf32>
    %cst_168 = arith.constant dense<0.000000e+00> : vector<64x128xf32>
    %187 = tpu.matmul %186, %184, %cst_168 {dimension_numbers = #tpu.dot_dimension_numbers<[1], [0], [0], [1], [0, 0, 1, 1], [], []>} : vector<64x32xf32>, vector<32x128xf32>, vector<64x128xf32> -> vector<64x128xf32>
    %188 = arith.addf %181, %187 : vector<64x128xf32>
    %c2_169 = arith.constant 2 : index
    %c0_170 = arith.constant 0 : index
    %c0_171 = arith.constant 0 : index
    %189 = vector.load %arg20[%c2_169, %c0_170, %c0_171] : memref<4x256x128xbf16, #tpu.memory_space<vmem>>, vector<1x256x128xbf16>
    %190 = vector.shape_cast %189 : vector<1x256x128xbf16> to vector<256x128xbf16>
    %cst_172 = arith.constant dense<0.000000e+00> : vector<32x128xf32>
    %191 = tpu.matmul %175, %190, %cst_172 {dimension_numbers = #tpu.dot_dimension_numbers<[1], [0], [0], [1], [0, 0, 1, 1], [], []>} : vector<32x256xbf16>, vector<256x128xbf16>, vector<32x128xf32> -> vector<32x128xf32>
    %c2_173 = arith.constant 2 : index
    %c0_174 = arith.constant 0 : index
    %c0_175 = arith.constant 0 : index
    %192 = vector.load %arg21[%c2_173, %c0_174, %c0_175] : memref<4x64x32xf32, #tpu.memory_space<vmem>>, vector<1x64x32xf32>
    %193 = vector.shape_cast %192 : vector<1x64x32xf32> to vector<64x32xf32>
    %cst_176 = arith.constant dense<0.000000e+00> : vector<64x128xf32>
    %194 = tpu.matmul %193, %191, %cst_176 {dimension_numbers = #tpu.dot_dimension_numbers<[1], [0], [0], [1], [0, 0, 1, 1], [], []>} : vector<64x32xf32>, vector<32x128xf32>, vector<64x128xf32> -> vector<64x128xf32>
    %195 = arith.addf %188, %194 : vector<64x128xf32>
    %c3_177 = arith.constant 3 : index
    %c0_178 = arith.constant 0 : index
    %c0_179 = arith.constant 0 : index
    %196 = vector.load %arg20[%c3_177, %c0_178, %c0_179] : memref<4x256x128xbf16, #tpu.memory_space<vmem>>, vector<1x256x128xbf16>
    %197 = vector.shape_cast %196 : vector<1x256x128xbf16> to vector<256x128xbf16>
    %cst_180 = arith.constant dense<0.000000e+00> : vector<32x128xf32>
    %198 = tpu.matmul %175, %197, %cst_180 {dimension_numbers = #tpu.dot_dimension_numbers<[1], [0], [0], [1], [0, 0, 1, 1], [], []>} : vector<32x256xbf16>, vector<256x128xbf16>, vector<32x128xf32> -> vector<32x128xf32>
    %c3_181 = arith.constant 3 : index
    %c0_182 = arith.constant 0 : index
    %c0_183 = arith.constant 0 : index
    %199 = vector.load %arg21[%c3_181, %c0_182, %c0_183] : memref<4x64x32xf32, #tpu.memory_space<vmem>>, vector<1x64x32xf32>
    %200 = vector.shape_cast %199 : vector<1x64x32xf32> to vector<64x32xf32>
    %cst_184 = arith.constant dense<0.000000e+00> : vector<64x128xf32>
    %201 = tpu.matmul %200, %198, %cst_184 {dimension_numbers = #tpu.dot_dimension_numbers<[1], [0], [0], [1], [0, 0, 1, 1], [], []>} : vector<64x32xf32>, vector<32x128xf32>, vector<64x128xf32> -> vector<64x128xf32>
    %202 = arith.addf %195, %201 : vector<64x128xf32>
    %203 = math.tanh %202 : vector<64x128xf32>
    %c0_185 = arith.constant 0 : index
    %c0_186 = arith.constant 0 : index
    %204 = vector.load %arg22[%c0_185, %c0_186] : memref<64x128xf32, #tpu.memory_space<vmem>>, vector<64x128xf32>
    tpu.vector_store %arg22[%c0_185, %c0_186], %203 {strides = array<i32>} : memref<64x128xf32, #tpu.memory_space<vmem>>, vector<64x128xf32>,
    return
  }
  func.func @transform_0(%arg0: i32) -> (i32, i32) {
    %c0_i32 = arith.constant 0 : i32
    %c0_i32_0 = arith.constant 0 : i32
    %c0_i32_1 = arith.constant 0 : i32
    return %c0_i32, %c0_i32_0 : i32, i32
  }
  func.func @transform_1(%arg0: i32) -> (i32, i32, i32) {
    %c0_i32 = arith.constant 0 : i32
    %c0_i32_0 = arith.constant 0 : i32
    %c0_i32_1 = arith.constant 0 : i32
    %c0_i32_2 = arith.constant 0 : i32
    return %c0_i32, %c0_i32_0, %c0_i32_1 : i32, i32, i32
  }
  func.func @transform_2(%arg0: i32) -> (i32, i32, i32) {
    %c0_i32 = arith.constant 0 : i32
    %c0_i32_0 = arith.constant 0 : i32
    %c0_i32_1 = arith.constant 0 : i32
    %c0_i32_2 = arith.constant 0 : i32
    return %c0_i32, %c0_i32_0, %c0_i32_1 : i32, i32, i32
  }
  func.func @transform_3(%arg0: i32) -> (i32, i32) {
    %c0_i32 = arith.constant 0 : i32
    %c0_i32_0 = arith.constant 0 : i32
    %c0_i32_1 = arith.constant 0 : i32
    return %c0_i32, %c0_i32_0 : i32, i32
  }
  func.func @transform_4(%arg0: i32) -> (i32, i32) {
    %c0_i32 = arith.constant 0 : i32
    %c0_i32_0 = arith.constant 0 : i32
    %c0_i32_1 = arith.constant 0 : i32
    return %c0_i32, %c0_i32_0 : i32, i32
  }
  func.func @transform_5(%arg0: i32) -> (i32, i32) {
    %c0_i32 = arith.constant 0 : i32
    %c0_i32_0 = arith.constant 0 : i32
    %c0_i32_1 = arith.constant 0 : i32
    return %c0_i32, %c0_i32_0 : i32, i32
  }
  func.func @transform_6(%arg0: i32) -> (i32, i32) {
    %c0_i32 = arith.constant 0 : i32
    %c0_i32_0 = arith.constant 0 : i32
    %c0_i32_1 = arith.constant 0 : i32
    return %c0_i32, %c0_i32_0 : i32, i32
  }
  func.func @transform_7(%arg0: i32) -> (i32, i32, i32) {
    %c0_i32 = arith.constant 0 : i32
    %c0_i32_0 = arith.constant 0 : i32
    %c0_i32_1 = arith.constant 0 : i32
    %c0_i32_2 = arith.constant 0 : i32
    return %c0_i32, %c0_i32_0, %c0_i32_1 : i32, i32, i32
  }
  func.func @transform_8(%arg0: i32) -> (i32, i32, i32) {
    %c0_i32 = arith.constant 0 : i32
    %c0_i32_0 = arith.constant 0 : i32
    %c0_i32_1 = arith.constant 0 : i32
    %c0_i32_2 = arith.constant 0 : i32
    return %c0_i32, %c0_i32_0, %c0_i32_1 : i32, i32, i32
  }
  func.func @transform_9(%arg0: i32) -> (i32, i32) {
    %c0_i32 = arith.constant 0 : i32
    %c0_i32_0 = arith.constant 0 : i32
    %c0_i32_1 = arith.constant 0 : i32
    return %c0_i32, %c0_i32_0 : i32, i32
  }
  func.func @transform_10(%arg0: i32) -> (i32, i32) {
    %c0_i32 = arith.constant 0 : i32
    %c0_i32_0 = arith.constant 0 : i32
    %c0_i32_1 = arith.constant 0 : i32
    return %c0_i32, %c0_i32_0 : i32, i32
  }
  func.func @transform_11(%arg0: i32) -> (i32, i32) {
    %c0_i32 = arith.constant 0 : i32
    %c0_i32_0 = arith.constant 0 : i32
    %c0_i32_1 = arith.constant 0 : i32
    return %c0_i32, %c0_i32_0 : i32, i32
  }
  func.func @transform_12(%arg0: i32) -> (i32, i32) {
    %c0_i32 = arith.constant 0 : i32
    %c0_i32_0 = arith.constant 0 : i32
    %c0_i32_1 = arith.constant 0 : i32
    return %c0_i32, %c0_i32_0 : i32, i32
  }
  func.func @transform_13(%arg0: i32) -> (i32, i32, i32) {
    %c0_i32 = arith.constant 0 : i32
    %c0_i32_0 = arith.constant 0 : i32
    %c0_i32_1 = arith.constant 0 : i32
    %c0_i32_2 = arith.constant 0 : i32
    return %c0_i32, %c0_i32_0, %c0_i32_1 : i32, i32, i32
  }
  func.func @transform_14(%arg0: i32) -> (i32, i32, i32) {
    %c0_i32 = arith.constant 0 : i32
    %c0_i32_0 = arith.constant 0 : i32
    %c0_i32_1 = arith.constant 0 : i32
    %c0_i32_2 = arith.constant 0 : i32
    return %c0_i32, %c0_i32_0, %c0_i32_1 : i32, i32, i32
  }
  func.func @transform_15(%arg0: i32) -> (i32, i32) {
    %c0_i32 = arith.constant 0 : i32
    %c0_i32_0 = arith.constant 0 : i32
    %c0_i32_1 = arith.constant 0 : i32
    return %c0_i32, %c0_i32_0 : i32, i32
  }
  func.func @transform_16(%arg0: i32) -> (i32, i32) {
    %c0_i32 = arith.constant 0 : i32
    %c0_i32_0 = arith.constant 0 : i32
    %c0_i32_1 = arith.constant 0 : i32
    return %c0_i32, %c0_i32_0 : i32, i32
  }
  func.func @transform_17(%arg0: i32) -> (i32, i32) {
    %c0_i32 = arith.constant 0 : i32
    %c0_i32_0 = arith.constant 0 : i32
    %c0_i32_1 = arith.constant 0 : i32
    return %c0_i32, %c0_i32_0 : i32, i32
  }
  func.func @transform_18(%arg0: i32) -> (i32, i32) {
    %c0_i32 = arith.constant 0 : i32
    %c0_i32_0 = arith.constant 0 : i32
    %c0_i32_1 = arith.constant 0 : i32
    return %c0_i32, %c0_i32_0 : i32, i32
  }
  func.func @transform_19(%arg0: i32) -> (i32, i32, i32) {
    %c0_i32 = arith.constant 0 : i32
    %c0_i32_0 = arith.constant 0 : i32
    %c0_i32_1 = arith.constant 0 : i32
    %c0_i32_2 = arith.constant 0 : i32
    return %c0_i32, %c0_i32_0, %c0_i32_1 : i32, i32, i32
  }
  func.func @transform_20(%arg0: i32) -> (i32, i32, i32) {
    %c0_i32 = arith.constant 0 : i32
    %c0_i32_0 = arith.constant 0 : i32
    %c0_i32_1 = arith.constant 0 : i32
    %c0_i32_2 = arith.constant 0 : i32
    return %c0_i32, %c0_i32_0, %c0_i32_1 : i32, i32, i32
  }
  func.func @transform_21(%arg0: i32) -> (i32, i32) {
    %c0_i32 = arith.constant 0 : i32
    %c0_i32_0 = arith.constant 0 : i32
    %c0_i32_1 = arith.constant 0 : i32
    return %c0_i32, %c0_i32_0 : i32, i32
  }
}

</mosaic_0001>

<bundles_post_ra>
// kernel: generator_forward.1
= control target key start
LH: loop header
LB: loop body
LE: loop exit
PB: predicated region body
PF: predicated region fallthrough
CT: control target
= control target key end

     0   :  { %s9402_s0 = inlined_call_operand.vmem [shape: f32[2,26], index: 0, kind: input, shape index: {}]   ;;  %s9403_s1 = inlined_call_operand.vmem [shape: bf16[4,26,256], index: 1, kind: input, shape index: {}]   ;;  %s9404_s2 = inlined_call_operand.vmem [shape: f32[4,8,2], index: 2, kind: input, shape index: {}]   ;;  %s9405_s3 = inlined_call_operand.vmem [shape: f32[256,64], index: 3, kind: input, shape index: {}]   ;;  %s9406_s4 = inlined_call_operand.vmem [shape: f32[64,256], index: 4, kind: input, shape index: {}]   ;;  %s9407_s5 = inlined_call_operand.vmem [shape: f32[1,256], index: 5, kind: input, shape index: {}]   ;;  %s9408_s6 = inlined_call_operand.vmem [shape: f32[1,256], index: 6, kind: input, shape index: {}]   ;;  %s9409_s7 = inlined_call_operand.vmem [shape: bf16[4,256,256], index: 7, kind: input, shape index: {}]   ;;  %s9410_s8 = inlined_call_operand.vmem [shape: f32[4,16,8], index: 8, kind: input, shape index: {}]   ;;  %s9411_s9 = inlined_call_operand.vmem [shape: f32[256,32], index: 9, kind: input, shape index: {}]   ;;  %s9412_s10 = inlined_call_operand.hbm [shape: f32[32,256], index: 10, kind: input, shape index: {}]   ;;  %s9413_s11 = inlined_call_operand.vmem [shape: f32[1,256], index: 11, kind: input, shape index: {}]   ;;  %s9414_s12 = inlined_call_operand.vmem [shape: f32[1,256], index: 12, kind: input, shape index: {}]   ;;  %s9415_s13 = inlined_call_operand.hbm [shape: bf16[4,256,256], index: 13, kind: input, shape index: {}]   ;;  %s9416_s14 = inlined_call_operand.vmem [shape: f32[4,32,16], index: 14, kind: input, shape index: {}]   ;;  %s9417_s15 = inlined_call_operand.vmem [shape: f32[256,16], index: 15, kind: input, shape index: {}]   ;;  %s9418_s16 = inlined_call_operand.hbm [shape: f32[16,256], index: 16, kind: input, shape index: {}]   ;;  %s9419_s17 = inlined_call_operand.vmem [shape: f32[1,256], index: 17, kind: input, shape index: {}]   ;;  %s9420_s18 = inlined_call_operand.vmem [shape: f32[1,256], index: 18, kind: input, shape index: {}]   ;;  %s9421_s19 = inlined_call_operand.vmem [shape: bf16[4,256,128], index: 19, kind: input, shape index: {}]   ;;  %s9422_s20 = inlined_call_operand.vmem [shape: f32[4,64,32], index: 20, kind: input, shape index: {}]   ;;  %s9423_s21 = inlined_call_operand.vmem [shape: f32[64,128], index: 21, kind: output, shape index: {}]  }
   0x1   :  { %9428 = sst [smem:[#allocation9_spill]] %s9402_s0 }
   0x2   :  { %9429 = sst [smem:[#allocation10_spill]] %s9403_s1 }
   0x3   :  { %9430 = sst [smem:[#allocation11_spill]] %s9404_s2 }
   0x4   :  { %9431 = sst [smem:[#allocation12_spill]] %s9405_s3 }
   0x5   :  { %9432 = sst [smem:[#allocation13_spill]] %s9406_s4 }
   0x6   :  { %9433 = sst [smem:[#allocation14_spill]] %s9407_s5 }
   0x7   :  { %26 = vsyncpa [#allocation3], 0 }
   0x8   :  { %27 = vsyncpa [#allocation5], 0  ;;  %s7703_s2 = smov [#allocation4]  }
   0x9   :  { %s69_s25 = sshll.u32 %s7703_s2, 4  ;;  %s70_s25 = int_to_ptr.vmem [resolvable:$true] %s69_s25 }
   0xa   :  { %s7647_s26 = scalar_lea.vmem %s70_s25, 16384  ;;  %p7652_p1 = scmp.lt.s32.totalorder %s70_s25, %s70_s25 }
   0xb   :  { %p7648_p0 = scmp.ne.s32.totalorder %s70_s25, %s7647_s26  ;;  %p7653_p2 = scmp.lt.s32.totalorder %s7647_s26, %s7647_s26 }
   0xd   :  { %p7654_p3 = por %p7653_p2, %p7652_p1 }
   0xf   :  { %p7655_p4 = pnand %p7654_p3, %p7648_p0 }
  0x11   :  { %7658 = shalt.err (!%p7655_p4)
}
  0x12   :  { %s7704_s27 = smov 128   ;;  %s7705_s3 = smov 8  }
  0x13   :  { %75 = dma.hbm_to_vmem [thread:$0]  %s9415_s13, 16384, %s70_s25, [#allocation5], %s7704_s27, %s7704_s27, %s7705_s3  }
  0x14   :  { %s7706_s0 = smov [#allocation2]  }
  0x15   :  { %s53_s4 = sshll.u32 %s7706_s0, 4  ;;  %s54_s4 = int_to_ptr.vmem [resolvable:$true] %s53_s4 }
  0x16   :  { %s7667_s30 = scalar_lea.vmem %s54_s4, 1024  ;;  %p7672_p6 = scmp.lt.s32.totalorder %s54_s4, %s54_s4 }
  0x17   :  { %p7668_p5 = scmp.ne.s32.totalorder %s54_s4, %s7667_s30  ;;  %p7673_p7 = scmp.lt.s32.totalorder %s7667_s30, %s7667_s30 }
  0x19   :  { %p7674_p8 = por %p7673_p7, %p7672_p6 }
  0x1b   :  { %p7675_p9 = pnand %p7674_p8, %p7668_p5 }
  0x1d   :  { %7678 = shalt.err (!%p7675_p9)
}
  0x1e   :  { %s7707_s5 = smov 256   ;;  %s7708_s22 = smov 16  }
  0x1f   :  { %59 = dma.hbm_to_vmem [thread:$0]  %s9412_s10, 1024, %s54_s4, [#allocation3], %s7707_s5, %s7707_s5, %s7708_s22  }
  0x20   :  { %s7709_s24 = smov [#allocation6]  }
  0x21   :  { %s85_s2 = sshll.u32 %s7709_s24, 4  ;;  %s86_s2 = int_to_ptr.vmem [resolvable:$true] %s85_s2 }
  0x22   :  { %s7687_s13 = scalar_lea.vmem %s86_s2, 512  ;;  %p7692_p11 = scmp.lt.s32.totalorder %s86_s2, %s86_s2 }
  0x23   :  { %p7688_p10 = scmp.ne.s32.totalorder %s86_s2, %s7687_s13  ;;  %p7693_p12 = scmp.lt.s32.totalorder %s7687_s13, %s7687_s13 }
  0x25   :  { %p7694_p13 = por %p7693_p12, %p7692_p11 }
  0x27   :  { %p7695_p0 = pnand %p7694_p13, %p7688_p10 }
  0x29   :  { %7698 = shalt.err (!%p7695_p0)
}
  0x2a   :  { %91 = dma.hbm_to_vmem [thread:$0]  %s9418_s16, 512, %s86_s2, [#allocation5], %s7707_s5, %s7707_s5, %s7708_s22  }
  0x2b   :  { %7699 = dma.done.wait [#allocation3], 1024  }
  0x2c   :  { %7700 = vsyncadd [#allocation3], 4294966272 }
  0x2d   :  { %7701 = dma.done.wait [#allocation5], 16896  }
  0x2e   :  { %7702 = vsyncadd [#allocation5], 4294950400  ;;  %v7710_v0 = vmov 0   ;;  %vm138_vm0 = vcmask 1044480   ;;  %s9434_s3 = sld [smem:[#allocation10_spill]]  ;;  %vm134_vm1 = vcmask 211968  }
  0x2f   :  { %177 = vmatprep.mubr.bf16.mxu0 %v7710_v0  ;;  %248 = vmatprep.mubr.bf16.mxu1 %v7710_v0  ;;  %s9435_s27 = sld [smem:[#allocation9_spill]]  ;;  %v7711_v13 = vmov 0.0   ;;  %vm263_vm2 = vcmask 1041408   ;;  %vm259_vm3 = vcmask 15360   ;;  %vm943_vm4 = vcmask 523264  }
  0x30   :  { %s9436_s4 = sld [smem:[#allocation11_spill]]  ;;  %vm1624_vm5 = vcmask 64512   ;;  %vm2651_vm6 = vcmask 261120   ;;  %vm3350_vm7 = vcmask 130048  }
  0x31   :  { %s9437_s1 = sld [smem:[#allocation12_spill]] }
  0x32   :  { %s9438_s23 = sld [smem:[#allocation13_spill]] }
  0x34   :  { %v7139_v1 = vld [vmem:[%s9434_s3 + $0x14] ss:$8 sps:$4 sm:$0x1f]   ;;  %v7143_v3 = vld [vmem:[%s9434_s3 + $0x10] ss:$8 sps:$4 sm:$0x1f]  }
  0x35   :  { %v7141_v2 = vld [vmem:[%s9434_s3 + $0x34] ss:$8 sps:$4 sm:$0x1f]   ;;  %6017 = vmatprep.subr.msk.bf16.mxu0 %vm138_vm0, %v7139_v1  ;;  %v7144_v4 = vld [vmem:[%s9434_s3 + $0x30] ss:$8 sps:$4 sm:$0x1f]  }
  0x36   :  { %6027 = vmatprep.subr.msk.bf16.mxu1 %vm138_vm0, %v7141_v2  ;;  %v7145_v5 = vld [vmem:[%s9434_s3 + $0x4] ss:$8 sps:$4 sm:$0xff]   ;;  %v140_v6 = vsel %vm138_vm0, %v7143_v3, 0  ;;  %v211_v7 = vsel %vm138_vm0, %v7144_v4, 0  ;;  %v7149_v9 = vld [vmem:[%s9434_s3] ss:$8 sps:$4 sm:$0xff]  }
  0x37   :  { %v7147_v8 = vld [vmem:[%s9434_s3 + $0x24] ss:$8 sps:$4 sm:$0xff]   ;;  %158 = vmatpush1.bf16.msra.mxu0 %v140_v6  ;;  %229 = vmatpush1.bf16.msra.mxu1 %v211_v7  ;;  %v7150_v10 = vld [vmem:[%s9434_s3 + $0x20] ss:$8 sps:$4 sm:$0xff]   ;;  %v6046_v37 = vld [vmem:[%s9436_s4 + $0x10] sm:$0xff] }
  0x38   :  { %v110_v11 = vld [vmem:[%s9435_s27] sm:$0x3]  ;;  %159 = vmatprep.subr.bf16.mxu0 %v7145_v5  ;;  %230 = vmatprep.subr.bf16.mxu1 %v7147_v8  ;;  %v7153_v16 = vld [vmem:[%s9434_s3 + $0x50] ss:$8 sps:$4 sm:$0x1f]   ;;  %v6029_v19 = vld [vmem:[%s9436_s4 + $0x8] sm:$0xff] }
  0x39   :  { %v111_v12 = vpack.c.bf16 %v110_v11, %v110_v11  ;;  %v186_v20 = vld [vmem:[%s9436_s4] sm:$0xff]  ;;  %v7151_v21 = vld [vmem:[%s9434_s3 + $0x54] ss:$8 sps:$4 sm:$0x1f]   ;;  %v445_v23 = vsel %vm138_vm0, %v7153_v16, 0  ;;  %v784_v47 = vld [vmem:[%s9437_s1 + $0xe8] sm:$0xff] }
  0x3a   :  { %v7156_v24 = vld [vmem:[%s9434_s3 + $0x44] ss:$8 sps:$4 sm:$0xff]   ;;  %v7154_v28 = vld [vmem:[%s9434_s3 + $0x40] ss:$8 sps:$4 sm:$0xff]   ;;  %v786_v43 = vld [vmem:[%s9437_s1 + $0xf8] sm:$0xff] }
  0x3b   :  { %160 = vmatpush1.bf16.msra.mxu0 %v7149_v9  ;;  %231 = vmatpush1.bf16.msra.mxu1 %v7150_v10  ;;  %v7159_v33 = vld [vmem:[%s9434_s3 + $0x70] ss:$8 sps:$4 sm:$0x1f]   ;;  %v7157_v35 = vld [vmem:[%s9434_s3 + $0x74] ss:$8 sps:$4 sm:$0x1f]  }
  0x3c   :  { %v599_v38 = vsel %vm138_vm0, %v7159_v33, 0  ;;  %v7162_v39 = vld [vmem:[%s9434_s3 + $0x64] ss:$8 sps:$4 sm:$0xff]   ;;  %v7160_v42 = vld [vmem:[%s9434_s3 + $0x60] ss:$8 sps:$4 sm:$0xff]   ;;  %v770_v44 = vld [vmem:[%s9437_s1 + $0x78] sm:$0xff] }
  0x3d   :  { %v785_v45 = vld [vmem:[%s9437_s1 + $0xf0] sm:$0xff]  ;;  %v768_v48 = vld [vmem:[%s9437_s1 + $0x68] sm:$0xff]  ;;  %v783_v49 = vld [vmem:[%s9437_s1 + $0xe0] sm:$0xff] }
  0x3e   :  { %6018 = vmatmul.mubr.msk.bf16.vlgmr.msra.gmra.mxu0 %vm134_vm1, %v111_v12  ;;  %6028 = vmatmul.mubr.msk.bf16.vlgmr.msra.gmra.mxu1 %vm134_vm1, %v111_v12  ;;  %v769_v46 = vld [vmem:[%s9437_s1 + $0x70] sm:$0xff]  ;;  %v767_v50 = vld [vmem:[%s9437_s1 + $0x60] sm:$0xff]  ;;  %v782_v51 = vld [vmem:[%s9437_s1 + $0xd8] sm:$0xff] }
  0x3f   :  { %334 = vmatprep.mubr.f32.mxu0 %v7711_v13  ;;  %414 = vmatprep.mubr.f32.mxu1 %v7711_v13  ;;  %v766_v52 = vld [vmem:[%s9437_s1 + $0x58] sm:$0xff]  ;;  %v781_v53 = vld [vmem:[%s9437_s1 + $0xd0] sm:$0xff]  ;;  %v780_v55 = vld [vmem:[%s9437_s1 + $0xc8] sm:$0xff] }
  0x40   :  { %v765_v54 = vld [vmem:[%s9437_s1 + $0x50] sm:$0xff]  ;;  %v764_v56 = vld [vmem:[%s9437_s1 + $0x48] sm:$0xff]  ;;  %v6060_v1 = vld [vmem:[%s9436_s4 + $0x18] sm:$0xff] }
  0x41   :  { %v779_v4 = vld [vmem:[%s9437_s1 + $0xc0] sm:$0xff]  ;;  %v778_v6 = vld [vmem:[%s9437_s1 + $0xb8] sm:$0xff]  ;;  %v777_v8 = vld [vmem:[%s9437_s1 + $0xb0] sm:$0xff] }
  0x42   :  { %v763_v5 = vld [vmem:[%s9437_s1 + $0x40] sm:$0xff]  ;;  %v762_v7 = vld [vmem:[%s9437_s1 + $0x38] sm:$0xff]  ;;  %v761_v9 = vld [vmem:[%s9437_s1 + $0x30] sm:$0xff] }
  0x43   :  { %v776_v10 = vld [vmem:[%s9437_s1 + $0xa8] sm:$0xff]  ;;  %v758_v16 = vld [vmem:[%s9437_s1 + $0x18] sm:$0xff] }
  0x44   :  { %v760_v11 = vld [vmem:[%s9437_s1 + $0x28] sm:$0xff] }
  0xfe   :  { %v179_v14 = vpop.f32.mrf.mxu0  ;;  %v250_v15 = vpop.f32.mrf.mxu1 }
 0x100   :  { %v181_v17 = vpop.f32.mrf.mxu0  ;;  %v252_v18 = vpop.f32.mrf.mxu1 }
 0x101   :  { %6030 = vmatprep.subr.msk.mxu0 %vm263_vm2, %v252_v18  ;;  %6033 = vmatprep.subr.msk.mxu1 %vm263_vm2, %v181_v17  ;;  %v773_v17 = vld [vmem:[%s9437_s1 + $0x90] sm:$0xff] }
 0x102   :  { %v254_v22 = vpop.f32.mrf.mxu1  ;;  %6031 = vmatpush1.msk.msra.mxu0 %vm263_vm2, %v250_v15  ;;  %6034 = vmatpush1.msk.msra.mxu1 %vm263_vm2, %v179_v14  ;;  %v183_v25 = vpop.f32.mrf.mxu0  ;;  %v759_v14 = vld [vmem:[%s9437_s1 + $0x20] sm:$0xff]  ;;  %v774_v15 = vld [vmem:[%s9437_s1 + $0x98] sm:$0xff]  ;;  %v757_v18 = vld [vmem:[%s9437_s1 + $0x10] sm:$0xff] }
 0x103   :  { %6032 = vmatmul.mubr.msk.f32.vlgmr.msra.gmra.mxu0 %vm259_vm3, %v6029_v19  ;;  %6035 = vmatmul.mubr.msk.f32.vlgmr.msra.gmra.mxu1 %vm259_vm3, %v186_v20  ;;  %v772_v19 = vld [vmem:[%s9437_s1 + $0x88] sm:$0xff]  ;;  %v755_v22 = vld [vmem:[%s9437_s1] sm:$0xff] }
 0x104   :  { %6044 = vmatprep.subr.msk.bf16.mxu0 %vm138_vm0, %v7151_v21  ;;  %v255_v26 = vpop.f32.mrf.mxu1  ;;  %482 = vmatprep.mubr.bf16.mxu0 %v7710_v0  ;;  %v184_v27 = vpop.f32.mrf.mxu0  ;;  %v756_v20 = vld [vmem:[%s9437_s1 + $0x8] sm:$0xff]  ;;  %v771_v21 = vld [vmem:[%s9437_s1 + $0x80] sm:$0xff] }
 0x105   :  { %463 = vmatpush1.bf16.msra.mxu0 %v445_v23  ;;  %566 = vmatprep.mubr.f32.mxu1 %v7711_v13  ;;  %v942_v23 = vld [vmem:[%s9438_s23 + $0x78] sm:$0xff] }
 0x106   :  { %464 = vmatprep.subr.bf16.mxu0 %v7156_v24 }
 0x109   :  { %465 = vmatpush1.bf16.msra.mxu0 %v7154_v28 }
 0x10c   :  { %6045 = vmatmul.mubr.msk.bf16.vlgmr.msra.gmra.mxu0 %vm134_vm1, %v111_v12 }
 0x10d   :  { %720 = vmatprep.mubr.f32.mxu0 %v7711_v13 }
 0x1c3   :  { %v336_v29 = vpop.f32.mrf.mxu0  ;;  %v416_v30 = vpop.f32.mrf.mxu1 }
 0x1c4   :  { %v417_v31 = vadd.f32 %v416_v30, %v336_v29 }
 0x1c5   :  { %v338_v32 = vpop.f32.mrf.mxu0  ;;  %v418_v57 = vpop.f32.mrf.mxu1 }
 0x1c6   :  { %v419_v59 = vadd.f32 %v418_v57, %v338_v32  ;;  %v938_v57 = vld [vmem:[%s9438_s23 + $0x58] sm:$0xff] }
 0x1cc   :  { %v484_v34 = vpop.f32.mrf.mxu0 }
 0x1ce   :  { %v486_v36 = vpop.f32.mrf.mxu0 }
 0x1cf   :  { %6047 = vmatprep.subr.msk.mxu1 %vm263_vm2, %v486_v36 }
 0x1d0   :  { %v488_v40 = vpop.f32.mrf.mxu0  ;;  %6048 = vmatpush1.msk.msra.mxu1 %vm263_vm2, %v484_v34 }
 0x1d1   :  { %6049 = vmatmul.mubr.msk.f32.vlgmr.msra.gmra.mxu1 %vm259_vm3, %v6046_v37  ;;  %6058 = vmatprep.subr.msk.bf16.mxu1 %vm138_vm0, %v7157_v35 }
 0x1d2   :  { %v489_v41 = vpop.f32.mrf.mxu0  ;;  %617 = vmatpush1.bf16.msra.mxu1 %v599_v38  ;;  %636 = vmatprep.mubr.bf16.mxu1 %v7710_v0 }
 0x1d3   :  { %618 = vmatprep.subr.bf16.mxu1 %v7162_v39 }
 0x1d6   :  { %619 = vmatpush1.bf16.msra.mxu1 %v7160_v42 }
 0x1d7   :  { %6680 = vmatprep.subr.mxu1 %v786_v43 }
 0x1d9   :  { %6059 = vmatmul.mubr.msk.bf16.vlgmr.msra.gmra.mxu1 %vm134_vm1, %v111_v12  ;;  %v775_v12 = vld [vmem:[%s9437_s1 + $0xa0] sm:$0xff]  ;;  %s9439_s1 = sld [smem:[#allocation14_spill]] }
 0x1da   :  { %6681 = vmatpush3.msra.mxu1 %v770_v44 }
 0x1db   :  { %6682 = vmatprep.subr.mxu1 %v785_v45 }
 0x1dc   :  { %6683 = vmatpush3.msra.mxu1 %v769_v46 }
 0x1dd   :  { %6684 = vmatprep.subr.mxu1 %v784_v47 }
 0x1de   :  { %6685 = vmatpush3.msra.mxu1 %v768_v48 }
 0x1df   :  { %6686 = vmatprep.subr.mxu1 %v783_v49 }
 0x1e0   :  { %6687 = vmatpush3.msra.mxu1 %v767_v50 }
 0x1e1   :  { %6688 = vmatprep.subr.mxu1 %v782_v51 }
 0x1e2   :  { %6689 = vmatpush3.msra.mxu1 %v766_v52 }
 0x1e3   :  { %6690 = vmatprep.subr.mxu1 %v781_v53 }
 0x1e4   :  { %6691 = vmatpush3.msra.mxu1 %v765_v54 }
 0x1e5   :  { %6692 = vmatprep.subr.mxu1 %v780_v55 }
 0x1e6   :  { %6693 = vmatpush3.msra.mxu1 %v764_v56 }
 0x1e7   :  { %6694 = vmatprep.subr.mxu1 %v779_v4 }
 0x1e8   :  { %6695 = vmatpush3.msra.mxu1 %v763_v5 }
 0x1e9   :  { %6696 = vmatprep.subr.mxu1 %v778_v6 }
 0x1ea   :  { %6697 = vmatpush3.msra.mxu1 %v762_v7 }
 0x1eb   :  { %6698 = vmatprep.subr.mxu1 %v777_v8 }
 0x1ec   :  { %6699 = vmatpush3.msra.mxu1 %v761_v9 }
 0x1ed   :  { %6700 = vmatprep.subr.mxu1 %v776_v10 }
 0x1ee   :  { %6701 = vmatpush3.msra.mxu1 %v760_v11 }
 0x1ef   :  { %6702 = vmatprep.subr.mxu1 %v775_v12 }
 0x1f0   :  { %6703 = vmatpush3.msra.mxu1 %v759_v14 }
 0x1f1   :  { %6704 = vmatprep.subr.mxu1 %v774_v15 }
 0x1f2   :  { %6705 = vmatpush3.msra.mxu1 %v758_v16 }
 0x1f3   :  { %6706 = vmatprep.subr.mxu1 %v773_v17 }
 0x1f4   :  { %6707 = vmatpush3.msra.mxu1 %v757_v18 }
 0x1f5   :  { %6708 = vmatprep.subr.mxu1 %v772_v19 }
 0x1f6   :  { %6709 = vmatpush3.msra.mxu1 %v756_v20 }
 0x1f7   :  { %6710 = vmatprep.subr.mxu1 %v771_v21 }
 0x1f8   :  { %6711 = vmatpush3.msra.mxu1 %v755_v22 }
 0x1f9   :  { %963 = vmatprep.subr.mxu1 %v942_v23 }
 0x291   :  { %v568_v58 = vpop.f32.mrf.mxu1 }
 0x292   :  { %v7962_v60 = vadd.f32 %v568_v58, %v417_v31  ;;  %v937_v58 = vld [vmem:[%s9438_s23 + $0x50] sm:$0xff] }
 0x293   :  { %v570_v61 = vpop.f32.mrf.mxu1 }
 0x294   :  { %v7964_v62 = vadd.f32 %v570_v61, %v419_v59  ;;  %v936_v59 = vld [vmem:[%s9438_s23 + $0x48] sm:$0xff]  ;;  %v934_v61 = vld [vmem:[%s9438_s23 + $0x38] sm:$0xff] }
 0x299   :  { %v638_v63 = vpop.f32.mrf.mxu1 }
 0x29b   :  { %v640_v0 = vpop.f32.mrf.mxu1 }
 0x29c   :  { %6061 = vmatprep.subr.msk.mxu0 %vm263_vm2, %v640_v0  ;;  %v931_v0 = vld [vmem:[%s9438_s23 + $0x20] sm:$0xff] }
 0x29d   :  { %v642_v2 = vpop.f32.mrf.mxu1  ;;  %6062 = vmatpush1.msk.msra.mxu0 %vm263_vm2, %v638_v63  ;;  %v932_v63 = vld [vmem:[%s9438_s23 + $0x28] sm:$0xff] }
 0x29e   :  { %6063 = vmatmul.mubr.msk.f32.vlgmr.msra.gmra.mxu0 %vm259_vm3, %v6060_v1  ;;  %6715 = vmatprep.subr.mxu0 %v786_v43  ;;  %v930_v1 = vld [vmem:[%s9438_s23 + $0x18] sm:$0xff]  ;;  %v929_v2 = vld [vmem:[%s9438_s23 + $0x10] sm:$0xff] }
 0x29f   :  { %v643_v3 = vpop.f32.mrf.mxu1  ;;  %6716 = vmatpush3.msra.mxu0 %v770_v44 }
 0x2a0   :  { %6717 = vmatprep.subr.mxu0 %v785_v45  ;;  %v928_v3 = vld [vmem:[%s9438_s23 + $0x8] sm:$0xff] }
 0x2a1   :  { %6718 = vmatpush3.msra.mxu0 %v769_v46 }
 0x2a2   :  { %6719 = vmatprep.subr.mxu0 %v784_v47 }
 0x2a3   :  { %6720 = vmatpush3.msra.mxu0 %v768_v48 }
 0x2a4   :  { %6721 = vmatprep.subr.mxu0 %v783_v49 }
 0x2a5   :  { %6722 = vmatpush3.msra.mxu0 %v767_v50 }
 0x2a6   :  { %6723 = vmatprep.subr.mxu0 %v782_v51 }
 0x2a7   :  { %6724 = vmatpush3.msra.mxu0 %v766_v52  ;;  %v941_v52 = vld [vmem:[%s9438_s23 + $0x70] sm:$0xff] }
 0x2a8   :  { %6725 = vmatprep.subr.mxu0 %v781_v53 }
 0x2a9   :  { %6726 = vmatpush3.msra.mxu0 %v765_v54  ;;  %v940_v54 = vld [vmem:[%s9438_s23 + $0x68] sm:$0xff] }
 0x2aa   :  { %6727 = vmatprep.subr.mxu0 %v780_v55 }
 0x2ab   :  { %6728 = vmatpush3.msra.mxu0 %v764_v56  ;;  %v939_v56 = vld [vmem:[%s9438_s23 + $0x60] sm:$0xff] }
 0x2ac   :  { %6729 = vmatprep.subr.mxu0 %v779_v4  ;;  %v927_v4 = vld [vmem:[%s9438_s23] sm:$0xff] }
 0x2ad   :  { %6730 = vmatpush3.msra.mxu0 %v763_v5  ;;  %v7165_v5 = vld [vmem:[%s9409_s7 + $0x74] ss:$8 sps:$4 sm:$0xff]  }
 0x2ae   :  { %6731 = vmatprep.subr.mxu0 %v778_v6  ;;  %v7168_v6 = vld [vmem:[%s9409_s7 + $0x174] ss:$8 sps:$4 sm:$0xff]  }
 0x2af   :  { %6732 = vmatpush3.msra.mxu0 %v762_v7 }
 0x2b0   :  { %6733 = vmatprep.subr.mxu0 %v777_v8 }
 0x2b1   :  { %6734 = vmatpush3.msra.mxu0 %v761_v9 }
 0x2b2   :  { %6735 = vmatprep.subr.mxu0 %v776_v10  ;;  %v7163_v10 = vld [vmem:[%s9409_s7 + $0x70] ss:$8 sps:$4 sm:$0xff]  }
 0x2b3   :  { %6736 = vmatpush3.msra.mxu0 %v760_v11 }
 0x2b4   :  { %6737 = vmatprep.subr.mxu0 %v775_v12  ;;  %v7171_v12 = vld [vmem:[%s9409_s7 + $0x64] ss:$8 sps:$4 sm:$0xff]  }
 0x2b5   :  { %6738 = vmatpush3.msra.mxu0 %v759_v14 }
 0x2b6   :  { %6739 = vmatprep.subr.mxu0 %v774_v15  ;;  %v7166_v15 = vld [vmem:[%s9409_s7 + $0x170] ss:$8 sps:$4 sm:$0xff]  }
 0x2b7   :  { %6740 = vmatpush3.msra.mxu0 %v758_v16 }
 0x2b8   :  { %6741 = vmatprep.subr.mxu0 %v773_v17  ;;  %v7174_v17 = vld [vmem:[%s9409_s7 + $0x164] ss:$8 sps:$4 sm:$0xff]  }
 0x2b9   :  { %6742 = vmatpush3.msra.mxu0 %v757_v18  ;;  %v7169_v18 = vld [vmem:[%s9409_s7 + $0x60] ss:$8 sps:$4 sm:$0xff]  }
 0x2ba   :  { %6743 = vmatprep.subr.mxu0 %v772_v19  ;;  %v7177_v19 = vld [vmem:[%s9409_s7 + $0x54] ss:$8 sps:$4 sm:$0xff]  }
 0x2bb   :  { %6744 = vmatpush3.msra.mxu0 %v756_v20  ;;  %v7172_v20 = vld [vmem:[%s9409_s7 + $0x160] ss:$8 sps:$4 sm:$0xff]  }
 0x2bc   :  { %6745 = vmatprep.subr.mxu0 %v771_v21  ;;  %v7180_v21 = vld [vmem:[%s9409_s7 + $0x154] ss:$8 sps:$4 sm:$0xff]  }
 0x2bd   :  { %6746 = vmatpush3.msra.mxu0 %v755_v22  ;;  %v7175_v22 = vld [vmem:[%s9409_s7 + $0x50] ss:$8 sps:$4 sm:$0xff]  }
 0x2be   :  { %1037 = vmatprep.subr.mxu0 %v942_v23  ;;  %v7183_v23 = vld [vmem:[%s9409_s7 + $0x44] ss:$8 sps:$4 sm:$0xff]  }
 0x35e   :  { %v722_v24 = vpop.f32.mrf.mxu0 }
 0x35f   :  { %v8030_v25 = vadd.f32 %v722_v24, %v7962_v60  ;;  %v935_v60 = vld [vmem:[%s9438_s23 + $0x40] sm:$0xff]  ;;  %v7178_v24 = vld [vmem:[%s9409_s7 + $0x150] ss:$8 sps:$4 sm:$0xff]  }
 0x360   :  { %v724_v26 = vpop.f32.mrf.mxu0 }
 0x361   :  { %v729_v27 = vrot.slane %v8030_v25, 4  ;;  %v741_v28 = vmul.f32 %v8030_v25, %v8030_v25  ;;  %v8036_v29 = vadd.f32 %v724_v26, %v7964_v62  ;;  %v933_v62 = vld [vmem:[%s9438_s23 + $0x30] sm:$0xff]  ;;  %v7186_v26 = vld [vmem:[%s9409_s7 + $0x144] ss:$8 sps:$4 sm:$0xff]  }
 0x363   :  { %v730_v30 = vadd.f32 %v729_v27, %v8030_v25  ;;  %v743_v31 = vrot.slane %v741_v28, 4  ;;  %v735_v32 = vrot.slane %v8036_v29, 4  ;;  %v742_v33 = vmul.f32 %v8036_v29, %v8036_v29  ;;  %v7181_v27 = vld [vmem:[%s9409_s7 + $0x40] ss:$8 sps:$4 sm:$0xff]  }
 0x365   :  { %v731_v34 = vrot.slane %v730_v30, 2  ;;  %v744_v35 = vadd.f32 %v743_v31, %v741_v28  ;;  %v736_v36 = vadd.f32 %v735_v32, %v8036_v29  ;;  %v749_v37 = vrot.slane %v742_v33, 4  ;;  %v7189_v28 = vld [vmem:[%s9409_s7 + $0x34] ss:$8 sps:$4 sm:$0xff]   ;;  %v7187_v32 = vld [vmem:[%s9409_s7 + $0x30] ss:$8 sps:$4 sm:$0xff]  }
 0x366   :  { %v7192_v31 = vld [vmem:[%s9409_s7 + $0x134] ss:$8 sps:$4 sm:$0xff]  }
 0x367   :  { %v737_v38 = vrot.slane %v736_v36, 2  ;;  %v732_v39 = vadd.f32 %v731_v34, %v730_v30  ;;  %v750_v40 = vadd.f32 %v749_v37, %v742_v33  ;;  %v745_v41 = vrot.slane %v744_v35, 2  ;;  %v7184_v30 = vld [vmem:[%s9409_s7 + $0x140] ss:$8 sps:$4 sm:$0xff]   ;;  %v7195_v33 = vld [vmem:[%s9409_s7 + $0x24] ss:$8 sps:$4 sm:$0xff]  }
 0x368   :  { %v7190_v34 = vld [vmem:[%s9409_s7 + $0x130] ss:$8 sps:$4 sm:$0xff]   ;;  %v7201_v37 = vld [vmem:[%s9409_s7 + $0x14] ss:$8 sps:$4 sm:$0xff]  }
 0x369   :  { %v738_v42 = vadd.f32 %v737_v38, %v736_v36  ;;  %v751_v43 = vrot.slane %v750_v40, 2  ;;  %v746_v44 = vadd.f32 %v745_v41, %v744_v35  ;;  %v733_v45 = vrot.slane %v732_v39, 1  ;;  %v7198_v35 = vld [vmem:[%s9409_s7 + $0x124] ss:$8 sps:$4 sm:$0xff]   ;;  %v7193_v36 = vld [vmem:[%s9409_s7 + $0x20] ss:$8 sps:$4 sm:$0xff]  }
 0x36a   :  { %v7196_v38 = vld [vmem:[%s9409_s7 + $0x120] ss:$8 sps:$4 sm:$0xff]   ;;  %v7202_v41 = vld [vmem:[%s9409_s7 + $0x110] ss:$8 sps:$4 sm:$0xff]  }
 0x36b   :  { %v739_v46 = vrot.slane %v738_v42, 1  ;;  %v752_v47 = vadd.f32 %v751_v43, %v750_v40  ;;  %v747_v48 = vrot.slane %v746_v44, 1  ;;  %v734_v51 = vadd.f32 %v733_v45, %v732_v39  ;;  %v7204_v39 = vld [vmem:[%s9409_s7 + $0x114] ss:$8 sps:$4 sm:$0xff]   ;;  %v7199_v40 = vld [vmem:[%s9409_s7 + $0x10] ss:$8 sps:$4 sm:$0xff]  }
 0x36c   :  { %v7210_v43 = vld [vmem:[%s9409_s7 + $0x104] ss:$8 sps:$4 sm:$0xff]   ;;  %v7208_v45 = vld [vmem:[%s9409_s7 + $0x100] ss:$8 sps:$4 sm:$0xff]  }
 0x36d   :  { %v740_v49 = vadd.f32 %v739_v46, %v738_v42  ;;  %v753_v50 = vrot.slane %v752_v47, 1  ;;  %v748_v55 = vadd.f32 %v747_v48, %v746_v44  ;;  %v7207_v42 = vld [vmem:[%s9409_s7 + $0x4] ss:$8 sps:$4 sm:$0xff]   ;;  %v7205_v44 = vld [vmem:[%s9409_s7] ss:$8 sps:$4 sm:$0xff]  }
 0x36e   :  { %v7213_v46 = vld [vmem:[%s9409_s7 + $0xf4] ss:$8 sps:$4 sm:$0xff]   ;;  %v7211_v48 = vld [vmem:[%s9409_s7 + $0xf0] ss:$8 sps:$4 sm:$0xff]  }
 0x36f   :  { %851 = vmatprep.mubr.f32.mxu1 %v740_v49  ;;  %v754_v53 = vadd.f32 %v753_v50, %v752_v47  ;;  %v7216_v47 = vld [vmem:[%s9409_s7 + $0x1f4] ss:$8 sps:$4 sm:$0xff]   ;;  %v7214_v49 = vld [vmem:[%s9409_s7 + $0x1f0] ss:$8 sps:$4 sm:$0xff]   ;;  %v7219_v50 = vld [vmem:[%s9409_s7 + $0xe4] ss:$8 sps:$4 sm:$0xff]  }
 0x370   :  { %852 = vmatmul.mubr.f32.vlgmr.msra.gmra.mxu1 %v734_v51  ;;  %v7222_v51 = vld [vmem:[%s9409_s7 + $0x1e4] ss:$8 sps:$4 sm:$0xff]  }
 0x371   :  { %921 = vmatprep.mubr.f32.mxu0 %v754_v53  ;;  %964 = vmatpush1.msra.mxu1 %v941_v52  ;;  %v7220_v53 = vld [vmem:[%s9409_s7 + $0x1e0] ss:$8 sps:$4 sm:$0xff]  }
 0x372   :  { %922 = vmatmul.mubr.f32.vlgmr.msra.gmra.mxu0 %v748_v55  ;;  %965 = vmatprep.subr.mxu1 %v940_v54  ;;  %v7225_v55 = vld [vmem:[%s9409_s7 + $0xd4] ss:$8 sps:$4 sm:$0xff]  }
 0x373   :  { %966 = vmatpush1.msra.mxu1 %v939_v56  ;;  %1038 = vmatpush1.msra.mxu0 %v941_v52  ;;  %v7217_v52 = vld [vmem:[%s9409_s7 + $0xe0] ss:$8 sps:$4 sm:$0xff]  }
 0x374   :  { %967 = vmatprep.subr.mxu1 %v938_v57  ;;  %1039 = vmatprep.subr.mxu0 %v940_v54  ;;  %v7223_v54 = vld [vmem:[%s9409_s7 + $0xd0] ss:$8 sps:$4 sm:$0xff]  }
 0x375   :  { %968 = vmatpush1.msra.mxu1 %v937_v58  ;;  %1040 = vmatpush1.msra.mxu0 %v939_v56  ;;  %v7226_v56 = vld [vmem:[%s9409_s7 + $0x1d0] ss:$8 sps:$4 sm:$0xff]  }
 0x376   :  { %969 = vmatprep.subr.mxu1 %v936_v59  ;;  %1041 = vmatprep.subr.mxu0 %v938_v57  ;;  %v7228_v57 = vld [vmem:[%s9409_s7 + $0x1d4] ss:$8 sps:$4 sm:$0xff]  }
 0x377   :  { %970 = vmatpush1.msra.mxu1 %v935_v60  ;;  %1042 = vmatpush1.msra.mxu0 %v937_v58  ;;  %v7231_v58 = vld [vmem:[%s9409_s7 + $0xc4] ss:$8 sps:$4 sm:$0xff]  }
 0x378   :  { %971 = vmatprep.subr.mxu1 %v934_v61  ;;  %1043 = vmatprep.subr.mxu0 %v936_v59  ;;  %v7234_v59 = vld [vmem:[%s9409_s7 + $0x1c4] ss:$8 sps:$4 sm:$0xff]  }
 0x379   :  { %972 = vmatpush1.msra.mxu1 %v933_v62  ;;  %1044 = vmatpush1.msra.mxu0 %v935_v60  ;;  %v7229_v60 = vld [vmem:[%s9409_s7 + $0xc0] ss:$8 sps:$4 sm:$0xff]  }
 0x37a   :  { %973 = vmatprep.subr.mxu1 %v932_v63  ;;  %1045 = vmatprep.subr.mxu0 %v934_v61  ;;  %v7232_v61 = vld [vmem:[%s9409_s7 + $0x1c0] ss:$8 sps:$4 sm:$0xff]  }
 0x37b   :  { %1046 = vmatpush1.msra.mxu0 %v933_v62  ;;  %1011 = vmatprep.mubr.f32.mxu1 %v7711_v13  ;;  %v7237_v62 = vld [vmem:[%s9409_s7 + $0xb4] ss:$8 sps:$4 sm:$0xff]  }
 0x37c   :  { %1047 = vmatprep.subr.mxu0 %v932_v63  ;;  %1085 = vmatprep.mubr.f32.mxu0 %v7711_v13  ;;  %v7240_v63 = vld [vmem:[%s9409_s7 + $0x1b4] ss:$8 sps:$4 sm:$0xff]  }
 0x37d   :  { %974 = vmatpush1.msra.mxu1 %v931_v0  ;;  %1048 = vmatpush1.msra.mxu0 %v931_v0  ;;  %v7235_v0 = vld [vmem:[%s9409_s7 + $0xb0] ss:$8 sps:$4 sm:$0xff]  }
 0x37e   :  { %975 = vmatprep.subr.mxu1 %v930_v1  ;;  %1049 = vmatprep.subr.mxu0 %v930_v1  ;;  %v7238_v1 = vld [vmem:[%s9409_s7 + $0x1b0] ss:$8 sps:$4 sm:$0xff]  }
 0x37f   :  { %976 = vmatpush1.msra.mxu1 %v929_v2  ;;  %1050 = vmatpush1.msra.mxu0 %v929_v2  ;;  %v7243_v2 = vld [vmem:[%s9409_s7 + $0xa4] ss:$8 sps:$4 sm:$0xff]  }
 0x380   :  { %977 = vmatprep.subr.mxu1 %v928_v3  ;;  %1051 = vmatprep.subr.mxu0 %v928_v3  ;;  %v7246_v3 = vld [vmem:[%s9409_s7 + $0x1a4] ss:$8 sps:$4 sm:$0xff]  }
 0x381   :  { %978 = vmatpush1.msra.mxu1 %v927_v4  ;;  %1052 = vmatpush1.msra.mxu0 %v927_v4  ;;  %v7241_v4 = vld [vmem:[%s9409_s7 + $0xa0] ss:$8 sps:$4 sm:$0xff]  }
 0x382   :  { %1344 = vmatprep.subr.bf16.mxu1 %v7165_v5  ;;  %1580 = vmatprep.subr.bf16.mxu0 %v7168_v6  ;;  %v7244_v5 = vld [vmem:[%s9409_s7 + $0x1a0] ss:$8 sps:$4 sm:$0xff]   ;;  %v7249_v6 = vld [vmem:[%s9409_s7 + $0x94] ss:$8 sps:$4 sm:$0xff]  }
 0x430   :  { %v6712_v7 = vpop.f32.mrf.mxu1 }
 0x432   :  { %v6713_v8 = vpop.f32.mrf.mxu1  ;;  %v6747_v9 = vpop.f32.mrf.mxu0 }
 0x433   :  { %v6714_v11 = vadd.f32 %v6713_v8, %v6712_v7  ;;  %v7252_v7 = vld [vmem:[%s9409_s7 + $0x194] ss:$8 sps:$4 sm:$0xff]   ;;  %v7247_v8 = vld [vmem:[%s9409_s7 + $0x90] ss:$8 sps:$4 sm:$0xff]  }
 0x434   :  { %v6748_v14 = vpop.f32.mrf.mxu0 }
 0x435   :  { %v6749_v16 = vadd.f32 %v6748_v14, %v6747_v9  ;;  %6064 = vmatmul.mubr.msk.f32.vlgmr.msra.gmra.mxu1 %vm943_vm4, %v6714_v11  ;;  %v7250_v9 = vld [vmem:[%s9409_s7 + $0x190] ss:$8 sps:$4 sm:$0xff]   ;;  %v7258_v11 = vld [vmem:[%s9409_s7 + $0x184] ss:$8 sps:$4 sm:$0xff]   ;;  %v7256_v14 = vld [vmem:[%s9409_s7 + $0x180] ss:$8 sps:$4 sm:$0xff]  }
 0x436   :  { %1345 = vmatpush1.bf16.msra.mxu1 %v7163_v10  ;;  %v7255_v10 = vld [vmem:[%s9409_s7 + $0x84] ss:$8 sps:$4 sm:$0xff]  }
 0x437   :  { %6065 = vmatmul.mubr.msk.f32.vlgmr.msra.gmra.mxu0 %vm943_vm4, %v6749_v16  ;;  %1346 = vmatprep.subr.bf16.mxu1 %v7171_v12  ;;  %v7253_v12 = vld [vmem:[%s9409_s7 + $0x80] ss:$8 sps:$4 sm:$0xff]  }
 0x438   :  { %1581 = vmatpush1.bf16.msra.mxu0 %v7166_v15 }
 0x439   :  { %1582 = vmatprep.subr.bf16.mxu0 %v7174_v17 }
 0x43a   :  { %1347 = vmatpush1.bf16.msra.mxu1 %v7169_v18 }
 0x43b   :  { %1348 = vmatprep.subr.bf16.mxu1 %v7177_v19 }
 0x43c   :  { %1583 = vmatpush1.bf16.msra.mxu0 %v7172_v20 }
 0x43d   :  { %1584 = vmatprep.subr.bf16.mxu0 %v7180_v21 }
 0x43e   :  { %1349 = vmatpush1.bf16.msra.mxu1 %v7175_v22  ;;  %v1096_v22 = vlaneseq }
 0x43f   :  { %1350 = vmatprep.subr.bf16.mxu1 %v7183_v23 }
 0x440   :  { %1585 = vmatpush1.bf16.msra.mxu0 %v7178_v24 }
 0x441   :  { %1586 = vmatprep.subr.bf16.mxu0 %v7186_v26 }
 0x442   :  { %1351 = vmatpush1.bf16.msra.mxu1 %v7181_v27  ;;  %v1097_v27 = vshrl.u32 %v1096_v22, 7  ;;  %v7291_v22 = vld [vmem:[%s9409_s7 + $0x2d4] ss:$8 sps:$4 sm:$0xff]  }
 0x443   :  { %1352 = vmatprep.subr.bf16.mxu1 %v7189_v28 }
 0x444   :  { %1587 = vmatpush1.bf16.msra.mxu0 %v7184_v30  ;;  %v8282_v28 = vsub.s32 0, %v1097_v27 }
 0x445   :  { %1588 = vmatprep.subr.bf16.mxu0 %v7192_v31  ;;  %v1120_v31 = vld [vmem:[%s9439_s1] sm:$0x3] }
 0x446   :  { %1353 = vmatpush1.bf16.msra.mxu1 %v7187_v32  ;;  %v8288_v32 = vsub.s32 1, %v1097_v27  ;;  %v7297_v27 = vld [vmem:[%s9409_s7 + $0x2b4] ss:$8 sps:$4 sm:$0xff]  }
 0x447   :  { %1354 = vmatprep.subr.bf16.mxu1 %v7195_v33 }
 0x448   :  { %1589 = vmatpush1.bf16.msra.mxu0 %v7190_v34 }
 0x449   :  { %1590 = vmatprep.subr.bf16.mxu0 %v7198_v35  ;;  %v1134_v35 = vld [vmem:[%s9408_s6] sm:$0x3] }
 0x44a   :  { %1355 = vmatpush1.bf16.msra.mxu1 %v7193_v36 }
 0x44b   :  { %1356 = vmatprep.subr.bf16.mxu1 %v7201_v37 }
 0x44c   :  { %1591 = vmatpush1.bf16.msra.mxu0 %v7196_v38  ;;  %v1125_v38 = vrot.slane %v1120_v31, %v8282_v28 }
 0x44d   :  { %1592 = vmatprep.subr.bf16.mxu0 %v7204_v39 }
 0x44e   :  { %1357 = vmatpush1.bf16.msra.mxu1 %v7199_v40  ;;  %v1129_v40 = vrot.slane %v1120_v31, %v8288_v32  ;;  %v7300_v31 = vld [vmem:[%s9409_s7 + $0x2a4] ss:$8 sps:$4 sm:$0xff]  }
 0x44f   :  { %1358 = vmatprep.subr.bf16.mxu1 %v7207_v42 }
 0x450   :  { %1593 = vmatpush1.bf16.msra.mxu0 %v7202_v41 }
 0x451   :  { %1594 = vmatprep.subr.bf16.mxu0 %v7210_v43 }
 0x452   :  { %1359 = vmatpush1.bf16.msra.mxu1 %v7205_v44  ;;  %v1139_v44 = vrot.slane %v1134_v35, %v8282_v28 }
 0x453   :  { %1360 = vmatprep.subr.bf16.mxu1 %v7213_v46  ;;  %v1143_v46 = vrot.slane %v1134_v35, %v8288_v32  ;;  %v7301_v35 = vld [vmem:[%s9409_s7 + $0x290] ss:$8 sps:$4 sm:$0xff]  }
 0x454   :  { %1595 = vmatpush1.bf16.msra.mxu0 %v7208_v45 }
 0x455   :  { %1596 = vmatprep.subr.bf16.mxu0 %v7216_v47 }
 0x456   :  { %1361 = vmatpush2.bf16.msra.mxu1 %v7211_v48 }
 0x457   :  { %1362 = vmatprep.subr.bf16.mxu1 %v7219_v50 }
 0x458   :  { %1597 = vmatpush2.bf16.msra.mxu0 %v7214_v49 }
 0x459   :  { %1598 = vmatprep.subr.bf16.mxu0 %v7222_v51 }
 0x45a   :  { %1363 = vmatpush2.bf16.msra.mxu1 %v7217_v52 }
 0x45b   :  { %1364 = vmatprep.subr.bf16.mxu1 %v7225_v55 }
 0x45c   :  { %1599 = vmatpush2.bf16.msra.mxu0 %v7220_v53 }
 0x45d   :  { %1600 = vmatprep.subr.bf16.mxu0 %v7228_v57  ;;  %v6162_v57 = vld [vmem:[%s9410_s8 + $0x10] sm:$0xff] }
 0x45e   :  { %1365 = vmatpush2.bf16.msra.mxu1 %v7223_v54 }
 0x45f   :  { %1366 = vmatprep.subr.bf16.mxu1 %v7231_v58  ;;  %v1385_v58 = vld [vmem:[%s9410_s8] sm:$0xff] }
 0x460   :  { %1601 = vmatpush2.bf16.msra.mxu0 %v7226_v56 }
 0x461   :  { %1602 = vmatprep.subr.bf16.mxu0 %v7234_v59  ;;  %v7261_v59 = vld [vmem:[%s9409_s7 + $0x274] ss:$8 sps:$4 sm:$0xff]  }
 0x462   :  { %1367 = vmatpush2.bf16.msra.mxu1 %v7229_v60  ;;  %v7259_v60 = vld [vmem:[%s9409_s7 + $0x270] ss:$8 sps:$4 sm:$0xff]  }
 0x463   :  { %1368 = vmatprep.subr.bf16.mxu1 %v7237_v62 }
 0x464   :  { %1603 = vmatpush2.bf16.msra.mxu0 %v7232_v61 }
 0x465   :  { %1604 = vmatprep.subr.bf16.mxu0 %v7240_v63  ;;  %v7264_v63 = vld [vmem:[%s9409_s7 + $0x264] ss:$8 sps:$4 sm:$0xff]  }
 0x466   :  { %1369 = vmatpush2.bf16.msra.mxu1 %v7235_v0 }
 0x467   :  { %1370 = vmatprep.subr.bf16.mxu1 %v7243_v2  ;;  %v6163_v2 = vld [vmem:[%s9410_s8 + $0x18] sm:$0xff] }
 0x468   :  { %1605 = vmatpush2.bf16.msra.mxu0 %v7238_v1 }
 0x469   :  { %1606 = vmatprep.subr.bf16.mxu0 %v7246_v3  ;;  %v1386_v3 = vld [vmem:[%s9410_s8 + $0x8] sm:$0xff] }
 0x46a   :  { %1371 = vmatpush2.bf16.msra.mxu1 %v7241_v4  ;;  %v7262_v4 = vld [vmem:[%s9409_s7 + $0x260] ss:$8 sps:$4 sm:$0xff]  }
 0x46b   :  { %1372 = vmatprep.subr.bf16.mxu1 %v7249_v6  ;;  %v7265_v6 = vld [vmem:[%s9409_s7 + $0x250] ss:$8 sps:$4 sm:$0xff]  }
 0x46c   :  { %1607 = vmatpush2.bf16.msra.mxu0 %v7244_v5  ;;  %v7267_v5 = vld [vmem:[%s9409_s7 + $0x254] ss:$8 sps:$4 sm:$0xff]  }
 0x46d   :  { %1608 = vmatprep.subr.bf16.mxu0 %v7252_v7  ;;  %v7270_v7 = vld [vmem:[%s9409_s7 + $0x244] ss:$8 sps:$4 sm:$0xff]  }
 0x46e   :  { %1373 = vmatpush2.bf16.msra.mxu1 %v7247_v8  ;;  %v7268_v8 = vld [vmem:[%s9409_s7 + $0x240] ss:$8 sps:$4 sm:$0xff]  }
 0x46f   :  { %1374 = vmatprep.subr.bf16.mxu1 %v7255_v10  ;;  %v7271_v10 = vld [vmem:[%s9409_s7 + $0x230] ss:$8 sps:$4 sm:$0xff]  }
 0x470   :  { %1609 = vmatpush2.bf16.msra.mxu0 %v7250_v9  ;;  %v7273_v9 = vld [vmem:[%s9409_s7 + $0x234] ss:$8 sps:$4 sm:$0xff]  }
 0x471   :  { %1610 = vmatprep.subr.bf16.mxu0 %v7258_v11  ;;  %v7276_v11 = vld [vmem:[%s9409_s7 + $0x224] ss:$8 sps:$4 sm:$0xff]  }
 0x472   :  { %1375 = vmatpush2.bf16.msra.mxu1 %v7253_v12  ;;  %v7274_v12 = vld [vmem:[%s9409_s7 + $0x220] ss:$8 sps:$4 sm:$0xff]  }
 0x474   :  { %1611 = vmatpush2.bf16.msra.mxu0 %v7256_v14  ;;  %v7279_v14 = vld [vmem:[%s9409_s7 + $0x214] ss:$8 sps:$4 sm:$0xff]  }
 0x4f5   :  { %v1013_v15 = vpop.f32.mrf.mxu1 }
 0x4f6   :  { %v1092_v16 = vmul.f32 %v1013_v15, %v1013_v15  ;;  %v1099_v30 = vrot.slane %v1013_v15, %v8282_v28  ;;  %v7277_v15 = vld [vmem:[%s9409_s7 + $0x210] ss:$8 sps:$4 sm:$0xff]  }
 0x4f7   :  { %v1015_v17 = vpop.f32.mrf.mxu1  ;;  %v1087_v18 = vpop.f32.mrf.mxu0 }
 0x4f8   :  { %v1093_v19 = vmul.f32 %v1015_v17, %v1015_v17  ;;  %v1094_v20 = vsub.f32 %v1087_v18, %v1092_v16  ;;  %v1103_v33 = vrot.slane %v1015_v17, %v8282_v28  ;;  %v1104_v36 = vsub.f32 %v8030_v25, %v1099_v30  ;;  %v7282_v16 = vld [vmem:[%s9409_s7 + $0x204] ss:$8 sps:$4 sm:$0xff]   ;;  %v7280_v17 = vld [vmem:[%s9409_s7 + $0x200] ss:$8 sps:$4 sm:$0xff]   ;;  %v7285_v18 = vld [vmem:[%s9409_s7 + $0x2f4] ss:$8 sps:$4 sm:$0xff]  }
 0x4f9   :  { %v1089_v21 = vpop.f32.mrf.mxu0  ;;  %v7295_v30 = vld [vmem:[%s9409_s7 + $0x2b0] ss:$8 sps:$4 sm:$0xff]  }
 0x4fa   :  { %v1106_v23 = vadd.f32 1e-05, %v1094_v20  ;;  %v1095_v24 = vsub.f32 %v1089_v21, %v1093_v19  ;;  %v1105_v41 = vsub.f32 %v8036_v29, %v1103_v33  ;;  %v7283_v19 = vld [vmem:[%s9409_s7 + $0x2f0] ss:$8 sps:$4 sm:$0xff]   ;;  %v7288_v20 = vld [vmem:[%s9409_s7 + $0x2e4] ss:$8 sps:$4 sm:$0xff]  }
 0x4fb   :  { %v7286_v21 = vld [vmem:[%s9409_s7 + $0x2e0] ss:$8 sps:$4 sm:$0xff]  }
 0x4fc   :  { %7611 = vrsqrt.f32 %v1106_v23  ;;  %v1107_v26 = vadd.f32 1e-05, %v1095_v24  ;;  %v7289_v23 = vld [vmem:[%s9409_s7 + $0x2d0] ss:$8 sps:$4 sm:$0xff]   ;;  %v7294_v24 = vld [vmem:[%s9409_s7 + $0x2c4] ss:$8 sps:$4 sm:$0xff]  }
 0x4fd   :  { %v7298_v33 = vld [vmem:[%s9409_s7 + $0x2a0] ss:$8 sps:$4 sm:$0xff]  }
 0x4fe   :  { %7613 = vrsqrt.f32 %v1107_v26  ;;  %v7292_v26 = vld [vmem:[%s9409_s7 + $0x2c0] ss:$8 sps:$4 sm:$0xff]  }
 0x509   :  { %v7612_v34 = vpop.eup %7611 }
 0x50a   :  { %v1113_v37 = vrot.slane %v7612_v34, %v8282_v28  ;;  %v7303_v34 = vld [vmem:[%s9409_s7 + $0x294] ss:$8 sps:$4 sm:$0xff]  }
 0x50b   :  { %v7614_v39 = vpop.eup %7613 }
 0x50c   :  { %v1117_v42 = vrot.slane %v7614_v39, %v8282_v28  ;;  %v1118_v43 = vmul.f32 %v1113_v37, %v1104_v36  ;;  %v7306_v36 = vld [vmem:[%s9409_s7 + $0x284] ss:$8 sps:$4 sm:$0xff]   ;;  %v7304_v37 = vld [vmem:[%s9409_s7 + $0x280] ss:$8 sps:$4 sm:$0xff]  }
 0x50e   :  { %v1119_v45 = vmul.f32 %v1117_v42, %v1105_v41  ;;  %v1132_v47 = vmul.f32 %v1125_v38, %v1118_v43 }
 0x510   :  { %v1133_v48 = vmul.f32 %v1129_v40, %v1119_v45  ;;  %v1146_v25 = vadd.f32 %v1139_v44, %v1132_v47 }
 0x512   :  { %v1147_v49 = vadd.f32 %v1143_v46, %v1133_v48  ;;  %v1148_v50 = vmax.f32 %v1146_v25, 0.0  ;;  %v7309_v25 = vld [vmem:[%s9409_s7 + $0x374] ss:$8 sps:$4 sm:$0xff]  }
 0x514   :  { %v1149_v51 = vmax.f32 %v1147_v49, 0.0  ;;  %v8304_v53 = vpack.c.bf16 %v1148_v50, %v1148_v50  ;;  %v6232_v50 = vld [vmem:[%s9410_s8 + $0x20] sm:$0xff] }
 0x516   :  { %v8302_v52 = vpack.c.bf16 %v1149_v51, %v1149_v51  ;;  %v7307_v51 = vld [vmem:[%s9409_s7 + $0x370] ss:$8 sps:$4 sm:$0xff]  }
 0x518   :  { %1376 = vmatprep.mubr.bf16.mxu1 %v8302_v52  ;;  %1612 = vmatprep.mubr.bf16.mxu0 %v8302_v52 }
 0x519   :  { %1377 = vmatmul.mubr.bf16.vlgmr.msra.gmra.mxu1 %v8304_v53  ;;  %1613 = vmatmul.mubr.bf16.vlgmr.msra.gmra.mxu0 %v8304_v53 }
 0x51a   :  { %1695 = vmatprep.mubr.f32.mxu1 %v7711_v13  ;;  %1778 = vmatprep.mubr.f32.mxu0 %v7711_v13 }
 0x5d9   :  { %v1378_v29 = vpop.f32.mrf.mxu1  ;;  %v1614_v54 = vpop.f32.mrf.mxu0 }
 0x5db   :  { %v1380_v55 = vpop.f32.mrf.mxu1  ;;  %v1616_v56 = vpop.f32.mrf.mxu0 }
 0x5dc   :  { %1661 = vmatprep.subr.mxu1 %v1616_v56  ;;  %1744 = vmatprep.subr.mxu0 %v1380_v55  ;;  %v6233_v56 = vld [vmem:[%s9410_s8 + $0x28] sm:$0xff] }
 0x5dd   :  { %v1382_v61 = vpop.f32.mrf.mxu1  ;;  %v1618_v62 = vpop.f32.mrf.mxu0  ;;  %1662 = vmatpush1.msra.mxu1 %v1614_v54  ;;  %1745 = vmatpush1.msra.mxu0 %v1378_v29  ;;  %v7312_v29 = vld [vmem:[%s9409_s7 + $0x364] ss:$8 sps:$4 sm:$0xff]  }
 0x5de   :  { %6164 = vmatmul.mubr.msk.f32.vlgmr.msra.gmra.mxu1 %vm1624_vm5, %v6162_v57  ;;  %6166 = vmatmul.mubr.msk.f32.vlgmr.msra.gmra.mxu0 %vm1624_vm5, %v1385_v58  ;;  %v7310_v57 = vld [vmem:[%s9409_s7 + $0x360] ss:$8 sps:$4 sm:$0xff]   ;;  %v7315_v58 = vld [vmem:[%s9409_s7 + $0x354] ss:$8 sps:$4 sm:$0xff]  }
 0x5df   :  { %1984 = vmatprep.subr.bf16.mxu1 %v7261_v59  ;;  %v1383_v0 = vpop.f32.mrf.mxu1  ;;  %v1619_v1 = vpop.f32.mrf.mxu0  ;;  %1701 = vmatprep.mubr.f32.mxu1 %v7711_v13  ;;  %v7313_v59 = vld [vmem:[%s9409_s7 + $0x350] ss:$8 sps:$4 sm:$0xff]   ;;  %v7316_v61 = vld [vmem:[%s9409_s7 + $0x340] ss:$8 sps:$4 sm:$0xff]   ;;  %v7321_v62 = vld [vmem:[%s9409_s7 + $0x334] ss:$8 sps:$4 sm:$0xff]  }
 0x5e0   :  { %1985 = vmatpush1.bf16.msra.mxu1 %v7259_v60  ;;  %1784 = vmatprep.mubr.f32.mxu0 %v7711_v13  ;;  %v7318_v60 = vld [vmem:[%s9409_s7 + $0x344] ss:$8 sps:$4 sm:$0xff]   ;;  %v7322_v0 = vld [vmem:[%s9409_s7 + $0x320] ss:$8 sps:$4 sm:$0xff]   ;;  %v7327_v1 = vld [vmem:[%s9409_s7 + $0x314] ss:$8 sps:$4 sm:$0xff]  }
 0x5e1   :  { %1986 = vmatprep.subr.bf16.mxu1 %v7264_v63  ;;  %v7324_v63 = vld [vmem:[%s9409_s7 + $0x324] ss:$8 sps:$4 sm:$0xff]  }
 0x5e2   :  { %6165 = vmatmul.mubr.msk.f32.gmra.mxu1 %vm1624_vm5, %v6163_v2  ;;  %6167 = vmatmul.mubr.msk.f32.gmra.mxu0 %vm1624_vm5, %v1386_v3  ;;  %v7325_v2 = vld [vmem:[%s9409_s7 + $0x310] ss:$8 sps:$4 sm:$0xff]   ;;  %v7330_v3 = vld [vmem:[%s9409_s7 + $0x304] ss:$8 sps:$4 sm:$0xff]  }
 0x5e3   :  { %2016 = vmatprep.mubr.bf16.mxu1 %v8302_v52  ;;  %2098 = vmatprep.mubr.f32.mxu0 %v7711_v13 }
 0x5e4   :  { %1987 = vmatpush1.bf16.msra.mxu1 %v7262_v4  ;;  %v7328_v4 = vld [vmem:[%s9409_s7 + $0x300] ss:$8 sps:$4 sm:$0xff]  }
 0x5e5   :  { %1988 = vmatprep.subr.bf16.mxu1 %v7267_v5  ;;  %v7333_v5 = vld [vmem:[%s9409_s7 + $0x3f4] ss:$8 sps:$4 sm:$0xff]  }
 0x5e8   :  { %1989 = vmatpush1.bf16.msra.mxu1 %v7265_v6  ;;  %v7331_v6 = vld [vmem:[%s9409_s7 + $0x3f0] ss:$8 sps:$4 sm:$0xff]  }
 0x5e9   :  { %1990 = vmatprep.subr.bf16.mxu1 %v7270_v7  ;;  %v7336_v7 = vld [vmem:[%s9409_s7 + $0x3e4] ss:$8 sps:$4 sm:$0xff]  }
 0x5ec   :  { %1991 = vmatpush1.bf16.msra.mxu1 %v7268_v8  ;;  %v7334_v8 = vld [vmem:[%s9409_s7 + $0x3e0] ss:$8 sps:$4 sm:$0xff]  }
 0x5ed   :  { %1992 = vmatprep.subr.bf16.mxu1 %v7273_v9  ;;  %v7339_v9 = vld [vmem:[%s9409_s7 + $0x3d4] ss:$8 sps:$4 sm:$0xff]  }
 0x5f0   :  { %1993 = vmatpush1.bf16.msra.mxu1 %v7271_v10  ;;  %v7337_v10 = vld [vmem:[%s9409_s7 + $0x3d0] ss:$8 sps:$4 sm:$0xff]  }
 0x5f1   :  { %1994 = vmatprep.subr.bf16.mxu1 %v7276_v11  ;;  %v7342_v11 = vld [vmem:[%s9409_s7 + $0x3c4] ss:$8 sps:$4 sm:$0xff]  }
 0x5f4   :  { %1995 = vmatpush1.bf16.msra.mxu1 %v7274_v12  ;;  %v7340_v12 = vld [vmem:[%s9409_s7 + $0x3c0] ss:$8 sps:$4 sm:$0xff]  }
 0x5f5   :  { %1996 = vmatprep.subr.bf16.mxu1 %v7279_v14  ;;  %v7345_v14 = vld [vmem:[%s9409_s7 + $0x3b4] ss:$8 sps:$4 sm:$0xff]  }
 0x5f8   :  { %1997 = vmatpush1.bf16.msra.mxu1 %v7277_v15  ;;  %v7343_v15 = vld [vmem:[%s9409_s7 + $0x3b0] ss:$8 sps:$4 sm:$0xff]  }
 0x5f9   :  { %1998 = vmatprep.subr.bf16.mxu1 %v7282_v16  ;;  %v7348_v16 = vld [vmem:[%s9409_s7 + $0x3a4] ss:$8 sps:$4 sm:$0xff]  }
 0x5fc   :  { %1999 = vmatpush1.bf16.msra.mxu1 %v7280_v17  ;;  %v7346_v17 = vld [vmem:[%s9409_s7 + $0x3a0] ss:$8 sps:$4 sm:$0xff]  }
 0x5fd   :  { %2000 = vmatprep.subr.bf16.mxu1 %v7285_v18  ;;  %v7351_v18 = vld [vmem:[%s9409_s7 + $0x394] ss:$8 sps:$4 sm:$0xff]  }
 0x600   :  { %2001 = vmatpush2.bf16.msra.mxu1 %v7283_v19  ;;  %v7349_v19 = vld [vmem:[%s9409_s7 + $0x390] ss:$8 sps:$4 sm:$0xff]  }
 0x601   :  { %2002 = vmatprep.subr.bf16.mxu1 %v7288_v20  ;;  %v7354_v20 = vld [vmem:[%s9409_s7 + $0x384] ss:$8 sps:$4 sm:$0xff]  }
 0x604   :  { %2003 = vmatpush2.bf16.msra.mxu1 %v7286_v21  ;;  %v7352_v21 = vld [vmem:[%s9409_s7 + $0x380] ss:$8 sps:$4 sm:$0xff]  }
 0x605   :  { %2004 = vmatprep.subr.bf16.mxu1 %v7291_v22  ;;  %v2502_v22 = vld [vmem:[%s9411_s9 + $0xf8] sm:$0xff] }
 0x608   :  { %2005 = vmatpush2.bf16.msra.mxu1 %v7289_v23  ;;  %v2486_v23 = vld [vmem:[%s9411_s9 + $0x78] sm:$0xff] }
 0x609   :  { %2006 = vmatprep.subr.bf16.mxu1 %v7294_v24  ;;  %v2501_v24 = vld [vmem:[%s9411_s9 + $0xf0] sm:$0xff] }
 0x60c   :  { %2007 = vmatpush2.bf16.msra.mxu1 %v7292_v26  ;;  %v2485_v26 = vld [vmem:[%s9411_s9 + $0x70] sm:$0xff] }
 0x60d   :  { %2008 = vmatprep.subr.bf16.mxu1 %v7297_v27  ;;  %v2484_v27 = vld [vmem:[%s9411_s9 + $0x68] sm:$0xff] }
 0x610   :  { %2009 = vmatpush2.bf16.msra.mxu1 %v7295_v30  ;;  %v2499_v30 = vld [vmem:[%s9411_s9 + $0xe0] sm:$0xff] }
 0x611   :  { %2010 = vmatprep.subr.bf16.mxu1 %v7300_v31  ;;  %v2483_v31 = vld [vmem:[%s9411_s9 + $0x60] sm:$0xff] }
 0x614   :  { %2011 = vmatpush2.bf16.msra.mxu1 %v7298_v33 }
 0x615   :  { %2012 = vmatprep.subr.bf16.mxu1 %v7303_v34 }
 0x618   :  { %2013 = vmatpush2.bf16.msra.mxu1 %v7301_v35 }
 0x619   :  { %2014 = vmatprep.subr.bf16.mxu1 %v7306_v36 }
 0x61c   :  { %2015 = vmatpush2.bf16.msra.mxu1 %v7304_v37 }
 0x61f   :  { %2017 = vmatmul.mubr.bf16.vlgmr.msra.gmra.mxu1 %v8304_v53 }
 0x620   :  { %2422 = vmatprep.mubr.f32.mxu1 %v7711_v13 }
 0x69e   :  { %v1697_v38 = vpop.f32.mrf.mxu1  ;;  %v1780_v39 = vpop.f32.mrf.mxu0 }
 0x69f   :  { %v8430_v40 = vadd.f32 %v1780_v39, %v1697_v38 }
 0x6a0   :  { %v1699_v41 = vpop.f32.mrf.mxu1  ;;  %v1782_v42 = vpop.f32.mrf.mxu0 }
 0x6a1   :  { %v8432_v43 = vadd.f32 %v1782_v42, %v1699_v41 }
 0x6a2   :  { %v1703_v44 = vpop.f32.mrf.mxu1  ;;  %v1786_v45 = vpop.f32.mrf.mxu0 }
 0x6a3   :  { %v8434_v46 = vadd.f32 %v1786_v45, %v1703_v44 }
 0x6a4   :  { %v8436_v47 = vpop.f32.mrf.mxu1  ;;  %v1788_v33 = vpop.f32.mrf.mxu0 }
 0x6a5   :  { %v1789_v39 = vadd.f32 %v1788_v33, %v8436_v47  ;;  %v2498_v47 = vld [vmem:[%s9411_s9 + $0xd8] sm:$0xff] }
 0x6df   :  { %v2018_v48 = vpop.f32.mrf.mxu1 }
 0x6e1   :  { %v2020_v49 = vpop.f32.mrf.mxu1 }
 0x6e2   :  { %2064 = vmatprep.subr.mxu0 %v2020_v49  ;;  %v2482_v49 = vld [vmem:[%s9411_s9 + $0x58] sm:$0xff] }
 0x6e3   :  { %v2022_v54 = vpop.f32.mrf.mxu1  ;;  %2065 = vmatpush1.msra.mxu0 %v2018_v48 }
 0x6e4   :  { %6234 = vmatmul.mubr.msk.f32.vlgmr.msra.gmra.mxu0 %vm1624_vm5, %v6232_v50  ;;  %2308 = vmatprep.subr.bf16.mxu0 %v7309_v25  ;;  %v2497_v50 = vld [vmem:[%s9411_s9 + $0xd0] sm:$0xff]  ;;  %v2480_v54 = vld [vmem:[%s9411_s9 + $0x48] sm:$0xff] }
 0x6e5   :  { %v2023_v55 = vpop.f32.mrf.mxu1  ;;  %2309 = vmatpush1.bf16.msra.mxu0 %v7307_v51  ;;  %2104 = vmatprep.mubr.f32.mxu0 %v7711_v13  ;;  %v2481_v51 = vld [vmem:[%s9411_s9 + $0x50] sm:$0xff] }
 0x6e6   :  { %2310 = vmatprep.subr.bf16.mxu0 %v7312_v29  ;;  %v2496_v29 = vld [vmem:[%s9411_s9 + $0xc8] sm:$0xff]  ;;  %v2495_v55 = vld [vmem:[%s9411_s9 + $0xc0] sm:$0xff] }
 0x6e8   :  { %6235 = vmatmul.mubr.msk.f32.gmra.mxu0 %vm1624_vm5, %v6233_v56  ;;  %v2479_v56 = vld [vmem:[%s9411_s9 + $0x40] sm:$0xff] }
 0x6e9   :  { %2311 = vmatpush1.bf16.msra.mxu0 %v7310_v57  ;;  %2340 = vmatprep.mubr.bf16.mxu0 %v8302_v52  ;;  %v7319_v52 = vld [vmem:[%s9409_s7 + $0x330] ss:$8 sps:$4 sm:$0xff]  }
 0x6ea   :  { %2312 = vmatprep.subr.bf16.mxu0 %v7315_v58  ;;  %v2494_v57 = vld [vmem:[%s9411_s9 + $0xb8] sm:$0xff] }
 0x6eb   :  { %v2478_v58 = vld [vmem:[%s9411_s9 + $0x38] sm:$0xff] }
 0x6ed   :  { %2313 = vmatpush1.bf16.msra.mxu0 %v7313_v59  ;;  %v2493_v59 = vld [vmem:[%s9411_s9 + $0xb0] sm:$0xff] }
 0x6ee   :  { %2314 = vmatprep.subr.bf16.mxu0 %v7318_v60  ;;  %v2477_v60 = vld [vmem:[%s9411_s9 + $0x30] sm:$0xff] }
 0x6f1   :  { %2315 = vmatpush1.bf16.msra.mxu0 %v7316_v61  ;;  %v2492_v61 = vld [vmem:[%s9411_s9 + $0xa8] sm:$0xff] }
 0x6f2   :  { %2316 = vmatprep.subr.bf16.mxu0 %v7321_v62  ;;  %v2476_v62 = vld [vmem:[%s9411_s9 + $0x28] sm:$0xff] }
 0x6f5   :  { %2317 = vmatpush1.bf16.msra.mxu0 %v7319_v52  ;;  %v2491_v52 = vld [vmem:[%s9411_s9 + $0xa0] sm:$0xff] }
 0x6f6   :  { %2318 = vmatprep.subr.bf16.mxu0 %v7324_v63  ;;  %v2475_v63 = vld [vmem:[%s9411_s9 + $0x20] sm:$0xff] }
 0x6f9   :  { %2319 = vmatpush1.bf16.msra.mxu0 %v7322_v0  ;;  %v2490_v0 = vld [vmem:[%s9411_s9 + $0x98] sm:$0xff] }
 0x6fa   :  { %2320 = vmatprep.subr.bf16.mxu0 %v7327_v1  ;;  %v2474_v1 = vld [vmem:[%s9411_s9 + $0x18] sm:$0xff] }
 0x6fd   :  { %2321 = vmatpush1.bf16.msra.mxu0 %v7325_v2  ;;  %v2489_v2 = vld [vmem:[%s9411_s9 + $0x90] sm:$0xff] }
 0x6fe   :  { %2322 = vmatprep.subr.bf16.mxu0 %v7330_v3  ;;  %v2473_v3 = vld [vmem:[%s9411_s9 + $0x10] sm:$0xff] }
 0x701   :  { %2323 = vmatpush1.bf16.msra.mxu0 %v7328_v4  ;;  %v2488_v4 = vld [vmem:[%s9411_s9 + $0x88] sm:$0xff] }
 0x702   :  { %2324 = vmatprep.subr.bf16.mxu0 %v7333_v5  ;;  %v2472_v5 = vld [vmem:[%s9411_s9 + $0x8] sm:$0xff] }
 0x705   :  { %2325 = vmatpush2.bf16.msra.mxu0 %v7331_v6  ;;  %v2487_v6 = vld [vmem:[%s9411_s9 + $0x80] sm:$0xff] }
 0x706   :  { %2326 = vmatprep.subr.bf16.mxu0 %v7336_v7  ;;  %v2471_v7 = vld [vmem:[%s9411_s9] sm:$0xff] }
 0x709   :  { %2327 = vmatpush2.bf16.msra.mxu0 %v7334_v8  ;;  %v2650_v8 = vld [vmem:[#allocation2 + $0x38] sm:$0xff] }
 0x70a   :  { %2328 = vmatprep.subr.bf16.mxu0 %v7339_v9 }
 0x70d   :  { %2329 = vmatpush2.bf16.msra.mxu0 %v7337_v10 }
 0x70e   :  { %2330 = vmatprep.subr.bf16.mxu0 %v7342_v11 }
 0x711   :  { %2331 = vmatpush2.bf16.msra.mxu0 %v7340_v12 }
 0x712   :  { %2332 = vmatprep.subr.bf16.mxu0 %v7345_v14 }
 0x715   :  { %2333 = vmatpush2.bf16.msra.mxu0 %v7343_v15 }
 0x716   :  { %2334 = vmatprep.subr.bf16.mxu0 %v7348_v16 }
 0x719   :  { %2335 = vmatpush2.bf16.msra.mxu0 %v7346_v17 }
 0x71a   :  { %2336 = vmatprep.subr.bf16.mxu0 %v7351_v18 }
 0x71d   :  { %2337 = vmatpush2.bf16.msra.mxu0 %v7349_v19 }
 0x71e   :  { %2338 = vmatprep.subr.bf16.mxu0 %v7354_v20 }
 0x721   :  { %2339 = vmatpush2.bf16.msra.mxu0 %v7352_v21 }
 0x722   :  { %6785 = vmatprep.subr.mxu0 %v2502_v22 }
 0x724   :  { %2341 = vmatmul.mubr.bf16.vlgmr.msra.gmra.mxu0 %v8304_v53  ;;  %v2500_v53 = vld [vmem:[%s9411_s9 + $0xe8] sm:$0xff] }
 0x725   :  { %6786 = vmatpush3.msra.mxu0 %v2486_v23 }
 0x726   :  { %6787 = vmatprep.subr.mxu0 %v2501_v24 }
 0x727   :  { %6788 = vmatpush3.msra.mxu0 %v2485_v26 }
 0x728   :  { %6789 = vmatprep.subr.mxu0 %v2500_v53 }
 0x729   :  { %6790 = vmatpush3.msra.mxu0 %v2484_v27 }
 0x72a   :  { %6791 = vmatprep.subr.mxu0 %v2499_v30 }
 0x72b   :  { %6792 = vmatpush3.msra.mxu0 %v2483_v31 }
 0x72c   :  { %6793 = vmatprep.subr.mxu0 %v2498_v47 }
 0x72d   :  { %6794 = vmatpush3.msra.mxu0 %v2482_v49 }
 0x72e   :  { %6795 = vmatprep.subr.mxu0 %v2497_v50 }
 0x72f   :  { %6796 = vmatpush3.msra.mxu0 %v2481_v51 }
 0x730   :  { %6797 = vmatprep.subr.mxu0 %v2496_v29 }
 0x731   :  { %6798 = vmatpush3.msra.mxu0 %v2480_v54 }
 0x732   :  { %6799 = vmatprep.subr.mxu0 %v2495_v55 }
 0x733   :  { %6800 = vmatpush3.msra.mxu0 %v2479_v56 }
 0x734   :  { %6801 = vmatprep.subr.mxu0 %v2494_v57 }
 0x735   :  { %6802 = vmatpush3.msra.mxu0 %v2478_v58 }
 0x736   :  { %6803 = vmatprep.subr.mxu0 %v2493_v59 }
 0x737   :  { %6804 = vmatpush3.msra.mxu0 %v2477_v60 }
 0x738   :  { %6805 = vmatprep.subr.mxu0 %v2492_v61 }
 0x739   :  { %6806 = vmatpush3.msra.mxu0 %v2476_v62 }
 0x73a   :  { %6807 = vmatprep.subr.mxu0 %v2491_v52 }
 0x73b   :  { %6808 = vmatpush3.msra.mxu0 %v2475_v63 }
 0x73c   :  { %6809 = vmatprep.subr.mxu0 %v2490_v0 }
 0x73d   :  { %6810 = vmatpush3.msra.mxu0 %v2474_v1 }
 0x73e   :  { %6811 = vmatprep.subr.mxu0 %v2489_v2 }
 0x73f   :  { %6812 = vmatpush3.msra.mxu0 %v2473_v3 }
 0x740   :  { %6813 = vmatprep.subr.mxu0 %v2488_v4 }
 0x741   :  { %6814 = vmatpush3.msra.mxu0 %v2472_v5 }
 0x742   :  { %6815 = vmatprep.subr.mxu0 %v2487_v6 }
 0x743   :  { %6816 = vmatpush3.msra.mxu0 %v2471_v7 }
 0x744   :  { %2753 = vmatprep.subr.mxu0 %v2650_v8 }
 0x7a4   :  { %v2100_v34 = vpop.f32.mrf.mxu0 }
 0x7a5   :  { %v8570_v35 = vadd.f32 %v2100_v34, %v8430_v40  ;;  %v6300_v40 = vld [vmem:[%s9410_s8 + $0x30] sm:$0xff] }
 0x7a6   :  { %v2102_v36 = vpop.f32.mrf.mxu0 }
 0x7a7   :  { %v8573_v37 = vadd.f32 %v2102_v36, %v8432_v43 }
 0x7a8   :  { %v2106_v38 = vpop.f32.mrf.mxu0 }
 0x7a9   :  { %v8577_v41 = vadd.f32 %v2106_v38, %v8434_v46  ;;  %v6301_v46 = vld [vmem:[%s9410_s8 + $0x38] sm:$0xff] }
 0x7aa   :  { %v2108_v42 = vpop.f32.mrf.mxu0 }
 0x7ab   :  { %v8579_v44 = vadd.f32 %v2108_v42, %v1789_v39 }
 0x7e4   :  { %v2342_v45 = vpop.f32.mrf.mxu0 }
 0x7e6   :  { %v2344_v48 = vpop.f32.mrf.mxu0 }
 0x7e7   :  { %2388 = vmatprep.subr.mxu1 %v2344_v48 }
 0x7e8   :  { %v2346_v25 = vpop.f32.mrf.mxu0  ;;  %2389 = vmatpush1.msra.mxu1 %v2342_v45 }
 0x7e9   :  { %6302 = vmatmul.mubr.msk.f32.vlgmr.msra.gmra.mxu1 %vm1624_vm5, %v6300_v40  ;;  %6750 = vmatprep.subr.mxu1 %v2502_v22 }
 0x7ea   :  { %v2347_v43 = vpop.f32.mrf.mxu0  ;;  %2428 = vmatprep.mubr.f32.mxu1 %v7711_v13  ;;  %6751 = vmatpush3.msra.mxu1 %v2486_v23 }
 0x7eb   :  { %6752 = vmatprep.subr.mxu1 %v2501_v24 }
 0x7ec   :  { %6753 = vmatpush3.msra.mxu1 %v2485_v26 }
 0x7ed   :  { %6303 = vmatmul.mubr.msk.f32.gmra.mxu1 %vm1624_vm5, %v6301_v46  ;;  %6754 = vmatprep.subr.mxu1 %v2500_v53 }
 0x7ee   :  { %6755 = vmatpush3.msra.mxu1 %v2484_v27 }
 0x7ef   :  { %6756 = vmatprep.subr.mxu1 %v2499_v30 }
 0x7f0   :  { %6757 = vmatpush3.msra.mxu1 %v2483_v31 }
 0x7f1   :  { %6758 = vmatprep.subr.mxu1 %v2498_v47 }
 0x7f2   :  { %6759 = vmatpush3.msra.mxu1 %v2482_v49 }
 0x7f3   :  { %6760 = vmatprep.subr.mxu1 %v2497_v50  ;;  %v2649_v50 = vld [vmem:[#allocation2 + $0x30] sm:$0xff] }
 0x7f4   :  { %6761 = vmatpush3.msra.mxu1 %v2481_v51 }
 0x7f5   :  { %6762 = vmatprep.subr.mxu1 %v2496_v29  ;;  %v2648_v29 = vld [vmem:[#allocation2 + $0x28] sm:$0xff] }
 0x7f6   :  { %6763 = vmatpush3.msra.mxu1 %v2480_v54 }
 0x7f7   :  { %6764 = vmatprep.subr.mxu1 %v2495_v55  ;;  %v2647_v55 = vld [vmem:[#allocation2 + $0x20] sm:$0xff] }
 0x7f8   :  { %6765 = vmatpush3.msra.mxu1 %v2479_v56  ;;  %v2646_v56 = vld [vmem:[#allocation2 + $0x18] sm:$0xff] }
 0x7f9   :  { %6766 = vmatprep.subr.mxu1 %v2494_v57  ;;  %v2645_v57 = vld [vmem:[#allocation2 + $0x10] sm:$0xff] }
 0x7fa   :  { %6767 = vmatpush3.msra.mxu1 %v2478_v58  ;;  %v2644_v58 = vld [vmem:[#allocation2 + $0x8] sm:$0xff] }
 0x7fb   :  { %6768 = vmatprep.subr.mxu1 %v2493_v59  ;;  %v2643_v59 = vld [vmem:[#allocation2] sm:$0xff] }
 0x7fc   :  { %6769 = vmatpush3.msra.mxu1 %v2477_v60  ;;  %v7357_v60 = vld [vmem:[#allocation4 + $0x74] ss:$8 sps:$4 sm:$0xff]  }
 0x7fd   :  { %6770 = vmatprep.subr.mxu1 %v2492_v61  ;;  %v7360_v61 = vld [vmem:[#allocation4 + $0x174] ss:$8 sps:$4 sm:$0xff]  }
 0x7fe   :  { %6771 = vmatpush3.msra.mxu1 %v2476_v62 }
 0x7ff   :  { %6772 = vmatprep.subr.mxu1 %v2491_v52 }
 0x800   :  { %6773 = vmatpush3.msra.mxu1 %v2475_v63 }
 0x801   :  { %6774 = vmatprep.subr.mxu1 %v2490_v0  ;;  %v7355_v0 = vld [vmem:[#allocation4 + $0x70] ss:$8 sps:$4 sm:$0xff]  }
 0x802   :  { %6775 = vmatpush3.msra.mxu1 %v2474_v1 }
 0x803   :  { %6776 = vmatprep.subr.mxu1 %v2489_v2  ;;  %v7363_v2 = vld [vmem:[#allocation4 + $0x64] ss:$8 sps:$4 sm:$0xff]  }
 0x804   :  { %6777 = vmatpush3.msra.mxu1 %v2473_v3 }
 0x805   :  { %6778 = vmatprep.subr.mxu1 %v2488_v4  ;;  %v7358_v4 = vld [vmem:[#allocation4 + $0x170] ss:$8 sps:$4 sm:$0xff]  }
 0x806   :  { %6779 = vmatpush3.msra.mxu1 %v2472_v5 }
 0x807   :  { %6780 = vmatprep.subr.mxu1 %v2487_v6  ;;  %v7366_v6 = vld [vmem:[#allocation4 + $0x164] ss:$8 sps:$4 sm:$0xff]  }
 0x808   :  { %6781 = vmatpush3.msra.mxu1 %v2471_v7  ;;  %v7361_v7 = vld [vmem:[#allocation4 + $0x60] ss:$8 sps:$4 sm:$0xff]  }
 0x809   :  { %2679 = vmatprep.subr.mxu1 %v2650_v8  ;;  %v7369_v8 = vld [vmem:[#allocation4 + $0x54] ss:$8 sps:$4 sm:$0xff]  }
 0x8a9   :  { %v2424_v9 = vpop.f32.mrf.mxu1 }
 0x8aa   :  { %v8663_v11 = vadd.f32 %v2424_v9, %v8570_v35  ;;  %v7364_v9 = vld [vmem:[#allocation4 + $0x160] ss:$8 sps:$4 sm:$0xff]  }
 0x8ab   :  { %v2426_v10 = vpop.f32.mrf.mxu1 }
 0x8ac   :  { %v8666_v12 = vadd.f32 %v2426_v10, %v8573_v37  ;;  %v2453_v17 = vmul.f32 %v8663_v11, %v8663_v11  ;;  %v7372_v10 = vld [vmem:[#allocation4 + $0x154] ss:$8 sps:$4 sm:$0xff]  }
 0x8ad   :  { %v2430_v14 = vpop.f32.mrf.mxu1 }
 0x8ae   :  { %v8669_v15 = vadd.f32 %v2430_v14, %v8577_v41  ;;  %v2454_v21 = vmul.f32 %v8666_v12, %v8666_v12  ;;  %v7367_v14 = vld [vmem:[#allocation4 + $0x50] ss:$8 sps:$4 sm:$0xff]  }
 0x8af   :  { %v2432_v16 = vpop.f32.mrf.mxu1 }
 0x8b0   :  { %v2439_v18 = vadd.f32 %v8669_v15, %v8663_v11  ;;  %v2455_v19 = vmul.f32 %v8669_v15, %v8669_v15  ;;  %v8678_v20 = vadd.f32 %v2432_v16, %v8579_v44  ;;  %v7375_v16 = vld [vmem:[#allocation4 + $0x44] ss:$8 sps:$4 sm:$0xff]  }
 0x8b2   :  { %v2440_v22 = vrot.slane %v2439_v18, 4  ;;  %v2457_v23 = vadd.f32 %v2455_v19, %v2453_v17  ;;  %v2446_v24 = vadd.f32 %v8678_v20, %v8666_v12  ;;  %v2456_v26 = vmul.f32 %v8678_v20, %v8678_v20  ;;  %v7370_v17 = vld [vmem:[#allocation4 + $0x150] ss:$8 sps:$4 sm:$0xff]   ;;  %v7373_v19 = vld [vmem:[#allocation4 + $0x40] ss:$8 sps:$4 sm:$0xff]  }
 0x8b4   :  { %v2441_v53 = vadd.f32 %v2440_v22, %v2439_v18  ;;  %v2458_v27 = vrot.slane %v2457_v23, 4  ;;  %v2447_v30 = vrot.slane %v2446_v24, 4  ;;  %v2464_v31 = vadd.f32 %v2456_v26, %v2454_v21  ;;  %v7378_v18 = vld [vmem:[#allocation4 + $0x144] ss:$8 sps:$4 sm:$0xff]   ;;  %v7381_v21 = vld [vmem:[#allocation4 + $0x34] ss:$8 sps:$4 sm:$0xff]  }
 0x8b5   :  { %v7376_v22 = vld [vmem:[#allocation4 + $0x140] ss:$8 sps:$4 sm:$0xff]   ;;  %v7387_v26 = vld [vmem:[#allocation4 + $0x24] ss:$8 sps:$4 sm:$0xff]  }
 0x8b6   :  { %v2442_v33 = vrot.slane %v2441_v53, 2  ;;  %v2459_v34 = vadd.f32 %v2458_v27, %v2457_v23  ;;  %v2448_v35 = vadd.f32 %v2447_v30, %v2446_v24  ;;  %v2465_v36 = vrot.slane %v2464_v31, 4  ;;  %v7384_v23 = vld [vmem:[#allocation4 + $0x134] ss:$8 sps:$4 sm:$0xff]   ;;  %v7379_v24 = vld [vmem:[#allocation4 + $0x30] ss:$8 sps:$4 sm:$0xff]  }
 0x8b7   :  { %v7390_v27 = vld [vmem:[#allocation4 + $0x124] ss:$8 sps:$4 sm:$0xff]   ;;  %v7385_v30 = vld [vmem:[#allocation4 + $0x20] ss:$8 sps:$4 sm:$0xff]  }
 0x8b8   :  { %v2443_v37 = vadd.f32 %v2442_v33, %v2441_v53  ;;  %v2460_v38 = vrot.slane %v2459_v34, 2  ;;  %v2449_v39 = vrot.slane %v2448_v35, 2  ;;  %v2466_v41 = vadd.f32 %v2465_v36, %v2464_v31  ;;  %v7382_v53 = vld [vmem:[#allocation4 + $0x130] ss:$8 sps:$4 sm:$0xff]   ;;  %v7393_v31 = vld [vmem:[#allocation4 + $0x14] ss:$8 sps:$4 sm:$0xff]  }
 0x8b9   :  { %v7388_v33 = vld [vmem:[#allocation4 + $0x120] ss:$8 sps:$4 sm:$0xff]   ;;  %v7394_v36 = vld [vmem:[#allocation4 + $0x110] ss:$8 sps:$4 sm:$0xff]  }
 0x8ba   :  { %v2450_v42 = vadd.f32 %v2449_v39, %v2448_v35  ;;  %v2467_v44 = vrot.slane %v2466_v41, 2  ;;  %v2461_v45 = vadd.f32 %v2460_v38, %v2459_v34  ;;  %v2444_v48 = vrot.slane %v2443_v37, 1  ;;  %v7396_v34 = vld [vmem:[#allocation4 + $0x114] ss:$8 sps:$4 sm:$0xff]   ;;  %v7391_v35 = vld [vmem:[#allocation4 + $0x10] ss:$8 sps:$4 sm:$0xff]  }
 0x8bb   :  { %v7402_v38 = vld [vmem:[#allocation4 + $0x104] ss:$8 sps:$4 sm:$0xff]   ;;  %v7397_v39 = vld [vmem:[#allocation4] ss:$8 sps:$4 sm:$0xff]  }
 0x8bc   :  { %v2451_v40 = vrot.slane %v2450_v42, 1  ;;  %v2468_v25 = vadd.f32 %v2467_v44, %v2466_v41  ;;  %v2462_v43 = vrot.slane %v2461_v45, 1  ;;  %v2445_v49 = vadd.f32 %v2444_v48, %v2443_v37  ;;  %v7399_v37 = vld [vmem:[#allocation4 + $0x4] ss:$8 sps:$4 sm:$0xff]   ;;  %v7400_v41 = vld [vmem:[#allocation4 + $0x100] ss:$8 sps:$4 sm:$0xff]  }
 0x8bd   :  { %v7408_v44 = vld [vmem:[#allocation4 + $0x1f4] ss:$8 sps:$4 sm:$0xff]   ;;  %v7406_v48 = vld [vmem:[#allocation4 + $0x1f0] ss:$8 sps:$4 sm:$0xff]  }
 0x8be   :  { %v2452_v46 = vadd.f32 %v2451_v40, %v2450_v42  ;;  %v2469_v47 = vrot.slane %v2468_v25, 1  ;;  %v2463_v54 = vadd.f32 %v2462_v43, %v2461_v45  ;;  %v7405_v42 = vld [vmem:[#allocation4 + $0xf4] ss:$8 sps:$4 sm:$0xff]   ;;  %v7403_v45 = vld [vmem:[#allocation4 + $0xf0] ss:$8 sps:$4 sm:$0xff]  }
 0x8bf   :  { %v7411_v40 = vld [vmem:[#allocation4 + $0xe4] ss:$8 sps:$4 sm:$0xff]   ;;  %v7409_v43 = vld [vmem:[#allocation4 + $0xe0] ss:$8 sps:$4 sm:$0xff]  }
 0x8c0   :  { %2567 = vmatprep.mubr.f32.mxu1 %v2452_v46  ;;  %v2470_v51 = vadd.f32 %v2469_v47, %v2468_v25  ;;  %v7414_v25 = vld [vmem:[#allocation4 + $0x1e4] ss:$8 sps:$4 sm:$0xff]   ;;  %v7412_v46 = vld [vmem:[#allocation4 + $0x1e0] ss:$8 sps:$4 sm:$0xff]   ;;  %v7417_v47 = vld [vmem:[#allocation4 + $0xd4] ss:$8 sps:$4 sm:$0xff]  }
 0x8c1   :  { %2568 = vmatmul.mubr.f32.vlgmr.msra.gmra.mxu1 %v2445_v49  ;;  %v7420_v49 = vld [vmem:[#allocation4 + $0x1d4] ss:$8 sps:$4 sm:$0xff]  }
 0x8c2   :  { %2637 = vmatprep.mubr.f32.mxu0 %v2470_v51  ;;  %2680 = vmatpush1.msra.mxu1 %v2649_v50  ;;  %v7418_v51 = vld [vmem:[#allocation4 + $0x1d0] ss:$8 sps:$4 sm:$0xff]  }
 0x8c3   :  { %2638 = vmatmul.mubr.f32.vlgmr.msra.gmra.mxu0 %v2463_v54  ;;  %2681 = vmatprep.subr.mxu1 %v2648_v29  ;;  %v7426_v54 = vld [vmem:[#allocation4 + $0x1c4] ss:$8 sps:$4 sm:$0xff]  }
 0x8c4   :  { %2754 = vmatpush1.msra.mxu0 %v2649_v50  ;;  %2719 = vmatprep.mubr.f32.mxu1 %v7711_v13  ;;  %v7415_v50 = vld [vmem:[#allocation4 + $0xd0] ss:$8 sps:$4 sm:$0xff]  }
 0x8c5   :  { %2755 = vmatprep.subr.mxu0 %v2648_v29  ;;  %2793 = vmatprep.mubr.f32.mxu0 %v7711_v13  ;;  %v7423_v29 = vld [vmem:[#allocation4 + $0xc4] ss:$8 sps:$4 sm:$0xff]  }
 0x8c6   :  { %2682 = vmatpush1.msra.mxu1 %v2647_v55  ;;  %2756 = vmatpush1.msra.mxu0 %v2647_v55  ;;  %v7421_v55 = vld [vmem:[#allocation4 + $0xc0] ss:$8 sps:$4 sm:$0xff]  }
 0x8c7   :  { %2683 = vmatprep.subr.mxu1 %v2646_v56  ;;  %2757 = vmatprep.subr.mxu0 %v2646_v56  ;;  %v7424_v56 = vld [vmem:[#allocation4 + $0x1c0] ss:$8 sps:$4 sm:$0xff]  }
 0x8c8   :  { %2684 = vmatpush1.msra.mxu1 %v2645_v57  ;;  %2758 = vmatpush1.msra.mxu0 %v2645_v57  ;;  %v7429_v57 = vld [vmem:[#allocation4 + $0xb4] ss:$8 sps:$4 sm:$0xff]  }
 0x8c9   :  { %2685 = vmatprep.subr.mxu1 %v2644_v58  ;;  %2759 = vmatprep.subr.mxu0 %v2644_v58  ;;  %v7432_v58 = vld [vmem:[#allocation4 + $0x1b4] ss:$8 sps:$4 sm:$0xff]  }
 0x8ca   :  { %2686 = vmatpush1.msra.mxu1 %v2643_v59  ;;  %2760 = vmatpush1.msra.mxu0 %v2643_v59  ;;  %v7427_v59 = vld [vmem:[#allocation4 + $0xb0] ss:$8 sps:$4 sm:$0xff]  }
 0x8cb   :  { %3062 = vmatprep.subr.bf16.mxu1 %v7357_v60  ;;  %3302 = vmatprep.subr.bf16.mxu0 %v7360_v61  ;;  %v7430_v60 = vld [vmem:[#allocation4 + $0x1b0] ss:$8 sps:$4 sm:$0xff]   ;;  %v7433_v61 = vld [vmem:[#allocation4 + $0xa0] ss:$8 sps:$4 sm:$0xff]  }
 0x981   :  { %v6782_v62 = vpop.f32.mrf.mxu1 }
 0x983   :  { %v6783_v52 = vpop.f32.mrf.mxu1  ;;  %v6817_v63 = vpop.f32.mrf.mxu0 }
 0x984   :  { %v6784_v1 = vadd.f32 %v6783_v52, %v6782_v62  ;;  %v7435_v62 = vld [vmem:[#allocation4 + $0xa4] ss:$8 sps:$4 sm:$0xff]   ;;  %v7436_v52 = vld [vmem:[#allocation4 + $0x1a0] ss:$8 sps:$4 sm:$0xff]  }
 0x985   :  { %v6818_v3 = vpop.f32.mrf.mxu0 }
 0x986   :  { %v6819_v5 = vadd.f32 %v6818_v3, %v6817_v63  ;;  %6304 = vmatmul.mubr.msk.f32.vlgmr.msra.gmra.mxu1 %vm2651_vm6, %v6784_v1  ;;  %v7438_v63 = vld [vmem:[#allocation4 + $0x1a4] ss:$8 sps:$4 sm:$0xff]   ;;  %v7444_v1 = vld [vmem:[#allocation4 + $0x194] ss:$8 sps:$4 sm:$0xff]   ;;  %v7442_v3 = vld [vmem:[#allocation4 + $0x190] ss:$8 sps:$4 sm:$0xff]  }
 0x987   :  { %3063 = vmatpush1.bf16.msra.mxu1 %v7355_v0  ;;  %v7441_v0 = vld [vmem:[#allocation4 + $0x94] ss:$8 sps:$4 sm:$0xff]  }
 0x988   :  { %6305 = vmatmul.mubr.msk.f32.vlgmr.msra.gmra.mxu0 %vm2651_vm6, %v6819_v5  ;;  %3064 = vmatprep.subr.bf16.mxu1 %v7363_v2  ;;  %v7439_v2 = vld [vmem:[#allocation4 + $0x90] ss:$8 sps:$4 sm:$0xff]   ;;  %v7450_v5 = vld [vmem:[#allocation4 + $0x184] ss:$8 sps:$4 sm:$0xff]  }
 0x989   :  { %3303 = vmatpush1.bf16.msra.mxu0 %v7358_v4  ;;  %v7447_v4 = vld [vmem:[#allocation4 + $0x84] ss:$8 sps:$4 sm:$0xff]  }
 0x98a   :  { %3304 = vmatprep.subr.bf16.mxu0 %v7366_v6  ;;  %v7445_v6 = vld [vmem:[#allocation4 + $0x80] ss:$8 sps:$4 sm:$0xff]  }
 0x98b   :  { %3065 = vmatpush1.bf16.msra.mxu1 %v7361_v7  ;;  %v7448_v7 = vld [vmem:[#allocation4 + $0x180] ss:$8 sps:$4 sm:$0xff]  }
 0x98c   :  { %3066 = vmatprep.subr.bf16.mxu1 %v7369_v8 }
 0x98d   :  { %3305 = vmatpush1.bf16.msra.mxu0 %v7364_v9 }
 0x98e   :  { %3306 = vmatprep.subr.bf16.mxu0 %v7372_v10 }
 0x98f   :  { %3067 = vmatpush1.bf16.msra.mxu1 %v7367_v14 }
 0x990   :  { %3068 = vmatprep.subr.bf16.mxu1 %v7375_v16 }
 0x991   :  { %3307 = vmatpush1.bf16.msra.mxu0 %v7370_v17 }
 0x992   :  { %3308 = vmatprep.subr.bf16.mxu0 %v7378_v18 }
 0x993   :  { %3069 = vmatpush1.bf16.msra.mxu1 %v7373_v19 }
 0x994   :  { %3070 = vmatprep.subr.bf16.mxu1 %v7381_v21 }
 0x995   :  { %3309 = vmatpush1.bf16.msra.mxu0 %v7376_v22 }
 0x996   :  { %3310 = vmatprep.subr.bf16.mxu0 %v7384_v23 }
 0x997   :  { %3071 = vmatpush1.bf16.msra.mxu1 %v7379_v24 }
 0x998   :  { %3072 = vmatprep.subr.bf16.mxu1 %v7387_v26  ;;  %v2832_v26 = vld [vmem:[%s9413_s11] sm:$0x3] }
 0x999   :  { %3311 = vmatpush1.bf16.msra.mxu0 %v7382_v53 }
 0x99a   :  { %3312 = vmatprep.subr.bf16.mxu0 %v7390_v27  ;;  %v2848_v27 = vld [vmem:[%s9414_s12] sm:$0x3] }
 0x99b   :  { %3073 = vmatpush1.bf16.msra.mxu1 %v7385_v30 }
 0x99c   :  { %3074 = vmatprep.subr.bf16.mxu1 %v7393_v31 }
 0x99d   :  { %3313 = vmatpush1.bf16.msra.mxu0 %v7388_v33 }
 0x99e   :  { %3314 = vmatprep.subr.bf16.mxu0 %v7396_v34 }
 0x99f   :  { %3075 = vmatpush1.bf16.msra.mxu1 %v7391_v35  ;;  %v2837_v35 = vrot.slane %v2832_v26, %v8282_v28 }
 0x9a0   :  { %3076 = vmatprep.subr.bf16.mxu1 %v7399_v37 }
 0x9a1   :  { %3315 = vmatpush1.bf16.msra.mxu0 %v7394_v36 }
 0x9a2   :  { %3316 = vmatprep.subr.bf16.mxu0 %v7402_v38 }
 0x9a3   :  { %3077 = vmatpush1.bf16.msra.mxu1 %v7397_v39  ;;  %v2841_v39 = vrot.slane %v2832_v26, %v8288_v32  ;;  %v7469_v26 = vld [vmem:[#allocation4 + $0x210] ss:$8 sps:$4 sm:$0xff]  }
 0x9a4   :  { %3078 = vmatprep.subr.bf16.mxu1 %v7405_v42 }
 0x9a5   :  { %3317 = vmatpush1.bf16.msra.mxu0 %v7400_v41 }
 0x9a6   :  { %3318 = vmatprep.subr.bf16.mxu0 %v7408_v44  ;;  %v2853_v44 = vrot.slane %v2848_v27, %v8282_v28 }
 0x9a7   :  { %3079 = vmatpush2.bf16.msra.mxu1 %v7403_v45 }
 0x9a8   :  { %3080 = vmatprep.subr.bf16.mxu1 %v7411_v40 }
 0x9a9   :  { %3319 = vmatpush2.bf16.msra.mxu0 %v7406_v48 }
 0x9aa   :  { %3320 = vmatprep.subr.bf16.mxu0 %v7414_v25 }
 0x9ab   :  { %3081 = vmatpush2.bf16.msra.mxu1 %v7409_v43 }
 0x9ac   :  { %3082 = vmatprep.subr.bf16.mxu1 %v7417_v47 }
 0x9ad   :  { %3321 = vmatpush2.bf16.msra.mxu0 %v7412_v46 }
 0x9ae   :  { %3322 = vmatprep.subr.bf16.mxu0 %v7420_v49 }
 0x9af   :  { %3083 = vmatpush2.bf16.msra.mxu1 %v7415_v50 }
 0x9b0   :  { %3084 = vmatprep.subr.bf16.mxu1 %v7423_v29 }
 0x9b1   :  { %3323 = vmatpush2.bf16.msra.mxu0 %v7418_v51 }
 0x9b2   :  { %3324 = vmatprep.subr.bf16.mxu0 %v7426_v54 }
 0x9b3   :  { %3085 = vmatpush2.bf16.msra.mxu1 %v7421_v55 }
 0x9b4   :  { %3086 = vmatprep.subr.bf16.mxu1 %v7429_v57 }
 0x9b5   :  { %3325 = vmatpush2.bf16.msra.mxu0 %v7424_v56 }
 0x9b6   :  { %3326 = vmatprep.subr.bf16.mxu0 %v7432_v58 }
 0x9b7   :  { %3087 = vmatpush2.bf16.msra.mxu1 %v7427_v59 }
 0x9b8   :  { %3088 = vmatprep.subr.bf16.mxu1 %v7435_v62 }
 0x9b9   :  { %3327 = vmatpush2.bf16.msra.mxu0 %v7430_v60 }
 0x9ba   :  { %3328 = vmatprep.subr.bf16.mxu0 %v7438_v63  ;;  %v6370_v63 = vld [vmem:[%s9416_s14 + $0x20] sm:$0xff] }
 0x9bb   :  { %3089 = vmatpush2.bf16.msra.mxu1 %v7433_v61 }
 0x9bc   :  { %3090 = vmatprep.subr.bf16.mxu1 %v7441_v0  ;;  %v3105_v0 = vld [vmem:[%s9416_s14] sm:$0xff] }
 0x9bd   :  { %3329 = vmatpush2.bf16.msra.mxu0 %v7436_v52 }
 0x9be   :  { %3330 = vmatprep.subr.bf16.mxu0 %v7444_v1  ;;  %v7453_v1 = vld [vmem:[#allocation4 + $0x274] ss:$8 sps:$4 sm:$0xff]  }
 0x9bf   :  { %3091 = vmatpush2.bf16.msra.mxu1 %v7439_v2  ;;  %v7451_v2 = vld [vmem:[#allocation4 + $0x270] ss:$8 sps:$4 sm:$0xff]  }
 0x9c0   :  { %3092 = vmatprep.subr.bf16.mxu1 %v7447_v4  ;;  %v6371_v4 = vld [vmem:[%s9416_s14 + $0x28] sm:$0xff] }
 0x9c1   :  { %3331 = vmatpush2.bf16.msra.mxu0 %v7442_v3  ;;  %v7456_v3 = vld [vmem:[#allocation4 + $0x264] ss:$8 sps:$4 sm:$0xff]  }
 0x9c2   :  { %3332 = vmatprep.subr.bf16.mxu0 %v7450_v5  ;;  %v3106_v5 = vld [vmem:[%s9416_s14 + $0x8] sm:$0xff] }
 0x9c3   :  { %3093 = vmatpush2.bf16.msra.mxu1 %v7445_v6  ;;  %v7454_v6 = vld [vmem:[#allocation4 + $0x260] ss:$8 sps:$4 sm:$0xff]  }
 0x9c5   :  { %3333 = vmatpush2.bf16.msra.mxu0 %v7448_v7  ;;  %v7459_v7 = vld [vmem:[#allocation4 + $0x254] ss:$8 sps:$4 sm:$0xff]  }
 0xa46   :  { %v2721_v8 = vpop.f32.mrf.mxu1 }
 0xa47   :  { %v2800_v9 = vmul.f32 %v2721_v8, %v2721_v8  ;;  %v2807_v23 = vrot.slane %v2721_v8, %v8282_v28  ;;  %v6372_v8 = vld [vmem:[%s9416_s14 + $0x30] sm:$0xff] }
 0xa48   :  { %v2723_v10 = vpop.f32.mrf.mxu1  ;;  %v2795_v14 = vpop.f32.mrf.mxu0 }
 0xa49   :  { %v2801_v16 = vmul.f32 %v2723_v10, %v2723_v10  ;;  %v2802_v17 = vsub.f32 %v2795_v14, %v2800_v9  ;;  %v2811_v24 = vrot.slane %v2723_v10, %v8282_v28  ;;  %v2812_v31 = vsub.f32 %v8663_v11, %v2807_v23  ;;  %v3107_v9 = vld [vmem:[%s9416_s14 + $0x10] sm:$0xff]  ;;  %v7462_v14 = vld [vmem:[#allocation4 + $0x244] ss:$8 sps:$4 sm:$0xff]  }
 0xa4a   :  { %v2797_v18 = vpop.f32.mrf.mxu0  ;;  %v2814_v33 = vsub.f32 %v8669_v15, %v2807_v23  ;;  %v2857_v15 = vrot.slane %v2848_v27, %v8288_v32  ;;  %v7457_v10 = vld [vmem:[#allocation4 + $0x250] ss:$8 sps:$4 sm:$0xff]   ;;  %v7466_v23 = vld [vmem:[#allocation4 + $0x220] ss:$8 sps:$4 sm:$0xff]  }
 0xa4b   :  { %v2803_v19 = vsub.f32 %v2797_v18, %v2801_v16  ;;  %v2816_v21 = vadd.f32 1e-05, %v2802_v17  ;;  %v2813_v36 = vsub.f32 %v8666_v12, %v2811_v24  ;;  %v2815_v37 = vsub.f32 %v8678_v20, %v2811_v24  ;;  %v6373_v16 = vld [vmem:[%s9416_s14 + $0x38] sm:$0xff]  ;;  %v7460_v18 = vld [vmem:[#allocation4 + $0x240] ss:$8 sps:$4 sm:$0xff]  }
 0xa4c   :  { %v3108_v17 = vld [vmem:[%s9416_s14 + $0x18] sm:$0xff]  ;;  %v7472_v27 = vld [vmem:[#allocation4 + $0x200] ss:$8 sps:$4 sm:$0xff]  }
 0xa4d   :  { %v2817_v22 = vadd.f32 1e-05, %v2803_v19  ;;  %7615 = vrsqrt.f32 %v2816_v21  ;;  %v7465_v19 = vld [vmem:[#allocation4 + $0x234] ss:$8 sps:$4 sm:$0xff]   ;;  %v7463_v21 = vld [vmem:[#allocation4 + $0x230] ss:$8 sps:$4 sm:$0xff]  }
 0xa4e   :  { %v7471_v24 = vld [vmem:[#allocation4 + $0x214] ss:$8 sps:$4 sm:$0xff]  }
 0xa4f   :  { %7617 = vrsqrt.f32 %v2817_v22  ;;  %v7468_v22 = vld [vmem:[#allocation4 + $0x224] ss:$8 sps:$4 sm:$0xff]  }
 0xa5a   :  { %v7616_v53 = vpop.eup %7615 }
 0xa5b   :  { %v2823_v34 = vrot.slane %v7616_v53, %v8282_v28  ;;  %v7474_v53 = vld [vmem:[#allocation4 + $0x204] ss:$8 sps:$4 sm:$0xff]  }
 0xa5c   :  { %v7618_v30 = vpop.eup %7617 }
 0xa5d   :  { %v2827_v38 = vrot.slane %v7618_v30, %v8282_v28  ;;  %v2828_v41 = vmul.f32 %v2823_v34, %v2812_v31  ;;  %v2830_v42 = vmul.f32 %v2823_v34, %v2814_v33  ;;  %v7477_v30 = vld [vmem:[#allocation4 + $0x2f4] ss:$8 sps:$4 sm:$0xff]   ;;  %v7475_v31 = vld [vmem:[#allocation4 + $0x2f0] ss:$8 sps:$4 sm:$0xff]   ;;  %v7480_v33 = vld [vmem:[#allocation4 + $0x2e4] ss:$8 sps:$4 sm:$0xff]  }
 0xa5e   :  { %v7478_v34 = vld [vmem:[#allocation4 + $0x2e0] ss:$8 sps:$4 sm:$0xff]  }
 0xa5f   :  { %v2829_v45 = vmul.f32 %v2827_v38, %v2813_v36  ;;  %v2831_v11 = vmul.f32 %v2827_v38, %v2815_v37  ;;  %v2844_v48 = vmul.f32 %v2837_v35, %v2828_v41  ;;  %v2846_v40 = vmul.f32 %v2837_v35, %v2830_v42  ;;  %v7483_v35 = vld [vmem:[#allocation4 + $0x2d4] ss:$8 sps:$4 sm:$0xff]   ;;  %v7481_v36 = vld [vmem:[#allocation4 + $0x2d0] ss:$8 sps:$4 sm:$0xff]   ;;  %v7486_v37 = vld [vmem:[#allocation4 + $0x2c4] ss:$8 sps:$4 sm:$0xff]  }
 0xa60   :  { %v7484_v38 = vld [vmem:[#allocation4 + $0x2c0] ss:$8 sps:$4 sm:$0xff]   ;;  %v7487_v41 = vld [vmem:[#allocation4 + $0x2b0] ss:$8 sps:$4 sm:$0xff]   ;;  %v7492_v42 = vld [vmem:[#allocation4 + $0x2a4] ss:$8 sps:$4 sm:$0xff]  }
 0xa61   :  { %v2845_v25 = vmul.f32 %v2841_v39, %v2829_v45  ;;  %v2847_v43 = vmul.f32 %v2841_v39, %v2831_v11  ;;  %v2860_v46 = vadd.f32 %v2853_v44, %v2844_v48  ;;  %v2862_v12 = vadd.f32 %v2853_v44, %v2846_v40  ;;  %v7489_v39 = vld [vmem:[#allocation4 + $0x2b4] ss:$8 sps:$4 sm:$0xff]   ;;  %v7490_v44 = vld [vmem:[#allocation4 + $0x2a0] ss:$8 sps:$4 sm:$0xff]   ;;  %v7493_v11 = vld [vmem:[#allocation4 + $0x290] ss:$8 sps:$4 sm:$0xff]  }
 0xa62   :  { %v7495_v45 = vld [vmem:[#allocation4 + $0x294] ss:$8 sps:$4 sm:$0xff]   ;;  %v7496_v48 = vld [vmem:[#allocation4 + $0x280] ss:$8 sps:$4 sm:$0xff]  }
 0xa63   :  { %v2861_v47 = vadd.f32 %v2857_v15, %v2845_v25  ;;  %v2863_v20 = vadd.f32 %v2857_v15, %v2847_v43  ;;  %v2864_v49 = vmax.f32 %v2860_v46, 0.0  ;;  %v2866_v50 = vmax.f32 %v2862_v12, 0.0  ;;  %v7498_v15 = vld [vmem:[#allocation4 + $0x284] ss:$8 sps:$4 sm:$0xff]  }
 0xa65   :  { %v2865_v51 = vmax.f32 %v2861_v47, 0.0  ;;  %v2867_v29 = vmax.f32 %v2863_v20, 0.0  ;;  %v8710_v55 = vpack.c.bf16 %v2866_v50, %v2864_v49 }
 0xa67   :  { %v8708_v54 = vpack.c.bf16 %v2867_v29, %v2865_v51 }
 0xa69   :  { %3094 = vmatprep.mubr.bf16.mxu1 %v8708_v54  ;;  %3334 = vmatprep.mubr.bf16.mxu0 %v8708_v54 }
 0xa6a   :  { %3095 = vmatmul.mubr.bf16.vlgmr.msra.gmra.mxu1 %v8710_v55  ;;  %3335 = vmatmul.mubr.bf16.vlgmr.msra.gmra.mxu0 %v8710_v55 }
 0xa6b   :  { %3427 = vmatprep.mubr.f32.mxu1 %v7711_v13  ;;  %3528 = vmatprep.mubr.f32.mxu0 %v7711_v13 }
 0xb2a   :  { %v3096_v56 = vpop.f32.mrf.mxu1  ;;  %v3336_v57 = vpop.f32.mrf.mxu0 }
 0xb2c   :  { %v3098_v58 = vpop.f32.mrf.mxu1  ;;  %v3338_v59 = vpop.f32.mrf.mxu0 }
 0xb2e   :  { %v3100_v60 = vpop.f32.mrf.mxu1  ;;  %v3340_v61 = vpop.f32.mrf.mxu0 }
 0xb30   :  { %v3102_v62 = vpop.f32.mrf.mxu1  ;;  %v3342_v52 = vpop.f32.mrf.mxu0 }
 0xb31   :  { %3391 = vmatprep.subr.mxu1 %v3342_v52  ;;  %3492 = vmatprep.subr.mxu0 %v3102_v62 }
 0xb32   :  { %3392 = vmatpush1.msra.mxu1 %v3340_v61  ;;  %3493 = vmatpush1.msra.mxu0 %v3100_v60 }
 0xb33   :  { %3393 = vmatprep.subr.mxu1 %v3338_v59  ;;  %3494 = vmatprep.subr.mxu0 %v3098_v58 }
 0xb34   :  { %3394 = vmatpush1.msra.mxu1 %v3336_v57  ;;  %3495 = vmatpush1.msra.mxu0 %v3096_v56 }
 0xb35   :  { %6374 = vmatmul.mubr.msk.f32.vlgmr.msra.gmra.mxu1 %vm3350_vm7, %v6370_v63  ;;  %6378 = vmatmul.mubr.msk.f32.vlgmr.msra.gmra.mxu0 %vm3350_vm7, %v3105_v0 }
 0xb36   :  { %3746 = vmatprep.subr.bf16.mxu1 %v7453_v1  ;;  %3433 = vmatprep.mubr.f32.mxu1 %v7711_v13 }
 0xb37   :  { %3747 = vmatpush1.bf16.msra.mxu1 %v7451_v2  ;;  %3534 = vmatprep.mubr.f32.mxu0 %v7711_v13 }
 0xb38   :  { %3748 = vmatprep.subr.bf16.mxu1 %v7456_v3 }
 0xb39   :  { %6375 = vmatmul.mubr.msk.f32.gmra.mxu1 %vm3350_vm7, %v6371_v4  ;;  %6379 = vmatmul.mubr.msk.f32.gmra.mxu0 %vm3350_vm7, %v3106_v5 }
 0xb3a   :  { %3439 = vmatprep.mubr.f32.mxu1 %v7711_v13  ;;  %3540 = vmatprep.mubr.f32.mxu0 %v7711_v13 }
 0xb3b   :  { %3749 = vmatpush1.bf16.msra.mxu1 %v7454_v6  ;;  %v7501_v6 = vld [vmem:[#allocation4 + $0x374] ss:$8 sps:$4 sm:$0xff]  }
 0xb3c   :  { %3750 = vmatprep.subr.bf16.mxu1 %v7459_v7  ;;  %v6414_v7 = vld [vmem:[%s9416_s14 + $0x40] sm:$0xff] }
 0xb3d   :  { %6376 = vmatmul.mubr.msk.f32.gmra.mxu1 %vm3350_vm7, %v6372_v8  ;;  %6380 = vmatmul.mubr.msk.f32.gmra.mxu0 %vm3350_vm7, %v3107_v9  ;;  %v7499_v8 = vld [vmem:[#allocation4 + $0x370] ss:$8 sps:$4 sm:$0xff]   ;;  %v7504_v9 = vld [vmem:[#allocation4 + $0x364] ss:$8 sps:$4 sm:$0xff]  }
 0xb3e   :  { %3445 = vmatprep.mubr.f32.mxu1 %v7711_v13  ;;  %3546 = vmatprep.mubr.f32.mxu0 %v7711_v13 }
 0xb3f   :  { %3751 = vmatpush1.bf16.msra.mxu1 %v7457_v10  ;;  %v6415_v10 = vld [vmem:[%s9416_s14 + $0x48] sm:$0xff] }
 0xb40   :  { %3752 = vmatprep.subr.bf16.mxu1 %v7462_v14  ;;  %v7502_v14 = vld [vmem:[#allocation4 + $0x360] ss:$8 sps:$4 sm:$0xff]  }
 0xb41   :  { %6377 = vmatmul.mubr.msk.f32.gmra.mxu1 %vm3350_vm7, %v6373_v16  ;;  %6381 = vmatmul.mubr.msk.f32.gmra.mxu0 %vm3350_vm7, %v3108_v17  ;;  %v7507_v16 = vld [vmem:[#allocation4 + $0x354] ss:$8 sps:$4 sm:$0xff]  }
 0xb42   :  { %3778 = vmatprep.mubr.bf16.mxu1 %v8708_v54  ;;  %3870 = vmatprep.mubr.f32.mxu0 %v7711_v13  ;;  %v6416_v17 = vld [vmem:[%s9416_s14 + $0x50] sm:$0xff] }
 0xb43   :  { %3753 = vmatpush1.bf16.msra.mxu1 %v7460_v18  ;;  %v7505_v18 = vld [vmem:[#allocation4 + $0x350] ss:$8 sps:$4 sm:$0xff]  }
 0xb44   :  { %3754 = vmatprep.subr.bf16.mxu1 %v7465_v19  ;;  %v7510_v19 = vld [vmem:[#allocation4 + $0x344] ss:$8 sps:$4 sm:$0xff]  }
 0xb47   :  { %3755 = vmatpush1.bf16.msra.mxu1 %v7463_v21  ;;  %v6417_v21 = vld [vmem:[%s9416_s14 + $0x58] sm:$0xff] }
 0xb48   :  { %3756 = vmatprep.subr.bf16.mxu1 %v7468_v22  ;;  %v7508_v22 = vld [vmem:[#allocation4 + $0x340] ss:$8 sps:$4 sm:$0xff]  }
 0xb4b   :  { %3757 = vmatpush1.bf16.msra.mxu1 %v7466_v23  ;;  %v7513_v23 = vld [vmem:[#allocation4 + $0x334] ss:$8 sps:$4 sm:$0xff]  }
 0xb4c   :  { %3758 = vmatprep.subr.bf16.mxu1 %v7471_v24  ;;  %v7511_v24 = vld [vmem:[#allocation4 + $0x330] ss:$8 sps:$4 sm:$0xff]  }
 0xb4f   :  { %3759 = vmatpush1.bf16.msra.mxu1 %v7469_v26  ;;  %v7516_v26 = vld [vmem:[#allocation4 + $0x324] ss:$8 sps:$4 sm:$0xff]  }
 0xb50   :  { %3760 = vmatprep.subr.bf16.mxu1 %v7474_v53  ;;  %v7514_v53 = vld [vmem:[#allocation4 + $0x320] ss:$8 sps:$4 sm:$0xff]  }
 0xb53   :  { %3761 = vmatpush1.bf16.msra.mxu1 %v7472_v27  ;;  %v7519_v27 = vld [vmem:[#allocation4 + $0x314] ss:$8 sps:$4 sm:$0xff]  }
 0xb54   :  { %3762 = vmatprep.subr.bf16.mxu1 %v7477_v30  ;;  %v7517_v30 = vld [vmem:[#allocation4 + $0x310] ss:$8 sps:$4 sm:$0xff]  }
 0xb57   :  { %3763 = vmatpush2.bf16.msra.mxu1 %v7475_v31  ;;  %v7522_v31 = vld [vmem:[#allocation4 + $0x304] ss:$8 sps:$4 sm:$0xff]  }
 0xb58   :  { %3764 = vmatprep.subr.bf16.mxu1 %v7480_v33  ;;  %v7520_v33 = vld [vmem:[#allocation4 + $0x300] ss:$8 sps:$4 sm:$0xff]  }
 0xb5b   :  { %3765 = vmatpush2.bf16.msra.mxu1 %v7478_v34  ;;  %v7525_v34 = vld [vmem:[#allocation4 + $0x3f4] ss:$8 sps:$4 sm:$0xff]  }
 0xb5c   :  { %3766 = vmatprep.subr.bf16.mxu1 %v7483_v35  ;;  %v7523_v35 = vld [vmem:[#allocation4 + $0x3f0] ss:$8 sps:$4 sm:$0xff]  }
 0xb5f   :  { %3767 = vmatpush2.bf16.msra.mxu1 %v7481_v36  ;;  %v7528_v36 = vld [vmem:[#allocation4 + $0x3e4] ss:$8 sps:$4 sm:$0xff]  }
 0xb60   :  { %3768 = vmatprep.subr.bf16.mxu1 %v7486_v37  ;;  %v7531_v37 = vld [vmem:[#allocation4 + $0x3d4] ss:$8 sps:$4 sm:$0xff]  }
 0xb63   :  { %3769 = vmatpush2.bf16.msra.mxu1 %v7484_v38  ;;  %v7529_v38 = vld [vmem:[#allocation4 + $0x3d0] ss:$8 sps:$4 sm:$0xff]  }
 0xb64   :  { %3770 = vmatprep.subr.bf16.mxu1 %v7489_v39  ;;  %v7534_v39 = vld [vmem:[#allocation4 + $0x3c4] ss:$8 sps:$4 sm:$0xff]  }
 0xb67   :  { %3771 = vmatpush2.bf16.msra.mxu1 %v7487_v41  ;;  %v7532_v41 = vld [vmem:[#allocation4 + $0x3c0] ss:$8 sps:$4 sm:$0xff]  }
 0xb68   :  { %3772 = vmatprep.subr.bf16.mxu1 %v7492_v42  ;;  %v7537_v42 = vld [vmem:[#allocation4 + $0x3b4] ss:$8 sps:$4 sm:$0xff]  }
 0xb6b   :  { %3773 = vmatpush2.bf16.msra.mxu1 %v7490_v44  ;;  %v7535_v44 = vld [vmem:[#allocation4 + $0x3b0] ss:$8 sps:$4 sm:$0xff]  }
 0xb6c   :  { %3774 = vmatprep.subr.bf16.mxu1 %v7495_v45  ;;  %v7540_v45 = vld [vmem:[#allocation4 + $0x3a4] ss:$8 sps:$4 sm:$0xff]  }
 0xb6f   :  { %3775 = vmatpush2.bf16.msra.mxu1 %v7493_v11  ;;  %v7538_v11 = vld [vmem:[#allocation4 + $0x3a0] ss:$8 sps:$4 sm:$0xff]  }
 0xb70   :  { %3776 = vmatprep.subr.bf16.mxu1 %v7498_v15  ;;  %v7543_v15 = vld [vmem:[#allocation4 + $0x394] ss:$8 sps:$4 sm:$0xff]  }
 0xb73   :  { %3777 = vmatpush2.bf16.msra.mxu1 %v7496_v48  ;;  %v7541_v48 = vld [vmem:[#allocation4 + $0x390] ss:$8 sps:$4 sm:$0xff]  }
 0xb76   :  { %3779 = vmatmul.mubr.bf16.vlgmr.msra.gmra.mxu1 %v8710_v55 }
 0xb77   :  { %4220 = vmatprep.mubr.f32.mxu1 %v7711_v13 }
 0xbf5   :  { %v3429_v40 = vpop.f32.mrf.mxu1  ;;  %v3530_v25 = vpop.f32.mrf.mxu0 }
 0xbf6   :  { %v8760_v43 = vadd.f32 %v3530_v25, %v3429_v40  ;;  %v7546_v40 = vld [vmem:[#allocation4 + $0x384] ss:$8 sps:$4 sm:$0xff]   ;;  %v7544_v25 = vld [vmem:[#allocation4 + $0x380] ss:$8 sps:$4 sm:$0xff]  }
 0xbf7   :  { %v3431_v46 = vpop.f32.mrf.mxu1  ;;  %v3532_v12 = vpop.f32.mrf.mxu0 }
 0xbf8   :  { %v8762_v47 = vadd.f32 %v3532_v12, %v3431_v46 }
 0xbf9   :  { %v3435_v20 = vpop.f32.mrf.mxu1  ;;  %v3536_v49 = vpop.f32.mrf.mxu0 }
 0xbfa   :  { %v8764_v50 = vadd.f32 %v3536_v49, %v3435_v20 }
 0xbfb   :  { %v3437_v51 = vpop.f32.mrf.mxu1  ;;  %v3538_v29 = vpop.f32.mrf.mxu0 }
 0xbfc   :  { %v8766_v56 = vadd.f32 %v3538_v29, %v3437_v51 }
 0xbfd   :  { %v3441_v57 = vpop.f32.mrf.mxu1  ;;  %v3542_v58 = vpop.f32.mrf.mxu0 }
 0xbfe   :  { %v8768_v59 = vadd.f32 %v3542_v58, %v3441_v57 }
 0xbff   :  { %v3443_v60 = vpop.f32.mrf.mxu1  ;;  %v3544_v61 = vpop.f32.mrf.mxu0 }
 0xc00   :  { %v8770_v62 = vadd.f32 %v3544_v61, %v3443_v60 }
 0xc01   :  { %v3447_v52 = vpop.f32.mrf.mxu1  ;;  %v3548_v63 = vpop.f32.mrf.mxu0 }
 0xc02   :  { %v8772_v0 = vadd.f32 %v3548_v63, %v3447_v52 }
 0xc03   :  { %v8774_v1 = vpop.f32.mrf.mxu1  ;;  %v3550_v46 = vpop.f32.mrf.mxu0 }
 0xc36   :  { %v3780_v2 = vpop.f32.mrf.mxu1 }
 0xc38   :  { %v3782_v3 = vpop.f32.mrf.mxu1 }
 0xc3a   :  { %v3784_v4 = vpop.f32.mrf.mxu1 }
 0xc3c   :  { %v3786_v5 = vpop.f32.mrf.mxu1 }
 0xc3d   :  { %3834 = vmatprep.subr.mxu0 %v3786_v5 }
 0xc3e   :  { %3835 = vmatpush1.msra.mxu0 %v3784_v4 }
 0xc3f   :  { %3836 = vmatprep.subr.mxu0 %v3782_v3 }
 0xc40   :  { %3837 = vmatpush1.msra.mxu0 %v3780_v2 }
 0xc41   :  { %6418 = vmatmul.mubr.msk.f32.vlgmr.msra.gmra.mxu0 %vm3350_vm7, %v6414_v7  ;;  %4096 = vmatprep.subr.bf16.mxu0 %v7501_v6  ;;  %v4328_v7 = vld [vmem:[%s9417_s15 + $0xf8] sm:$0xff] }
 0xc42   :  { %4097 = vmatpush1.bf16.msra.mxu0 %v7499_v8  ;;  %3876 = vmatprep.mubr.f32.mxu0 %v7711_v13  ;;  %v4312_v8 = vld [vmem:[%s9417_s15 + $0x78] sm:$0xff] }
 0xc43   :  { %4098 = vmatprep.subr.bf16.mxu0 %v7504_v9  ;;  %v4327_v9 = vld [vmem:[%s9417_s15 + $0xf0] sm:$0xff] }
 0xc45   :  { %6419 = vmatmul.mubr.msk.f32.gmra.mxu0 %vm3350_vm7, %v6415_v10  ;;  %v4311_v10 = vld [vmem:[%s9417_s15 + $0x70] sm:$0xff] }
 0xc46   :  { %4099 = vmatpush1.bf16.msra.mxu0 %v7502_v14  ;;  %3882 = vmatprep.mubr.f32.mxu0 %v7711_v13  ;;  %v4326_v14 = vld [vmem:[%s9417_s15 + $0xe8] sm:$0xff] }
 0xc47   :  { %4100 = vmatprep.subr.bf16.mxu0 %v7507_v16  ;;  %v4310_v16 = vld [vmem:[%s9417_s15 + $0x68] sm:$0xff] }
 0xc49   :  { %6420 = vmatmul.mubr.msk.f32.gmra.mxu0 %vm3350_vm7, %v6416_v17  ;;  %v4325_v17 = vld [vmem:[%s9417_s15 + $0xe0] sm:$0xff] }
 0xc4a   :  { %4101 = vmatpush1.bf16.msra.mxu0 %v7505_v18  ;;  %3888 = vmatprep.mubr.f32.mxu0 %v7711_v13  ;;  %v4309_v18 = vld [vmem:[%s9417_s15 + $0x60] sm:$0xff] }
 0xc4b   :  { %4102 = vmatprep.subr.bf16.mxu0 %v7510_v19  ;;  %v4324_v19 = vld [vmem:[%s9417_s15 + $0xd8] sm:$0xff] }
 0xc4d   :  { %6421 = vmatmul.mubr.msk.f32.gmra.mxu0 %vm3350_vm7, %v6417_v21  ;;  %v4308_v21 = vld [vmem:[%s9417_s15 + $0x58] sm:$0xff] }
 0xc4e   :  { %4103 = vmatpush1.bf16.msra.mxu0 %v7508_v22  ;;  %4128 = vmatprep.mubr.bf16.mxu0 %v8708_v54  ;;  %v7526_v54 = vld [vmem:[#allocation4 + $0x3e0] ss:$8 sps:$4 sm:$0xff]   ;;  %v4323_v22 = vld [vmem:[%s9417_s15 + $0xd0] sm:$0xff] }
 0xc4f   :  { %4104 = vmatprep.subr.bf16.mxu0 %v7513_v23  ;;  %v4307_v23 = vld [vmem:[%s9417_s15 + $0x50] sm:$0xff] }
 0xc52   :  { %4105 = vmatpush1.bf16.msra.mxu0 %v7511_v24  ;;  %v4322_v24 = vld [vmem:[%s9417_s15 + $0xc8] sm:$0xff] }
 0xc53   :  { %4106 = vmatprep.subr.bf16.mxu0 %v7516_v26  ;;  %v4306_v26 = vld [vmem:[%s9417_s15 + $0x48] sm:$0xff] }
 0xc56   :  { %4107 = vmatpush1.bf16.msra.mxu0 %v7514_v53  ;;  %v4321_v53 = vld [vmem:[%s9417_s15 + $0xc0] sm:$0xff] }
 0xc57   :  { %4108 = vmatprep.subr.bf16.mxu0 %v7519_v27  ;;  %v4305_v27 = vld [vmem:[%s9417_s15 + $0x40] sm:$0xff] }
 0xc5a   :  { %4109 = vmatpush1.bf16.msra.mxu0 %v7517_v30  ;;  %v4320_v30 = vld [vmem:[%s9417_s15 + $0xb8] sm:$0xff] }
 0xc5b   :  { %4110 = vmatprep.subr.bf16.mxu0 %v7522_v31  ;;  %v4304_v31 = vld [vmem:[%s9417_s15 + $0x38] sm:$0xff] }
 0xc5e   :  { %4111 = vmatpush1.bf16.msra.mxu0 %v7520_v33  ;;  %v4319_v33 = vld [vmem:[%s9417_s15 + $0xb0] sm:$0xff] }
 0xc5f   :  { %4112 = vmatprep.subr.bf16.mxu0 %v7525_v34  ;;  %v4303_v34 = vld [vmem:[%s9417_s15 + $0x30] sm:$0xff] }
 0xc62   :  { %4113 = vmatpush2.bf16.msra.mxu0 %v7523_v35  ;;  %v4318_v35 = vld [vmem:[%s9417_s15 + $0xa8] sm:$0xff] }
 0xc63   :  { %4114 = vmatprep.subr.bf16.mxu0 %v7528_v36  ;;  %v4302_v36 = vld [vmem:[%s9417_s15 + $0x28] sm:$0xff] }
 0xc66   :  { %4115 = vmatpush2.bf16.msra.mxu0 %v7526_v54  ;;  %v4317_v54 = vld [vmem:[%s9417_s15 + $0xa0] sm:$0xff] }
 0xc67   :  { %4116 = vmatprep.subr.bf16.mxu0 %v7531_v37  ;;  %v4301_v37 = vld [vmem:[%s9417_s15 + $0x20] sm:$0xff] }
 0xc6a   :  { %4117 = vmatpush2.bf16.msra.mxu0 %v7529_v38  ;;  %v4316_v38 = vld [vmem:[%s9417_s15 + $0x98] sm:$0xff] }
 0xc6b   :  { %4118 = vmatprep.subr.bf16.mxu0 %v7534_v39  ;;  %v4300_v39 = vld [vmem:[%s9417_s15 + $0x18] sm:$0xff] }
 0xc6e   :  { %4119 = vmatpush2.bf16.msra.mxu0 %v7532_v41  ;;  %v4315_v41 = vld [vmem:[%s9417_s15 + $0x90] sm:$0xff] }
 0xc6f   :  { %4120 = vmatprep.subr.bf16.mxu0 %v7537_v42  ;;  %v4299_v42 = vld [vmem:[%s9417_s15 + $0x10] sm:$0xff] }
 0xc72   :  { %4121 = vmatpush2.bf16.msra.mxu0 %v7535_v44  ;;  %v4314_v44 = vld [vmem:[%s9417_s15 + $0x88] sm:$0xff] }
 0xc73   :  { %4122 = vmatprep.subr.bf16.mxu0 %v7540_v45  ;;  %v4298_v45 = vld [vmem:[%s9417_s15 + $0x8] sm:$0xff] }
 0xc76   :  { %4123 = vmatpush2.bf16.msra.mxu0 %v7538_v11  ;;  %v4313_v11 = vld [vmem:[%s9417_s15 + $0x80] sm:$0xff] }
 0xc77   :  { %4124 = vmatprep.subr.bf16.mxu0 %v7543_v15  ;;  %v4297_v15 = vld [vmem:[%s9417_s15] sm:$0xff] }
 0xc7a   :  { %4125 = vmatpush2.bf16.msra.mxu0 %v7541_v48 }
 0xc7b   :  { %4126 = vmatprep.subr.bf16.mxu0 %v7546_v40 }
 0xc7e   :  { %4127 = vmatpush2.bf16.msra.mxu0 %v7544_v25 }
 0xc7f   :  { %6855 = vmatprep.subr.mxu0 %v4328_v7 }
 0xc81   :  { %4129 = vmatmul.mubr.bf16.vlgmr.msra.gmra.mxu0 %v8710_v55 }
 0xc82   :  { %6856 = vmatpush3.msra.mxu0 %v4312_v8 }
 0xc83   :  { %6857 = vmatprep.subr.mxu0 %v4327_v9 }
 0xc84   :  { %6858 = vmatpush3.msra.mxu0 %v4311_v10 }
 0xc85   :  { %6859 = vmatprep.subr.mxu0 %v4326_v14 }
 0xc86   :  { %6860 = vmatpush3.msra.mxu0 %v4310_v16 }
 0xc87   :  { %6861 = vmatprep.subr.mxu0 %v4325_v17 }
 0xc88   :  { %6862 = vmatpush3.msra.mxu0 %v4309_v18 }
 0xc89   :  { %6863 = vmatprep.subr.mxu0 %v4324_v19 }
 0xc8a   :  { %6864 = vmatpush3.msra.mxu0 %v4308_v21 }
 0xc8b   :  { %6865 = vmatprep.subr.mxu0 %v4323_v22 }
 0xc8c   :  { %6866 = vmatpush3.msra.mxu0 %v4307_v23 }
 0xc8d   :  { %6867 = vmatprep.subr.mxu0 %v4322_v24 }
 0xc8e   :  { %6868 = vmatpush3.msra.mxu0 %v4306_v26 }
 0xc8f   :  { %6869 = vmatprep.subr.mxu0 %v4321_v53 }
 0xc90   :  { %6870 = vmatpush3.msra.mxu0 %v4305_v27 }
 0xc91   :  { %6871 = vmatprep.subr.mxu0 %v4320_v30 }
 0xc92   :  { %6872 = vmatpush3.msra.mxu0 %v4304_v31 }
 0xc93   :  { %6873 = vmatprep.subr.mxu0 %v4319_v33 }
 0xc94   :  { %6874 = vmatpush3.msra.mxu0 %v4303_v34 }
 0xc95   :  { %6875 = vmatprep.subr.mxu0 %v4318_v35 }
 0xc96   :  { %6876 = vmatpush3.msra.mxu0 %v4302_v36 }
 0xc97   :  { %6877 = vmatprep.subr.mxu0 %v4317_v54 }
 0xc98   :  { %6878 = vmatpush3.msra.mxu0 %v4301_v37 }
 0xc99   :  { %6879 = vmatprep.subr.mxu0 %v4316_v38 }
 0xc9a   :  { %6880 = vmatpush3.msra.mxu0 %v4300_v39 }
 0xc9b   :  { %6881 = vmatprep.subr.mxu0 %v4315_v41 }
 0xc9c   :  { %6882 = vmatpush3.msra.mxu0 %v4299_v42 }
 0xc9d   :  { %6883 = vmatprep.subr.mxu0 %v4314_v44 }
 0xc9e   :  { %6884 = vmatpush3.msra.mxu0 %v4298_v45 }
 0xc9f   :  { %6885 = vmatprep.subr.mxu0 %v4313_v11 }
 0xca0   :  { %6886 = vmatpush3.msra.mxu0 %v4297_v15 }
 0xd01   :  { %v3872_v12 = vpop.f32.mrf.mxu0 }
 0xd02   :  { %v8798_v20 = vadd.f32 %v3872_v12, %v8760_v43 }
 0xd03   :  { %v3874_v49 = vpop.f32.mrf.mxu0 }
 0xd04   :  { %v8801_v51 = vadd.f32 %v3874_v49, %v8762_v47  ;;  %v3551_v47 = vadd.f32 %v3550_v46, %v8774_v1  ;;  %v6457_v1 = vld [vmem:[%s9416_s14 + $0x78] sm:$0xff] }
 0xd05   :  { %v3878_v29 = vpop.f32.mrf.mxu0 }
 0xd06   :  { %v8804_v57 = vadd.f32 %v3878_v29, %v8764_v50 }
 0xd07   :  { %v3880_v58 = vpop.f32.mrf.mxu0 }
 0xd08   :  { %v8807_v60 = vadd.f32 %v3880_v58, %v8766_v56 }
 0xd09   :  { %v3884_v61 = vpop.f32.mrf.mxu0 }
 0xd0a   :  { %v8810_v55 = vadd.f32 %v3884_v61, %v8768_v59  ;;  %v6454_v59 = vld [vmem:[%s9416_s14 + $0x60] sm:$0xff] }
 0xd0b   :  { %v3886_v52 = vpop.f32.mrf.mxu0 }
 0xd0c   :  { %v8813_v43 = vadd.f32 %v3886_v52, %v8770_v62  ;;  %v6455_v62 = vld [vmem:[%s9416_s14 + $0x68] sm:$0xff] }
 0xd0d   :  { %v3890_v63 = vpop.f32.mrf.mxu0 }
 0xd0e   :  { %v8817_v2 = vadd.f32 %v3890_v63, %v8772_v0  ;;  %v6456_v0 = vld [vmem:[%s9416_s14 + $0x70] sm:$0xff] }
 0xd0f   :  { %v3892_v50 = vpop.f32.mrf.mxu0 }
 0xd10   :  { %v8819_v3 = vadd.f32 %v3892_v50, %v3551_v47 }
 0xd41   :  { %v4130_v4 = vpop.f32.mrf.mxu0 }
 0xd43   :  { %v4132_v56 = vpop.f32.mrf.mxu0 }
 0xd45   :  { %v4134_v5 = vpop.f32.mrf.mxu0 }
 0xd47   :  { %v4136_v6 = vpop.f32.mrf.mxu0 }
 0xd48   :  { %4184 = vmatprep.subr.mxu1 %v4136_v6 }
 0xd49   :  { %4185 = vmatpush1.msra.mxu1 %v4134_v5 }
 0xd4a   :  { %4186 = vmatprep.subr.mxu1 %v4132_v56 }
 0xd4b   :  { %4187 = vmatpush1.msra.mxu1 %v4130_v4 }
 0xd4c   :  { %6458 = vmatmul.mubr.msk.f32.vlgmr.msra.gmra.mxu1 %vm3350_vm7, %v6454_v59  ;;  %6820 = vmatprep.subr.mxu1 %v4328_v7 }
 0xd4d   :  { %4226 = vmatprep.mubr.f32.mxu1 %v7711_v13  ;;  %6821 = vmatpush3.msra.mxu1 %v4312_v8 }
 0xd4e   :  { %6822 = vmatprep.subr.mxu1 %v4327_v9 }
 0xd4f   :  { %6823 = vmatpush3.msra.mxu1 %v4311_v10 }
 0xd50   :  { %6459 = vmatmul.mubr.msk.f32.gmra.mxu1 %vm3350_vm7, %v6455_v62  ;;  %6824 = vmatprep.subr.mxu1 %v4326_v14 }
 0xd51   :  { %4232 = vmatprep.mubr.f32.mxu1 %v7711_v13  ;;  %6825 = vmatpush3.msra.mxu1 %v4310_v16 }
 0xd52   :  { %6826 = vmatprep.subr.mxu1 %v4325_v17 }
 0xd53   :  { %6827 = vmatpush3.msra.mxu1 %v4309_v18 }
 0xd54   :  { %6460 = vmatmul.mubr.msk.f32.gmra.mxu1 %vm3350_vm7, %v6456_v0  ;;  %6828 = vmatprep.subr.mxu1 %v4324_v19 }
 0xd55   :  { %4238 = vmatprep.mubr.f32.mxu1 %v7711_v13  ;;  %6829 = vmatpush3.msra.mxu1 %v4308_v21 }
 0xd56   :  { %6830 = vmatprep.subr.mxu1 %v4323_v22 }
 0xd57   :  { %6831 = vmatpush3.msra.mxu1 %v4307_v23 }
 0xd58   :  { %6461 = vmatmul.mubr.msk.f32.gmra.mxu1 %vm3350_vm7, %v6457_v1  ;;  %6832 = vmatprep.subr.mxu1 %v4322_v24 }
 0xd59   :  { %6833 = vmatpush3.msra.mxu1 %v4306_v26 }
 0xd5a   :  { %6834 = vmatprep.subr.mxu1 %v4321_v53 }
 0xd5b   :  { %6835 = vmatpush3.msra.mxu1 %v4305_v27 }
 0xd5c   :  { %6836 = vmatprep.subr.mxu1 %v4320_v30 }
 0xd5d   :  { %6837 = vmatpush3.msra.mxu1 %v4304_v31 }
 0xd5e   :  { %6838 = vmatprep.subr.mxu1 %v4319_v33 }
 0xd5f   :  { %6839 = vmatpush3.msra.mxu1 %v4303_v34 }
 0xd60   :  { %6840 = vmatprep.subr.mxu1 %v4318_v35 }
 0xd61   :  { %6841 = vmatpush3.msra.mxu1 %v4302_v36 }
 0xd62   :  { %6842 = vmatprep.subr.mxu1 %v4317_v54 }
 0xd63   :  { %6843 = vmatpush3.msra.mxu1 %v4301_v37 }
 0xd64   :  { %6844 = vmatprep.subr.mxu1 %v4316_v38 }
 0xd65   :  { %6845 = vmatpush3.msra.mxu1 %v4300_v39 }
 0xd66   :  { %6846 = vmatprep.subr.mxu1 %v4315_v41 }
 0xd67   :  { %6847 = vmatpush3.msra.mxu1 %v4299_v42 }
 0xd68   :  { %6848 = vmatprep.subr.mxu1 %v4314_v44 }
 0xd69   :  { %6849 = vmatpush3.msra.mxu1 %v4298_v45 }
 0xd6a   :  { %6850 = vmatprep.subr.mxu1 %v4313_v11 }
 0xd6b   :  { %6851 = vmatpush3.msra.mxu1 %v4297_v15  ;;  %v4472_v15 = vld [vmem:[#allocation6 + $0x18] sm:$0xff] }
 0xd6c   :  { %4504 = vmatprep.subr.mxu1 %v4472_v15 }
 0xe0c   :  { %v4222_v48 = vpop.f32.mrf.mxu1 }
 0xe0d   :  { %v8940_v12 = vadd.f32 %v4222_v48, %v8798_v20  ;;  %v4471_v48 = vld [vmem:[#allocation6 + $0x10] sm:$0xff] }
 0xe0e   :  { %v4224_v40 = vpop.f32.mrf.mxu1 }
 0xe0f   :  { %v8946_v58 = vadd.f32 %v4224_v40, %v8801_v51  ;;  %v4470_v40 = vld [vmem:[#allocation6 + $0x8] sm:$0xff] }
 0xe10   :  { %v4228_v25 = vpop.f32.mrf.mxu1 }
 0xe11   :  { %v8937_v46 = vadd.f32 %v4228_v25, %v8804_v57  ;;  %v4271_v57 = vmul.f32 %v8940_v12, %v8940_v12  ;;  %v4469_v25 = vld [vmem:[#allocation6] sm:$0xff] }
 0xe12   :  { %v4230_v49 = vpop.f32.mrf.mxu1 }
 0xe13   :  { %v8943_v29 = vadd.f32 %v4230_v49, %v8807_v60  ;;  %v4273_v61 = vmul.f32 %v8937_v46, %v8937_v46  ;;  %v4253_v60 = vadd.f32 %v8937_v46, %v8940_v12 }
 0xe14   :  { %v4234_v52 = vpop.f32.mrf.mxu1 }
 0xe15   :  { %v8951_v63 = vadd.f32 %v4234_v52, %v8810_v55  ;;  %v4274_v20 = vmul.f32 %v8943_v29, %v8943_v29  ;;  %v4272_v55 = vmul.f32 %v8946_v58, %v8946_v58  ;;  %v4279_v4 = vadd.f32 %v4273_v61, %v4271_v57 }
 0xe16   :  { %v4236_v47 = vpop.f32.mrf.mxu1  ;;  %v4262_v5 = vadd.f32 %v8943_v29, %v8946_v58 }
 0xe17   :  { %v4275_v51 = vmul.f32 %v8951_v63, %v8951_v63  ;;  %v8962_v50 = vadd.f32 %v4236_v47, %v8813_v43  ;;  %v4254_v6 = vadd.f32 %v4253_v60, %v8951_v63  ;;  %v4288_v0 = vadd.f32 %v4274_v20, %v4272_v55  ;;  %v7547_v60 = vld [vmem:[%s9421_s19 + $0x78] sm:$0xff]  }
 0xe18   :  { %v4240_v56 = vpop.f32.mrf.mxu1  ;;  %v7549_v55 = vld [vmem:[%s9421_s19 + $0x38] sm:$0xff]  }
 0xe19   :  { %v4276_v59 = vmul.f32 %v8962_v50, %v8962_v50  ;;  %v8972_v62 = vadd.f32 %v4240_v56, %v8817_v2  ;;  %v4280_v1 = vadd.f32 %v4279_v4, %v4275_v51  ;;  %v4263_v7 = vadd.f32 %v4262_v5, %v8962_v50  ;;  %v7548_v51 = vld [vmem:[%s9421_s19 + $0xf8] sm:$0xff]   ;;  %v7551_v4 = vld [vmem:[%s9421_s19 + $0x70] sm:$0xff]  }
 0xe1a   :  { %v4242_v43 = vpop.f32.mrf.mxu1  ;;  %6918 = vmatprep.subr.bf16.mxu0 %v7548_v51  ;;  %v7552_v56 = vld [vmem:[%s9421_s19 + $0xf0] sm:$0xff]  }
 0xe1b   :  { %v4255_v8 = vadd.f32 %v4254_v6, %v8972_v62  ;;  %v4277_v9 = vmul.f32 %v8972_v62, %v8972_v62  ;;  %v8979_v10 = vadd.f32 %v4242_v43, %v8819_v3  ;;  %v4289_v14 = vadd.f32 %v4288_v0, %v4276_v59  ;;  %v7553_v5 = vld [vmem:[%s9421_s19 + $0x30] sm:$0xff]   ;;  %v7555_v59 = vld [vmem:[%s9421_s19 + $0x68] sm:$0xff]  }
 0xe1c   :  { %v7554_v6 = vld [vmem:[%s9421_s19 + $0xb0] sm:$0xff]   ;;  %v7556_v0 = vld [vmem:[%s9421_s19 + $0xe8] sm:$0xff]  }
 0xe1d   :  { %v4256_v16 = vrot.slane %v4255_v8, 4  ;;  %v4281_v17 = vadd.f32 %v4280_v1, %v4277_v9  ;;  %v4264_v18 = vadd.f32 %v4263_v7, %v8979_v10  ;;  %v4278_v2 = vmul.f32 %v8979_v10, %v8979_v10  ;;  %v7557_v1 = vld [vmem:[%s9421_s19 + $0x28] sm:$0xff]   ;;  %v7559_v7 = vld [vmem:[%s9421_s19 + $0x60] sm:$0xff]  }
 0xe1e   :  { %v7558_v43 = vld [vmem:[%s9421_s19 + $0xa8] sm:$0xff]   ;;  %v7561_v9 = vld [vmem:[%s9421_s19 + $0x20] sm:$0xff]  }
 0xe1f   :  { %v4257_v19 = vadd.f32 %v4256_v16, %v4255_v8  ;;  %v4282_v21 = vrot.slane %v4281_v17, 4  ;;  %v4265_v22 = vrot.slane %v4264_v18, 4  ;;  %v4290_v23 = vadd.f32 %v4289_v14, %v4278_v2  ;;  %v7560_v8 = vld [vmem:[%s9421_s19 + $0xe0] sm:$0xff]   ;;  %v7563_v16 = vld [vmem:[%s9421_s19 + $0x58] sm:$0xff]  }
 0xe20   :  { %v7562_v14 = vld [vmem:[%s9421_s19 + $0xa0] sm:$0xff]   ;;  %v7566_v2 = vld [vmem:[%s9421_s19 + $0x98] sm:$0xff]  }
 0xe21   :  { %v4258_v24 = vrot.slane %v4257_v19, 2  ;;  %v4283_v26 = vadd.f32 %v4282_v21, %v4281_v17  ;;  %v4266_v53 = vadd.f32 %v4265_v22, %v4264_v18  ;;  %v4291_v27 = vrot.slane %v4290_v23, 4  ;;  %v7564_v17 = vld [vmem:[%s9421_s19 + $0xd8] sm:$0xff]   ;;  %v7568_v21 = vld [vmem:[%s9421_s19 + $0xd0] sm:$0xff]  }
 0xe22   :  { %v7565_v18 = vld [vmem:[%s9421_s19 + $0x18] sm:$0xff]   ;;  %v7569_v22 = vld [vmem:[%s9421_s19 + $0x10] sm:$0xff]  }
 0xe23   :  { %v4259_v30 = vadd.f32 %v4258_v24, %v4257_v19  ;;  %v4284_v31 = vrot.slane %v4283_v26, 2  ;;  %v4267_v3 = vrot.slane %v4266_v53, 2  ;;  %v4292_v33 = vadd.f32 %v4291_v27, %v4290_v23  ;;  %v7567_v19 = vld [vmem:[%s9421_s19 + $0x50] sm:$0xff]   ;;  %v7571_v24 = vld [vmem:[%s9421_s19 + $0x48] sm:$0xff]  }
 0xe24   :  { %v7570_v23 = vld [vmem:[%s9421_s19 + $0x90] sm:$0xff]   ;;  %v7574_v27 = vld [vmem:[%s9421_s19 + $0x88] sm:$0xff]  }
 0xe25   :  { %v4268_v34 = vadd.f32 %v4267_v3, %v4266_v53  ;;  %v4293_v35 = vrot.slane %v4292_v33, 2  ;;  %v4285_v36 = vadd.f32 %v4284_v31, %v4283_v26  ;;  %v4260_v54 = vrot.slane %v4259_v30, 1  ;;  %v7572_v26 = vld [vmem:[%s9421_s19 + $0xc8] sm:$0xff]   ;;  %v7576_v31 = vld [vmem:[%s9421_s19 + $0xc0] sm:$0xff]  }
 0xe26   :  { %v7573_v53 = vld [vmem:[%s9421_s19 + $0x8] sm:$0xff]   ;;  %v7577_v3 = vld [vmem:[%s9421_s19] sm:$0xff]  }
 0xe27   :  { %v4269_v37 = vrot.slane %v4268_v34, 1  ;;  %v4294_v38 = vadd.f32 %v4293_v35, %v4292_v33  ;;  %v4286_v39 = vrot.slane %v4285_v36, 1  ;;  %v4261_v44 = vadd.f32 %v4260_v54, %v4259_v30  ;;  %v7575_v30 = vld [vmem:[%s9421_s19 + $0x40] sm:$0xff]  }
 0xe28   :  { %v7578_v33 = vld [vmem:[%s9421_s19 + $0x80] sm:$0xff]  }
 0xe29   :  { %v4270_v41 = vadd.f32 %v4269_v37, %v4268_v34  ;;  %v4295_v42 = vrot.slane %v4294_v38, 1  ;;  %v4287_v11 = vadd.f32 %v4286_v39, %v4285_v36 }
 0xe2b   :  { %4393 = vmatprep.mubr.f32.mxu1 %v4270_v41  ;;  %v4296_v45 = vadd.f32 %v4295_v42, %v4294_v38 }
 0xe2c   :  { %4394 = vmatmul.mubr.f32.vlgmr.msra.gmra.mxu1 %v4261_v44 }
 0xe2d   :  { %4463 = vmatprep.mubr.f32.mxu0 %v4296_v45  ;;  %4540 = vmatprep.mubr.f32.mxu1 %v7711_v13 }
 0xe2e   :  { %4464 = vmatmul.mubr.f32.vlgmr.msra.gmra.mxu0 %v4287_v11  ;;  %4505 = vmatpush1.msra.mxu1 %v4471_v48 }
 0xe2f   :  { %4506 = vmatprep.subr.mxu1 %v4470_v40 }
 0xe30   :  { %4507 = vmatpush1.msra.mxu1 %v4469_v25 }
 0xe31   :  { %4578 = vmatprep.subr.mxu1 %v4472_v15  ;;  %v4661_v15 = vld [vmem:[%s9419_s17] sm:$0x3] }
 0xeec   :  { %v6852_v49 = vpop.f32.mrf.mxu1 }
 0xeee   :  { %v6853_v61 = vpop.f32.mrf.mxu1  ;;  %v6887_v52 = vpop.f32.mrf.mxu0 }
 0xeef   :  { %v6854_v57 = vadd.f32 %v6853_v61, %v6852_v49 }
 0xef0   :  { %v6888_v20 = vpop.f32.mrf.mxu0 }
 0xef1   :  { %6462 = vmatmul.mubr.msk.f32.vlgmr.msra.gmra.mxu1 %vm3350_vm7, %v6854_v57  ;;  %v6889_v47 = vadd.f32 %v6888_v20, %v6887_v52  ;;  %v4666_v20 = vrot.slane %v4661_v15, %v8282_v28 }
 0xef2   :  { %4579 = vmatpush1.msra.mxu1 %v4471_v48  ;;  %4614 = vmatprep.mubr.f32.mxu1 %v7711_v13  ;;  %v7550_v13 = vld [vmem:[%s9421_s19 + $0xb8] sm:$0xff]   ;;  %v4681_v48 = vld [vmem:[%s9420_s18] sm:$0x3] }
 0xef3   :  { %4580 = vmatprep.subr.mxu1 %v4470_v40  ;;  %6919 = vmatpush3.bf16.msra.mxu0 %v7550_v13  ;;  %v4690_v49 = vrot.slane %v4681_v48, %v8288_v32  ;;  %v4686_v13 = vrot.slane %v4681_v48, %v8282_v28 }
 0xef4   :  { %4581 = vmatpush1.msra.mxu1 %v4469_v25  ;;  %6920 = vmatprep.subr.bf16.mxu0 %v7552_v56  ;;  %v4670_v25 = vrot.slane %v4661_v15, %v8288_v32 }
 0xef5   :  { %6463 = vmatmul.mubr.msk.f32.vlgmr.msra.gmra.mxu1 %vm3350_vm7, %v6889_v47  ;;  %6890 = vmatprep.subr.bf16.mxu1 %v7547_v60 }
 0xef6   :  { %6891 = vmatpush3.bf16.msra.mxu1 %v7549_v55 }
 0xef7   :  { %6892 = vmatprep.subr.bf16.mxu1 %v7551_v4  ;;  %6921 = vmatpush3.bf16.msra.mxu0 %v7554_v6 }
 0xef8   :  { %6922 = vmatprep.subr.bf16.mxu0 %v7556_v0 }
 0xefa   :  { %6893 = vmatpush3.bf16.msra.mxu1 %v7553_v5 }
 0xefb   :  { %6894 = vmatprep.subr.bf16.mxu1 %v7555_v59  ;;  %6923 = vmatpush3.bf16.msra.mxu0 %v7558_v43 }
 0xefc   :  { %6924 = vmatprep.subr.bf16.mxu0 %v7560_v8 }
 0xefe   :  { %6895 = vmatpush3.bf16.msra.mxu1 %v7557_v1 }
 0xeff   :  { %6896 = vmatprep.subr.bf16.mxu1 %v7559_v7  ;;  %6925 = vmatpush3.bf16.msra.mxu0 %v7562_v14 }
 0xf00   :  { %6926 = vmatprep.subr.bf16.mxu0 %v7564_v17 }
 0xf02   :  { %6897 = vmatpush3.bf16.msra.mxu1 %v7561_v9 }
 0xf03   :  { %6898 = vmatprep.subr.bf16.mxu1 %v7563_v16  ;;  %6927 = vmatpush3.bf16.msra.mxu0 %v7566_v2 }
 0xf04   :  { %6928 = vmatprep.subr.bf16.mxu0 %v7568_v21 }
 0xf06   :  { %6899 = vmatpush3.bf16.msra.mxu1 %v7565_v18 }
 0xf07   :  { %6900 = vmatprep.subr.bf16.mxu1 %v7567_v19  ;;  %6929 = vmatpush3.bf16.msra.mxu0 %v7570_v23 }
 0xf08   :  { %6930 = vmatprep.subr.bf16.mxu0 %v7572_v26 }
 0xf0a   :  { %6901 = vmatpush3.bf16.msra.mxu1 %v7569_v22 }
 0xf0b   :  { %6902 = vmatprep.subr.bf16.mxu1 %v7571_v24  ;;  %6931 = vmatpush3.bf16.msra.mxu0 %v7574_v27 }
 0xf0c   :  { %6932 = vmatprep.subr.bf16.mxu0 %v7576_v31 }
 0xf0e   :  { %6903 = vmatpush3.bf16.msra.mxu1 %v7573_v53 }
 0xf0f   :  { %6904 = vmatprep.subr.bf16.mxu1 %v7575_v30  ;;  %6933 = vmatpush3.bf16.msra.mxu0 %v7578_v33 }
 0xf12   :  { %6905 = vmatpush3.bf16.msra.mxu1 %v7577_v3 }
 0xfb1   :  { %v4542_v34 = vpop.f32.mrf.mxu1 }
 0xfb2   :  { %v4621_v36 = vmul.f32 %v4542_v34, %v4542_v34  ;;  %v4628_v45 = vrot.slane %v4542_v34, %v8282_v28 }
 0xfb3   :  { %v4544_v35 = vpop.f32.mrf.mxu1 }
 0xfb4   :  { %v4622_v37 = vmul.f32 %v4544_v35, %v4544_v35  ;;  %v4632_v11 = vrot.slane %v4544_v35, %v8282_v28  ;;  %v4633_v61 = vsub.f32 %v8940_v12, %v4628_v45  ;;  %v4635_v52 = vsub.f32 %v8937_v46, %v4628_v45 }
 0xfb5   :  { %v4616_v54 = vpop.f32.mrf.mxu1  ;;  %v4637_v60 = vsub.f32 %v8951_v63, %v4628_v45  ;;  %v4639_v51 = vsub.f32 %v8972_v62, %v4628_v45 }
 0xfb6   :  { %v4623_v38 = vsub.f32 %v4616_v54, %v4621_v36  ;;  %v4634_v55 = vsub.f32 %v8946_v58, %v4632_v11  ;;  %v4636_v4 = vsub.f32 %v8943_v29, %v4632_v11  ;;  %v4638_v46 = vsub.f32 %v8962_v50, %v4632_v11  ;;  %v6528_v36 = vld [vmem:[%s9422_s20 + $0x40] sm:$0xff] }
 0xfb7   :  { %v4618_v39 = vpop.f32.mrf.mxu1  ;;  %v4640_v5 = vsub.f32 %v8979_v10, %v4632_v11  ;;  %v4890_v54 = vld [vmem:[%s9422_s20] sm:$0xff] }
 0xfb8   :  { %v4641_v41 = vadd.f32 1e-05, %v4623_v38  ;;  %v4624_v42 = vsub.f32 %v4618_v39, %v4622_v37 }
 0xfba   :  { %7619 = vrsqrt.f32 %v4641_v41  ;;  %v4642_v44 = vadd.f32 1e-05, %v4624_v42 }
 0xfbc   :  { %7621 = vrsqrt.f32 %v4642_v44 }
 0xfc7   :  { %v7620_v40 = vpop.eup %7619 }
 0xfc8   :  { %v4648_v57 = vrot.slane %v7620_v40, %v8282_v28 }
 0xfc9   :  { %v7622_v47 = vpop.eup %7621 }
 0xfca   :  { %v4652_v32 = vrot.slane %v7622_v47, %v8282_v28  ;;  %v4653_v12 = vmul.f32 %v4648_v57, %v4633_v61  ;;  %v4655_v56 = vmul.f32 %v4648_v57, %v4635_v52  ;;  %v4657_v6 = vmul.f32 %v4648_v57, %v4637_v60 }
 0xfcb   :  { %v4659_v59 = vmul.f32 %v4648_v57, %v4639_v51 }
 0xfcc   :  { %v4654_v0 = vmul.f32 %v4652_v32, %v4634_v55  ;;  %v4656_v63 = vmul.f32 %v4652_v32, %v4636_v4  ;;  %v4673_v1 = vmul.f32 %v4666_v20, %v4653_v12  ;;  %v4675_v62 = vmul.f32 %v4666_v20, %v4655_v56  ;;  %v7579_v12 = vld [vmem:[%s9421_s19 + $0x178] sm:$0xff]   ;;  %v6529_v56 = vld [vmem:[%s9422_s20 + $0x48] sm:$0xff] }
 0xfcd   :  { %v4658_v43 = vmul.f32 %v4652_v32, %v4638_v46  ;;  %v4660_v58 = vmul.f32 %v4652_v32, %v4640_v5  ;;  %v4677_v18 = vmul.f32 %v4666_v20, %v4657_v6  ;;  %v4679_v50 = vmul.f32 %v4666_v20, %v4659_v59  ;;  %v7580_v46 = vld [vmem:[%s9421_s19 + $0x138] sm:$0xff]   ;;  %v4891_v5 = vld [vmem:[%s9422_s20 + $0x8] sm:$0xff]  ;;  %v7581_v6 = vld [vmem:[%s9421_s19 + $0x170] sm:$0xff]  }
 0xfce   :  { %v4674_v7 = vmul.f32 %v4670_v25, %v4654_v0  ;;  %v4676_v8 = vmul.f32 %v4670_v25, %v4656_v63  ;;  %v4693_v9 = vadd.f32 %v4686_v13, %v4673_v1  ;;  %v4695_v29 = vadd.f32 %v4686_v13, %v4675_v62  ;;  %v6530_v59 = vld [vmem:[%s9422_s20 + $0x50] sm:$0xff]  ;;  %v6531_v63 = vld [vmem:[%s9422_s20 + $0x58] sm:$0xff]  ;;  %v6532_v62 = vld [vmem:[%s9422_s20 + $0x60] sm:$0xff] }
 0xfcf   :  { %v4678_v14 = vmul.f32 %v4670_v25, %v4658_v43  ;;  %v4680_v28 = vmul.f32 %v4670_v25, %v4660_v58  ;;  %v4697_v30 = vadd.f32 %v4686_v13, %v4677_v18  ;;  %v4699_v31 = vadd.f32 %v4686_v13, %v4679_v50  ;;  %v4892_v0 = vld [vmem:[%s9422_s20 + $0x10] sm:$0xff]  ;;  %v7583_v43 = vld [vmem:[%s9421_s19 + $0x168] sm:$0xff]   ;;  %v4893_v58 = vld [vmem:[%s9422_s20 + $0x18] sm:$0xff] }
 0xfd0   :  { %v4694_v16 = vadd.f32 %v4690_v49, %v4674_v7  ;;  %v4696_v17 = vadd.f32 %v4690_v49, %v4676_v8  ;;  %v4701_v2 = vmax.f32 %v4693_v9, 0.0  ;;  %v4703_v10 = vmax.f32 %v4695_v29, 0.0  ;;  %v7582_v1 = vld [vmem:[%s9421_s19 + $0x130] sm:$0xff]   ;;  %v4894_v7 = vld [vmem:[%s9422_s20 + $0x20] sm:$0xff]  ;;  %v6533_v8 = vld [vmem:[%s9422_s20 + $0x68] sm:$0xff] }
 0xfd1   :  { %v4698_v19 = vadd.f32 %v4690_v49, %v4678_v14  ;;  %v4700_v21 = vadd.f32 %v4690_v49, %v4680_v28  ;;  %v4705_v33 = vmax.f32 %v4697_v30, 0.0  ;;  %v4707_v34 = vmax.f32 %v4699_v31, 0.0  ;;  %v7584_v9 = vld [vmem:[%s9421_s19 + $0x128] sm:$0xff]   ;;  %v6534_v29 = vld [vmem:[%s9422_s20 + $0x70] sm:$0xff]  ;;  %v7585_v14 = vld [vmem:[%s9421_s19 + $0x160] sm:$0xff]  }
 0xfd2   :  { %v4702_v22 = vmax.f32 %v4694_v16, 0.0  ;;  %v4704_v23 = vmax.f32 %v4696_v17, 0.0  ;;  %v9108_v27 = vpack.c.bf16 %v4703_v10, %v4701_v2  ;;  %v4895_v28 = vld [vmem:[%s9422_s20 + $0x28] sm:$0xff]  ;;  %v4896_v16 = vld [vmem:[%s9422_s20 + $0x30] sm:$0xff]  ;;  %v6535_v17 = vld [vmem:[%s9422_s20 + $0x78] sm:$0xff] }
 0xfd3   :  { %v4706_v24 = vmax.f32 %v4698_v19, 0.0  ;;  %v4708_v26 = vmax.f32 %v4700_v21, 0.0  ;;  %v9118_v35 = vpack.c.bf16 %v4707_v34, %v4705_v33  ;;  %v7586_v18 = vld [vmem:[%s9421_s19 + $0x120] sm:$0xff]   ;;  %v7587_v50 = vld [vmem:[%s9421_s19 + $0x158] sm:$0xff]   ;;  %v7589_v19 = vld [vmem:[%s9421_s19 + $0x150] sm:$0xff]  }
 0xfd4   :  { %v9106_v53 = vpack.c.bf16 %v4704_v23, %v4702_v22  ;;  %v4897_v2 = vld [vmem:[%s9422_s20 + $0x38] sm:$0xff]  ;;  %v7590_v21 = vld [vmem:[%s9421_s19 + $0x110] sm:$0xff]   ;;  %v7591_v22 = vld [vmem:[%s9421_s19 + $0x148] sm:$0xff]  }
 0xfd5   :  { %v9112_v3 = vpack.c.bf16 %v4708_v26, %v4706_v24  ;;  %v7588_v10 = vld [vmem:[%s9421_s19 + $0x118] sm:$0xff]   ;;  %v7592_v23 = vld [vmem:[%s9421_s19 + $0x108] sm:$0xff]   ;;  %v7593_v24 = vld [vmem:[%s9421_s19 + $0x140] sm:$0xff]  }
 0xfd6   :  { %4873 = vmatprep.mubr.bf16.mxu1 %v9106_v53  ;;  %5059 = vmatprep.mubr.bf16.mxu0 %v9106_v53  ;;  %v7594_v26 = vld [vmem:[%s9421_s19 + $0x100] sm:$0xff]  }
 0xfd7   :  { %4874 = vmatmul.mubr.bf16.vlgmr.msra.gmra.mxu1 %v9108_v27  ;;  %5060 = vmatmul.mubr.bf16.vlgmr.msra.gmra.mxu0 %v9108_v27  ;;  %v6600_v30 = vld [vmem:[%s9422_s20 + $0x80] sm:$0xff] }
 0xfd8   :  { %4881 = vmatprep.mubr.bf16.mxu1 %v9112_v3  ;;  %5067 = vmatprep.mubr.bf16.mxu0 %v9112_v3 }
 0xfdf   :  { %4882 = vmatmul.mubr.bf16.gmra.mxu1 %v9118_v35  ;;  %5068 = vmatmul.mubr.bf16.gmra.mxu0 %v9118_v35 }
 0xfe0   :  { %7058 = vmatprep.mubr.msk.f32.mxu1 %vm2651_vm6, %v6528_v36  ;;  %7078 = vmatprep.mubr.msk.f32.mxu0 %vm2651_vm6, %v4890_v54 }
0x1097   :  { %v6906_v37 = vpop.f32.mrf.mxu1  ;;  %v6934_v38 = vpop.f32.mrf.mxu0 }
0x1099   :  { %v6907_v39 = vpop.f32.mrf.mxu1  ;;  %v6935_v41 = vpop.f32.mrf.mxu0 }
0x109a   :  { %v6908_v4 = vadd.f32 %v6907_v39, %v6906_v37  ;;  %v6936_v32 = vadd.f32 %v6935_v41, %v6934_v38 }
0x109b   :  { %v6909_v42 = vpop.f32.mrf.mxu1  ;;  %v6937_v44 = vpop.f32.mrf.mxu0 }
0x109d   :  { %v6910_v45 = vpop.f32.mrf.mxu1  ;;  %v6938_v11 = vpop.f32.mrf.mxu0 }
0x109e   :  { %v6911_v55 = vadd.f32 %v6910_v45, %v6909_v42  ;;  %v6939_v13 = vadd.f32 %v6938_v11, %v6937_v44 }
0x109f   :  { %v6912_v15 = vpop.f32.mrf.mxu1  ;;  %v6940_v48 = vpop.f32.mrf.mxu0 }
0x10a1   :  { %v6913_v40 = vpop.f32.mrf.mxu1  ;;  %v6941_v25 = vpop.f32.mrf.mxu0 }
0x10a2   :  { %v6914_v60 = vadd.f32 %v6913_v40, %v6912_v15  ;;  %v6942_v51 = vadd.f32 %v6941_v25, %v6940_v48 }
0x10a3   :  { %v6915_v49 = vpop.f32.mrf.mxu1  ;;  %v6943_v61 = vpop.f32.mrf.mxu0 }
0x10a5   :  { %v6916_v52 = vpop.f32.mrf.mxu1  ;;  %v6944_v57 = vpop.f32.mrf.mxu0 }
0x10a6   :  { %v6917_v20 = vadd.f32 %v6916_v52, %v6915_v49  ;;  %v6945_v47 = vadd.f32 %v6944_v57, %v6943_v61 }
0x10a8   :  { %7050 = vmatprep.subr.mxu1 %v6945_v47  ;;  %7070 = vmatprep.subr.mxu0 %v6917_v20 }
0x10a9   :  { %7051 = vmatpush3.msra.mxu1 %v6945_v47  ;;  %7071 = vmatpush3.msra.mxu0 %v6917_v20 }
0x10aa   :  { %7052 = vmatprep.subr.mxu1 %v6942_v51  ;;  %7072 = vmatprep.subr.mxu0 %v6914_v60 }
0x10ab   :  { %7053 = vmatpush3.msra.mxu1 %v6942_v51  ;;  %7073 = vmatpush3.msra.mxu0 %v6914_v60 }
0x10ac   :  { %7054 = vmatprep.subr.mxu1 %v6939_v13  ;;  %7074 = vmatprep.subr.mxu0 %v6911_v55 }
0x10ad   :  { %7055 = vmatpush3.msra.mxu1 %v6939_v13  ;;  %7075 = vmatpush3.msra.mxu0 %v6911_v55 }
0x10ae   :  { %7056 = vmatprep.subr.mxu1 %v6936_v32  ;;  %7076 = vmatprep.subr.mxu0 %v6908_v4 }
0x10af   :  { %7057 = vmatpush3.msra.mxu1 %v6936_v32  ;;  %7077 = vmatpush3.msra.mxu0 %v6908_v4 }
0x10b0   :  { %7059 = vmatmul.mubr.msk.f32.vlgmr.msra.gmra.mxu1 %vm2651_vm6, %v6529_v56  ;;  %6970 = vmatprep.subr.bf16.mxu1 %v7579_v12 }
0x10b1   :  { %6971 = vmatpush3.bf16.msra.mxu1 %v7580_v46  ;;  %7079 = vmatmul.mubr.msk.f32.vlgmr.msra.gmra.mxu0 %vm2651_vm6, %v4891_v5 }
0x10b2   :  { %7061 = vmatprep.mubr.msk.f32.mxu1 %vm2651_vm6, %v6530_v59  ;;  %6972 = vmatprep.subr.bf16.mxu1 %v7581_v6  ;;  %v7595_v59 = vld [vmem:[%s9421_s19 + $0x1f8] sm:$0xff]  }
0x10b3   :  { %7081 = vmatprep.mubr.msk.f32.mxu0 %vm2651_vm6, %v4892_v0  ;;  %v6601_v0 = vld [vmem:[%s9422_s20 + $0x88] sm:$0xff] }
0x10b4   :  { %7062 = vmatmul.mubr.msk.f32.gmra.mxu1 %vm2651_vm6, %v6531_v63  ;;  %v7596_v63 = vld [vmem:[%s9421_s19 + $0x1b8] sm:$0xff]  }
0x10b5   :  { %6973 = vmatpush3.bf16.msra.mxu1 %v7582_v1  ;;  %7064 = vmatprep.mubr.msk.f32.mxu1 %vm2651_vm6, %v6532_v62  ;;  %v6602_v1 = vld [vmem:[%s9422_s20 + $0x90] sm:$0xff] }
0x10b6   :  { %6974 = vmatprep.subr.bf16.mxu1 %v7583_v43  ;;  %7082 = vmatmul.mubr.msk.f32.gmra.mxu0 %vm2651_vm6, %v4893_v58  ;;  %v7597_v62 = vld [vmem:[%s9421_s19 + $0x1f0] sm:$0xff]   ;;  %v6603_v43 = vld [vmem:[%s9422_s20 + $0x98] sm:$0xff] }
0x10b7   :  { %7084 = vmatprep.mubr.msk.f32.mxu0 %vm2651_vm6, %v4894_v7  ;;  %v7598_v58 = vld [vmem:[%s9421_s19 + $0x1b0] sm:$0xff]   ;;  %v6604_v7 = vld [vmem:[%s9422_s20 + $0xa0] sm:$0xff] }
0x10b8   :  { %7065 = vmatmul.mubr.msk.f32.gmra.mxu1 %vm2651_vm6, %v6533_v8  ;;  %v7599_v8 = vld [vmem:[%s9421_s19 + $0x1e8] sm:$0xff]  }
0x10b9   :  { %6975 = vmatpush3.bf16.msra.mxu1 %v7584_v9  ;;  %7067 = vmatprep.mubr.msk.f32.mxu1 %vm2651_vm6, %v6534_v29  ;;  %v6605_v9 = vld [vmem:[%s9422_s20 + $0xa8] sm:$0xff] }
0x10ba   :  { %6976 = vmatprep.subr.bf16.mxu1 %v7585_v14  ;;  %7085 = vmatmul.mubr.msk.f32.gmra.mxu0 %vm2651_vm6, %v4895_v28  ;;  %v7600_v29 = vld [vmem:[%s9421_s19 + $0x1a8] sm:$0xff]   ;;  %v6606_v14 = vld [vmem:[%s9422_s20 + $0xb0] sm:$0xff]  ;;  %v7601_v28 = vld [vmem:[%s9421_s19 + $0x1e0] sm:$0xff]  }
0x10bb   :  { %7087 = vmatprep.mubr.msk.f32.mxu0 %vm2651_vm6, %v4896_v16  ;;  %v6607_v16 = vld [vmem:[%s9422_s20 + $0xb8] sm:$0xff] }
0x10bc   :  { %7068 = vmatmul.mubr.msk.f32.gmra.mxu1 %vm2651_vm6, %v6535_v17  ;;  %v7602_v17 = vld [vmem:[%s9421_s19 + $0x1a0] sm:$0xff]  }
0x10bd   :  { %6977 = vmatpush3.bf16.msra.mxu1 %v7586_v18  ;;  %5504 = vmatprep.mubr.bf16.mxu1 %v9106_v53  ;;  %v7603_v18 = vld [vmem:[%s9421_s19 + $0x1d8] sm:$0xff]  }
0x10be   :  { %6978 = vmatprep.subr.bf16.mxu1 %v7587_v50  ;;  %7088 = vmatmul.mubr.msk.f32.gmra.mxu0 %vm2651_vm6, %v4897_v2  ;;  %v7604_v50 = vld [vmem:[%s9421_s19 + $0x198] sm:$0xff]   ;;  %v7605_v2 = vld [vmem:[%s9421_s19 + $0x1d0] sm:$0xff]  }
0x10bf   :  { %7098 = vmatprep.mubr.msk.f32.mxu0 %vm2651_vm6, %v6600_v30 }
0x10c1   :  { %6979 = vmatpush3.bf16.msra.mxu1 %v7588_v10  ;;  %v7606_v10 = vld [vmem:[%s9421_s19 + $0x190] sm:$0xff]  }
0x10c2   :  { %6980 = vmatprep.subr.bf16.mxu1 %v7589_v19  ;;  %v7607_v19 = vld [vmem:[%s9421_s19 + $0x1c8] sm:$0xff]  }
0x10c5   :  { %6981 = vmatpush3.bf16.msra.mxu1 %v7590_v21  ;;  %v7609_v21 = vld [vmem:[%s9421_s19 + $0x1c0] sm:$0xff]  }
0x10c6   :  { %6982 = vmatprep.subr.bf16.mxu1 %v7591_v22  ;;  %v7610_v22 = vld [vmem:[%s9421_s19 + $0x180] sm:$0xff]  }
0x10c9   :  { %6983 = vmatpush3.bf16.msra.mxu1 %v7592_v23  ;;  %v6664_v23 = vld [vmem:[%s9422_s20 + $0xc0] sm:$0xff] }
0x10ca   :  { %6984 = vmatprep.subr.bf16.mxu1 %v7593_v24 }
0x10cd   :  { %6985 = vmatpush3.bf16.msra.mxu1 %v7594_v26 }
0x10d0   :  { %5505 = vmatmul.mubr.bf16.vlgmr.msra.gmra.mxu1 %v9108_v27 }
0x10d1   :  { %5512 = vmatprep.mubr.bf16.mxu1 %v9112_v3 }
0x10d8   :  { %5513 = vmatmul.mubr.bf16.gmra.mxu1 %v9118_v35 }
0x10d9   :  { %7118 = vmatprep.mubr.msk.f32.mxu1 %vm2651_vm6, %v6664_v23 }
0x1170   :  { %v7060_v31 = vpop.f32.mrf.mxu1 }
0x1171   :  { %v7080_v33 = vpop.f32.mrf.mxu0 }
0x1172   :  { %v9242_v34 = vadd.f32 %v7080_v33, %v7060_v31  ;;  %v5175_v36 = vpop.f32.mrf.mxu1 }
0x1173   :  { %v5304_v54 = vpop.f32.mrf.mxu0 }
0x1174   :  { %v9244_v37 = vadd.f32 %v5304_v54, %v5175_v36  ;;  %v7063_v38 = vpop.f32.mrf.mxu1 }
0x1176   :  { %v7083_v39 = vpop.f32.mrf.mxu0  ;;  %v5185_v41 = vpop.f32.mrf.mxu1 }
0x1177   :  { %v9246_v42 = vadd.f32 %v7083_v39, %v7063_v38 }
0x1178   :  { %v5314_v44 = vpop.f32.mrf.mxu0  ;;  %v7066_v45 = vpop.f32.mrf.mxu1 }
0x1179   :  { %v9248_v11 = vadd.f32 %v5314_v44, %v5185_v41 }
0x117a   :  { %v7086_v15 = vpop.f32.mrf.mxu0  ;;  %v5195_v48 = vpop.f32.mrf.mxu1 }
0x117b   :  { %v9250_v40 = vadd.f32 %v7086_v15, %v7066_v45 }
0x117c   :  { %v5324_v25 = vpop.f32.mrf.mxu0  ;;  %v7069_v61 = vpop.f32.mrf.mxu1 }
0x117d   :  { %v9252_v49 = vadd.f32 %v5324_v25, %v5195_v48 }
0x117e   :  { %v7089_v52 = vpop.f32.mrf.mxu0  ;;  %v9256_v20 = vpop.f32.mrf.mxu1 }
0x117f   :  { %v9254_v57 = vadd.f32 %v7089_v52, %v7069_v61 }
0x1180   :  { %v5334_v24 = vpop.f32.mrf.mxu0 }
0x1181   :  { %v5335_v45 = vadd.f32 %v5334_v24, %v9256_v20 }
0x1190   :  { %v6986_v47 = vpop.f32.mrf.mxu1 }
0x1192   :  { %v6987_v60 = vpop.f32.mrf.mxu1 }
0x1193   :  { %v6988_v6 = vadd.f32 %v6987_v60, %v6986_v47 }
0x1194   :  { %v6989_v51 = vpop.f32.mrf.mxu1 }
0x1196   :  { %v6990_v55 = vpop.f32.mrf.mxu1 }
0x1197   :  { %v6991_v5 = vadd.f32 %v6990_v55, %v6989_v51  ;;  %v6666_v55 = vld [vmem:[%s9422_s20 + $0xd0] sm:$0xff] }
0x1198   :  { %v6992_v13 = vpop.f32.mrf.mxu1 }
0x119a   :  { %v6993_v4 = vpop.f32.mrf.mxu1 }
0x119b   :  { %v6994_v46 = vadd.f32 %v6993_v4, %v6992_v13  ;;  %v6667_v13 = vld [vmem:[%s9422_s20 + $0xd8] sm:$0xff]  ;;  %v6668_v4 = vld [vmem:[%s9422_s20 + $0xe0] sm:$0xff] }
0x119c   :  { %v6995_v32 = vpop.f32.mrf.mxu1 }
0x119e   :  { %v6996_v12 = vpop.f32.mrf.mxu1 }
0x119f   :  { %v6997_v56 = vadd.f32 %v6996_v12, %v6995_v32  ;;  %v6669_v32 = vld [vmem:[%s9422_s20 + $0xe8] sm:$0xff]  ;;  %v6670_v12 = vld [vmem:[%s9422_s20 + $0xf0] sm:$0xff] }
0x11a1   :  { %7090 = vmatprep.subr.mxu0 %v6997_v56 }
0x11a2   :  { %7091 = vmatpush3.msra.mxu0 %v6997_v56  ;;  %v6671_v56 = vld [vmem:[%s9422_s20 + $0xf8] sm:$0xff] }
0x11a3   :  { %7092 = vmatprep.subr.mxu0 %v6994_v46 }
0x11a4   :  { %7093 = vmatpush3.msra.mxu0 %v6994_v46 }
0x11a5   :  { %7094 = vmatprep.subr.mxu0 %v6991_v5 }
0x11a6   :  { %7095 = vmatpush3.msra.mxu0 %v6991_v5 }
0x11a7   :  { %7096 = vmatprep.subr.mxu0 %v6988_v6 }
0x11a8   :  { %7097 = vmatpush3.msra.mxu0 %v6988_v6 }
0x11a9   :  { %7099 = vmatmul.mubr.msk.f32.vlgmr.msra.gmra.mxu0 %vm2651_vm6, %v6601_v0  ;;  %7010 = vmatprep.subr.bf16.mxu0 %v7595_v59 }
0x11aa   :  { %7011 = vmatpush3.bf16.msra.mxu0 %v7596_v63  ;;  %7101 = vmatprep.mubr.msk.f32.mxu0 %vm2651_vm6, %v6602_v1 }
0x11ab   :  { %7012 = vmatprep.subr.bf16.mxu0 %v7597_v62 }
0x11ad   :  { %7102 = vmatmul.mubr.msk.f32.gmra.mxu0 %vm2651_vm6, %v6603_v43 }
0x11ae   :  { %7013 = vmatpush3.bf16.msra.mxu0 %v7598_v58  ;;  %7104 = vmatprep.mubr.msk.f32.mxu0 %vm2651_vm6, %v6604_v7 }
0x11af   :  { %7014 = vmatprep.subr.bf16.mxu0 %v7599_v8 }
0x11b1   :  { %7105 = vmatmul.mubr.msk.f32.gmra.mxu0 %vm2651_vm6, %v6605_v9 }
0x11b2   :  { %7015 = vmatpush3.bf16.msra.mxu0 %v7600_v29  ;;  %7107 = vmatprep.mubr.msk.f32.mxu0 %vm2651_vm6, %v6606_v14 }
0x11b3   :  { %7016 = vmatprep.subr.bf16.mxu0 %v7601_v28 }
0x11b5   :  { %7108 = vmatmul.mubr.msk.f32.gmra.mxu0 %vm2651_vm6, %v6607_v16 }
0x11b6   :  { %7017 = vmatpush3.bf16.msra.mxu0 %v7602_v17  ;;  %5828 = vmatprep.mubr.bf16.mxu0 %v9106_v53  ;;  %v7608_v53 = vld [vmem:[%s9421_s19 + $0x188] sm:$0xff]  }
0x11b7   :  { %7018 = vmatprep.subr.bf16.mxu0 %v7603_v18 }
0x11ba   :  { %7019 = vmatpush3.bf16.msra.mxu0 %v7604_v50 }
0x11bb   :  { %7020 = vmatprep.subr.bf16.mxu0 %v7605_v2 }
0x11be   :  { %7021 = vmatpush3.bf16.msra.mxu0 %v7606_v10 }
0x11bf   :  { %7022 = vmatprep.subr.bf16.mxu0 %v7607_v19 }
0x11c2   :  { %7023 = vmatpush3.bf16.msra.mxu0 %v7608_v53 }
0x11c3   :  { %7024 = vmatprep.subr.bf16.mxu0 %v7609_v21 }
0x11c6   :  { %7025 = vmatpush3.bf16.msra.mxu0 %v7610_v22 }
0x11c9   :  { %5829 = vmatmul.mubr.bf16.vlgmr.msra.gmra.mxu0 %v9108_v27 }
0x11ca   :  { %5836 = vmatprep.mubr.bf16.mxu0 %v9112_v3 }
0x11d1   :  { %5837 = vmatmul.mubr.bf16.gmra.mxu0 %v9118_v35 }
0x1269   :  { %v7100_v26 = vpop.f32.mrf.mxu0 }
0x126a   :  { %v5660_v30 = vadd.f32 %v7100_v26, %v9242_v34 }
0x126b   :  { %v5620_v31 = vpop.f32.mrf.mxu0 }
0x126c   :  { %v5659_v33 = vadd.f32 %v5620_v31, %v9244_v37 }
0x126d   :  { %v7103_v36 = vpop.f32.mrf.mxu0 }
0x126e   :  { %v5662_v27 = vadd.f32 %v7103_v36, %v9246_v42 }
0x126f   :  { %v5630_v54 = vpop.f32.mrf.mxu0 }
0x1270   :  { %v5661_v3 = vadd.f32 %v5630_v54, %v9248_v11 }
0x1271   :  { %v7106_v35 = vpop.f32.mrf.mxu0 }
0x1272   :  { %v5664_v38 = vadd.f32 %v7106_v35, %v9250_v40 }
0x1273   :  { %v5640_v39 = vpop.f32.mrf.mxu0 }
0x1274   :  { %v5663_v41 = vadd.f32 %v5640_v39, %v9252_v49 }
0x1275   :  { %v7109_v44 = vpop.f32.mrf.mxu0 }
0x1276   :  { %v5666_v34 = vadd.f32 %v7109_v44, %v9254_v57  ;;  %v6665_v57 = vld [vmem:[%s9422_s20 + $0xc8] sm:$0xff] }
0x1277   :  { %v5650_v15 = vpop.f32.mrf.mxu0 }
0x1278   :  { %v5665_v48 = vadd.f32 %v5650_v15, %v5335_v45 }
0x1289   :  { %v7026_v37 = vpop.f32.mrf.mxu0 }
0x128b   :  { %v7027_v25 = vpop.f32.mrf.mxu0 }
0x128c   :  { %v7028_v20 = vadd.f32 %v7027_v25, %v7026_v37 }
0x128d   :  { %v7029_v61 = vpop.f32.mrf.mxu0 }
0x128f   :  { %v7030_v42 = vpop.f32.mrf.mxu0 }
0x1290   :  { %v7031_v49 = vadd.f32 %v7030_v42, %v7029_v61 }
0x1291   :  { %v7032_v52 = vpop.f32.mrf.mxu0 }
0x1293   :  { %v7033_v47 = vpop.f32.mrf.mxu0 }
0x1294   :  { %v7034_v40 = vadd.f32 %v7033_v47, %v7032_v52 }
0x1295   :  { %v7035_v11 = vpop.f32.mrf.mxu0 }
0x1297   :  { %v7036_v60 = vpop.f32.mrf.mxu0 }
0x1298   :  { %v7037_v51 = vadd.f32 %v7036_v60, %v7035_v11 }
0x129a   :  { %7110 = vmatprep.subr.mxu1 %v7037_v51 }
0x129b   :  { %7111 = vmatpush3.msra.mxu1 %v7037_v51 }
0x129c   :  { %7112 = vmatprep.subr.mxu1 %v7034_v40 }
0x129d   :  { %7113 = vmatpush3.msra.mxu1 %v7034_v40 }
0x129e   :  { %7114 = vmatprep.subr.mxu1 %v7031_v49 }
0x129f   :  { %7115 = vmatpush3.msra.mxu1 %v7031_v49 }
0x12a0   :  { %7116 = vmatprep.subr.mxu1 %v7028_v20 }
0x12a1   :  { %7117 = vmatpush3.msra.mxu1 %v7028_v20 }
0x12a2   :  { %7119 = vmatmul.mubr.msk.f32.vlgmr.msra.gmra.mxu1 %vm2651_vm6, %v6665_v57 }
0x12a3   :  { %7121 = vmatprep.mubr.msk.f32.mxu1 %vm2651_vm6, %v6666_v55 }
0x12a6   :  { %7122 = vmatmul.mubr.msk.f32.gmra.mxu1 %vm2651_vm6, %v6667_v13 }
0x12a7   :  { %7124 = vmatprep.mubr.msk.f32.mxu1 %vm2651_vm6, %v6668_v4 }
0x12aa   :  { %7125 = vmatmul.mubr.msk.f32.gmra.mxu1 %vm2651_vm6, %v6669_v32 }
0x12ab   :  { %7127 = vmatprep.mubr.msk.f32.mxu1 %vm2651_vm6, %v6670_v12 }
0x12ae   :  { %7128 = vmatmul.mubr.msk.f32.gmra.mxu1 %vm2651_vm6, %v6671_v56 }
0x1362   :  { %v7120_v46 = vpop.f32.mrf.mxu1 }
0x1363   :  { %v5984_v5 = vadd.f32 %v7120_v46, %v5660_v30 }
0x1364   :  { %v5944_v6 = vpop.f32.mrf.mxu1 }
0x1365   :  { %7623 = vtanh.f32 %v5984_v5  ;;  %v5983_v59 = vadd.f32 %v5944_v6, %v5659_v33 }
0x1366   :  { %v7123_v0 = vpop.f32.mrf.mxu1 }
0x1367   :  { %7625 = vtanh.f32 %v5983_v59  ;;  %v5986_v63 = vadd.f32 %v7123_v0, %v5662_v27 }
0x1368   :  { %v5954_v1 = vpop.f32.mrf.mxu1 }
0x1369   :  { %7627 = vtanh.f32 %v5986_v63  ;;  %v5985_v62 = vadd.f32 %v5954_v1, %v5661_v3 }
0x136a   :  { %v7126_v43 = vpop.f32.mrf.mxu1 }
0x136b   :  { %7629 = vtanh.f32 %v5985_v62  ;;  %v5988_v58 = vadd.f32 %v7126_v43, %v5664_v38 }
0x136c   :  { %v5964_v7 = vpop.f32.mrf.mxu1 }
0x136d   :  { %7631 = vtanh.f32 %v5988_v58  ;;  %v5987_v8 = vadd.f32 %v5964_v7, %v5663_v41 }
0x136e   :  { %v7129_v9 = vpop.f32.mrf.mxu1 }
0x136f   :  { %7633 = vtanh.f32 %v5987_v8  ;;  %v5990_v29 = vadd.f32 %v7129_v9, %v5666_v34 }
0x1370   :  { %v5974_v14 = vpop.f32.mrf.mxu1 }
0x1371   :  { %7635 = vtanh.f32 %v5990_v29  ;;  %v5989_v28 = vadd.f32 %v5974_v14, %v5665_v48 }
0x1372   :  { %v7624_v16 = vpop.eup %7623 }
0x1373   :  { %6000 = vst [vmem:[%s9423_s21 + $0x8] sm:$0xff] %v7624_v16  ;;  %7637 = vtanh.f32 %v5989_v28 }
0x1374   :  { %v7626_v17 = vpop.eup %7625 }
0x1375   :  { %5999 = vst [vmem:[%s9423_s21] sm:$0xff] %v7626_v17 }
0x1376   :  { %v7628_v18 = vpop.eup %7627 }
0x1377   :  { %6002 = vst [vmem:[%s9423_s21 + $0x18] sm:$0xff] %v7628_v18 }
0x1378   :  { %v7630_v50 = vpop.eup %7629 }
0x1379   :  { %6001 = vst [vmem:[%s9423_s21 + $0x10] sm:$0xff] %v7630_v50 }
0x137a   :  { %v7632_v2 = vpop.eup %7631 }
0x137b   :  { %6004 = vst [vmem:[%s9423_s21 + $0x28] sm:$0xff] %v7632_v2 }
0x137c   :  { %v7634_v10 = vpop.eup %7633 }
0x137d   :  { %6003 = vst [vmem:[%s9423_s21 + $0x20] sm:$0xff] %v7634_v10 }
0x137e   :  { %v7636_v19 = vpop.eup %7635 }
0x137f   :  { %6006 = vst [vmem:[%s9423_s21 + $0x38] sm:$0xff] %v7636_v19 }
0x1380   :  { %v7638_v53 = vpop.eup %7637 }
0x1381   :  { %6005 = vst [vmem:[%s9423_s21 + $0x30] sm:$0xff] %v7638_v53 }
0x1382   :  { %6011 = vsyncpa [#allocation3], 1 }
0x1383   :  { %6012 = vsyncpa [#allocation5], 1 }

</bundles_post_ra>
